<compile_context>
chip_gen: v7x
topology: tpu7x:2x2x1
jax: 0.10.0
libtpu: 0.0.40
codegen_flags: <defaults>
</compile_context>

<pallas_src>
import math
from functools import partial

import numpy as np
import jax
import jax.numpy as jnp
from jax.experimental import pallas as pl
from jax.experimental.pallas import tpu as pltpu

# ----------------------------- config (small ViT) -----------------------------
IMG, PATCH, IN_CHANS = 16, 4, 3
EMBED, DEPTH, HEADS = 32, 2, 4
MLP_RATIO = 4.0
NUM_CLASSES = 10
LN_EPS = 1e-6
NUM_PATCHES = (IMG // PATCH) ** 2          # 16
SEQ = NUM_PATCHES + 1                      # 17 (cls + patches)
SEQ_P = 24                                 # token axis padded to a multiple of 8
HEAD_DIM = EMBED // HEADS                  # 8
HIDDEN = int(EMBED * MLP_RATIO)            # 128
KDIM = IN_CHANS * PATCH * PATCH            # 48
NEG_INF = -1e30
BIAS_LANES = 128                           # one bias-slab row = one lane tile

# row offsets inside weight slab B (fc2 blocks | w_pe | w_head | head_mask)
W_PE_ROW = DEPTH * HIDDEN                  # 256
W_HEAD_ROW = W_PE_ROW + KDIM               # 304
HMASK_ROW = W_HEAD_ROW + EMBED             # 336


# ------------------------------ fused Pallas kernel ----------------------------

def _vit_fused_kernel(target_ref, patches_ref, posbias_ref, attn_bias_ref,
                      wa_ref, wb_ref, bias_ref, loss_ref, pred_ref, *, batch_group):
    BG = batch_group
    T = BG * SEQ_P
    E = EMBED
    HT = HEADS * T
    g = pl.program_id(0)

    def layer_norm(x, gam, bet):
        mu = jnp.mean(x, axis=-1, keepdims=True)
        xc = x - mu
        var = jnp.mean(xc * xc, axis=-1, keepdims=True)   # biased var (torch LN)
        return xc * jax.lax.rsqrt(var + LN_EPS) * gam + bet

    def gelu(x):
        # TODO(synk): PyTorch nn.GELU() default is exact erf; tanh approximation used here.
        c = 0.7978845608028654  # sqrt(2/pi)
        return 0.5 * x * (1.0 + jnp.tanh(c * (x + 0.044715 * x * x * x)))

    # Loop-invariant loads (hoisted before the unrolled depth loop).
    head_mask = wb_ref[HMASK_ROW:HMASK_ROW + HT, :]        # (HT, E) block-diag head selector
    bias_all = attn_bias_ref[...]                          # (T, HT) head-tiled additive bias
    w_pe = wb_ref[W_PE_ROW:W_PE_ROW + KDIM, :]

    # Patch embedding (conv-as-matmul). posbias already carries the conv bias,
    # the positional embedding and the (cls + pos[0]) row; padded rows stay 0.
    xf = jnp.dot(patches_ref[...], w_pe,
                 preferred_element_type=jnp.float32) + posbias_ref[...]          # (T, E)

    for d in range(DEPTH):
        r0 = d * E
        w_qkv = wa_ref[r0:r0 + E, 0:3 * E]          # Q columns pre-scaled by 1/sqrt(hd)
        w_proj = wa_ref[r0:r0 + E, 3 * E:4 * E]
        w_fc1 = wa_ref[r0:r0 + E, 4 * E:4 * E + HIDDEN]
        w_fc2 = wb_ref[d * HIDDEN:(d + 1) * HIDDEN, :]
        br = 4 * d
        ln1_g = bias_ref[br:br + 1, 0:E]
        ln1_b = bias_ref[br:br + 1, E:2 * E]
        ln2_g = bias_ref[br:br + 1, 2 * E:3 * E]
        ln2_b = bias_ref[br:br + 1, 3 * E:4 * E]
        b_qkv = bias_ref[br + 1:br + 2, 0:3 * E]
        b_proj = bias_ref[br + 1:br + 2, 3 * E:4 * E]
        b_fc1 = bias_ref[br + 2:br + 3, 0:HIDDEN]
        b_fc2 = bias_ref[br + 3:br + 4, 0:E]

        # --- attention: all heads in one pass via block-diagonal K / V stacks ---
        h1 = layer_norm(xf, ln1_g, ln1_b)
        qkv = jnp.dot(h1, w_qkv, preferred_element_type=jnp.float32) + b_qkv     # (T, 3E)
        q = qkv[:, 0:E]
        kb = jnp.concatenate([qkv[:, E:2 * E]] * HEADS, axis=0) * head_mask      # (HT, E)
        vb = jnp.concatenate([qkv[:, 2 * E:3 * E]] * HEADS, axis=0) * head_mask  # (HT, E)
        s = jax.lax.dot_general(q, kb, (((1,), (1,)), ((), ())),
                                preferred_element_type=jnp.float32) + bias_all   # (T, HT)
        m = jnp.max(s, axis=-1, keepdims=True)     # global max across heads (stable)
        p = jnp.exp(s - m)                         # single lane-dense EUP pass
        denom = jnp.concatenate(
            [jnp.sum(p[:, h * T:(h + 1) * T], axis=-1, keepdims=True)
             for h in range(HEADS)], axis=-1)                                    # (T, HEADS)
        inv = pl.reciprocal(denom, approx=True)
        p = jnp.concatenate(
            [p[:, h * T:(h + 1) * T] * inv[:, h:h + 1] for h in range(HEADS)], axis=1)
        # fold the output projection:  vp row-block h = V_h @ Wproj[h]
        vp = jnp.dot(vb, w_proj, preferred_element_type=jnp.float32)             # (HT, E)
        xf = xf + jnp.dot(p, vp, preferred_element_type=jnp.float32) + b_proj

        # --- mlp branch ---
        h2 = layer_norm(xf, ln2_g, ln2_b)
        h2 = gelu(jnp.dot(h2, w_fc1, preferred_element_type=jnp.float32) + b_fc1)
        xf = xf + jnp.dot(h2, w_fc2, preferred_element_type=jnp.float32) + b_fc2

    # --- final norm, cls head, cross-entropy (logits stay in registers) ---
    fr = 4 * DEPTH
    norm_g = bias_ref[fr:fr + 1, 0:E]
    norm_b = bias_ref[fr:fr + 1, E:2 * E]
    b_head = bias_ref[fr:fr + 1, 2 * E:2 * E + NUM_CLASSES]
    w_head = wb_ref[W_HEAD_ROW:W_HEAD_ROW + E, 0:NUM_CLASSES]

    xn = layer_norm(xf, norm_g, norm_b)
    # TODO(synk): nn.Dropout(p=0.9) on the cls latent is stochastic (train mode); identity here.
    lat = jnp.concatenate([xn[i * SEQ_P:i * SEQ_P + 1, :] for i in range(BG)], axis=0)
    logits = jnp.dot(lat, w_head, preferred_element_type=jnp.float32) + b_head   # (BG, C)
    pred_ref[...] = logits.reshape(1, BG, NUM_CLASSES)                           # single store

    mx = jnp.max(logits, axis=-1, keepdims=True)
    lse = mx + jnp.log(jnp.sum(jnp.exp(logits - mx), axis=-1, keepdims=True))    # (BG, 1)
    ids = jax.lax.broadcasted_iota(jnp.int32, (BG, NUM_CLASSES), 1)
    picked = jnp.zeros((), jnp.float32)
    for i in range(BG):
        t = target_ref[g * BG + i]                 # scalar from SMEM prefetch
        onehot = (ids[i:i + 1, :] == t).astype(jnp.float32)
        picked = picked + jnp.sum(onehot * logits[i:i + 1, :])
    loss_ref[...] = jnp.reshape(jnp.sum(lse) - picked, (1, 1, 1))   # per-group CE sum


# ------------------------- 2D sin-cos positional embed -------------------------

def _get_1d_sincos(embed_dim, pos):
    omega = np.arange(embed_dim // 2, dtype=np.float64)
    omega /= embed_dim / 2.0
    omega = 1.0 / 10000 ** omega
    out = np.einsum("m,d->md", pos.reshape(-1), omega)
    return np.concatenate([np.sin(out), np.cos(out)], axis=1)


def get_2d_sincos_pos_embed(embed_dim, grid_size, cls_token=False):
    grid_h = np.arange(grid_size, dtype=np.float64)
    grid_w = np.arange(grid_size, dtype=np.float64)
    grid = np.meshgrid(grid_w, grid_h)
    grid = np.stack(grid, axis=0).reshape([2, 1, grid_size, grid_size])
    emb_h = _get_1d_sincos(embed_dim // 2, grid[0])
    emb_w = _get_1d_sincos(embed_dim // 2, grid[1])
    pe = np.concatenate([emb_h, emb_w], axis=1)
    if cls_token:
        pe = np.concatenate([np.zeros([1, embed_dim]), pe], axis=0)
    return pe.astype(np.float32)


# ------------------------------ parameter init ---------------------------------

def _xavier(key, fan_in, fan_out):
    a = math.sqrt(6.0 / (fan_in + fan_out))
    return jax.random.uniform(key, (fan_in, fan_out), jnp.float32, -a, a)


def init_params(key):
    E, D = EMBED, HIDDEN
    keys = jax.random.split(key, DEPTH + 3)
    k_pe, k_cls, k_head = keys[0], keys[1], keys[2]
    params = {
        "w_pe": _xavier(k_pe, KDIM, E),
        "b_pe": jnp.zeros((E,), jnp.float32),
        "cls_token": 0.02 * jax.random.normal(k_cls, (1, 1, E), jnp.float32),
        "pos_embed": jnp.asarray(
            get_2d_sincos_pos_embed(E, IMG // PATCH, cls_token=True))[None],
        "norm_g": jnp.ones((E,), jnp.float32),
        "norm_b": jnp.zeros((E,), jnp.float32),
        "w_head": _xavier(k_head, E, NUM_CLASSES),
        "b_head": jnp.zeros((NUM_CLASSES,), jnp.float32),
        "blocks": [],
    }
    for i in range(DEPTH):
        kq, kp, k1, k2 = jax.random.split(keys[3 + i], 4)
        params["blocks"].append({
            "ln1_g": jnp.ones((E,), jnp.float32), "ln1_b": jnp.zeros((E,), jnp.float32),
            "ln2_g": jnp.ones((E,), jnp.float32), "ln2_b": jnp.zeros((E,), jnp.float32),
            "w_qkv": _xavier(kq, E, 3 * E), "b_qkv": jnp.zeros((3 * E,), jnp.float32),
            "w_proj": _xavier(kp, E, E),    "b_proj": jnp.zeros((E,), jnp.float32),
            "w_fc1": _xavier(k1, E, D),     "b_fc1": jnp.zeros((D,), jnp.float32),
            "w_fc2": _xavier(k2, D, E),     "b_fc2": jnp.zeros((E,), jnp.float32),
        })
    return params


# --------------------------------- wrapper --------------------------------------

def _build_attn_bias(bg):
    """(T, HEADS*T) additive bias: block-diag over sequences, -1e30 on padded keys,
    already replicated along the head-stacked key axis."""
    tok = np.arange(bg * SEQ_P)
    same_seq = (tok[:, None] // SEQ_P) == (tok[None, :] // SEQ_P)
    key_real = (tok[None, :] % SEQ_P) < SEQ
    bias = np.where(same_seq & key_real, 0.0, NEG_INF).astype(np.float32)
    return jnp.asarray(np.tile(bias, (1, HEADS)))


def _build_head_mask(bg):
    """(HEADS*T, E) 0/1 selector: row-block h keeps only head-h feature columns."""
    t = bg * SEQ_P
    m = np.zeros((HEADS * t, EMBED), np.float32)
    for h in range(HEADS):
        m[h * t:(h + 1) * t, h * HEAD_DIM:(h + 1) * HEAD_DIM] = 1.0
    return jnp.asarray(m)


@jax.jit
def vit_forward(params, imgs, target):
    B, C, H, W = imgs.shape
    gh, gw = H // PATCH, W // PATCH
    Np = gh * gw
    NB = 2 if (B % 2 == 0 and B >= 2) else 1      # batch groups (2 -> both TCs on v7x)
    BG = B // NB
    T = BG * SEQ_P
    scale = float(HEAD_DIM) ** -0.5

    # im2col patch extraction + token-axis padding (layout plumbing only).
    patches = imgs.reshape(B, C, gh, PATCH, gw, PATCH)
    patches = patches.transpose(0, 2, 4, 1, 3, 5).reshape(B, Np, KDIM)
    patches = jnp.pad(patches, ((0, 0), (1, SEQ_P - 1 - Np), (0, 0)))  # cls row + pad rows
    patches = patches.reshape(B * SEQ_P, KDIM)

    # Fold conv bias + positional embedding + (cls + pos[0]) into one per-sequence table.
    pos = params["pos_embed"][0]                               # (SEQ, E)
    cls_row = params["cls_token"].reshape(1, EMBED) + pos[:1]
    patch_rows = params["b_pe"].reshape(1, EMBED) + pos[1:]
    pad_rows = jnp.zeros((SEQ_P - SEQ, EMBED), jnp.float32)
    posbias = jnp.tile(jnp.concatenate([cls_row, patch_rows, pad_rows], axis=0), (BG, 1))

    attn_bias = _build_attn_bias(BG)                           # (T, HEADS*T)

    # ---- pack all parameters into 3 contiguous slabs (few DMAs instead of ~40) ----
    def pad_lanes(v, n):
        return jnp.pad(v, (0, n - v.shape[0]))

    wa_rows, wb_rows, bias_rows = [], [], []
    for blk in params["blocks"]:
        w_qkv = blk["w_qkv"].at[:, :EMBED].multiply(scale)     # fold 1/sqrt(hd) into Q
        b_qkv = blk["b_qkv"].at[:EMBED].multiply(scale)
        wa_rows.append(jnp.concatenate([w_qkv, blk["w_proj"], blk["w_fc1"]], axis=1))
        wb_rows.append(blk["w_fc2"])
        bias_rows.append(jnp.concatenate([blk["ln1_g"], blk["ln1_b"],
                                          blk["ln2_g"], blk["ln2_b"]]))
        bias_rows.append(jnp.concatenate([b_qkv, blk["b_proj"]]))
        bias_rows.append(blk["b_fc1"])
        bias_rows.append(pad_lanes(blk["b_fc2"], BIAS_LANES))
    wb_rows.append(params["w_pe"])
    wb_rows.append(jnp.pad(params["w_head"], ((0, 0), (0, EMBED - NUM_CLASSES))))
    wb_rows.append(_build_head_mask(BG))
    bias_rows.append(pad_lanes(jnp.concatenate([params["norm_g"], params["norm_b"],
                                                params["b_head"]]), BIAS_LANES))

    wa = jnp.concatenate(wa_rows, axis=0)        # (DEPTH*E, 4E+HIDDEN)  = (64, 256)
    wb = jnp.concatenate(wb_rows, axis=0)        # (DEPTH*HIDDEN+KDIM+E+HEADS*T, E)
    bias_slab = jnp.stack(bias_rows, axis=0)     # (4*DEPTH+1, 128)

    grid_spec = pltpu.PrefetchScalarGridSpec(
        num_scalar_prefetch=1,                   # target -> SMEM
        grid=(NB,),
        in_specs=[
            pl.BlockSpec((T, KDIM), lambda g, tgt: (g, 0)),       # patches (per group)
            pl.BlockSpec((T, EMBED), lambda g, tgt: (0, 0)),      # posbias (shared)
            pl.BlockSpec(attn_bias.shape, lambda g, tgt: (0, 0)),  # attention bias (shared)
            pl.BlockSpec(wa.shape, lambda g, tgt: (0, 0)),        # weight slab A (shared)
            pl.BlockSpec(wb.shape, lambda g, tgt: (0, 0)),        # weight slab B (shared)
            pl.BlockSpec(bias_slab.shape, lambda g, tgt: (0, 0)),  # bias slab (shared)
        ],
        out_specs=(
            pl.BlockSpec((1, 1, 1), lambda g, tgt: (g, 0, 0)),              # per-group loss sum
            pl.BlockSpec((1, BG, NUM_CLASSES), lambda g, tgt: (g, 0, 0)),   # per-group logits
        ),
    )

    loss_groups, pred_groups = pl.pallas_call(
        partial(_vit_fused_kernel, batch_group=BG),
        grid_spec=grid_spec,
        out_shape=(jax.ShapeDtypeStruct((NB, 1, 1), jnp.float32),
                   jax.ShapeDtypeStruct((NB, BG, NUM_CLASSES), jnp.float32)),
        compiler_params=pltpu.CompilerParams(
            dimension_semantics=("parallel",)),   # batch groups -> both TensorCores on v7x
    )(target.astype(jnp.int32), patches, posbias, attn_bias, wa, wb, bias_slab)

    loss = jnp.sum(loss_groups) / B               # mean cross-entropy over the batch
    pred = pred_groups.reshape(B, NUM_CLASSES)
    return loss, pred


# ---------------------------------- main ----------------------------------------

if __name__ == "__main__":
    key = jax.random.PRNGKey(0)
    k_img, k_tgt, k_par = jax.random.split(key, 3)

    imgs = jax.random.normal(k_img, (2, IN_CHANS, IMG, IMG), jnp.float32)   # NCHW
    target = jax.random.randint(k_tgt, (2,), 0, NUM_CLASSES).astype(jnp.int32)
    params = init_params(k_par)

    loss, pred = vit_forward(params, imgs, target)
    jax.block_until_ready((loss, pred))
    assert pred.shape == (2, NUM_CLASSES) and loss.shape == ()
    print("KERNEL_OK")
</pallas_src>

<mosaic_0001>
module attributes {stable_mosaic.version = 11 : i64} {
  func.func @_vit_fused_kernel(%arg0: i32, %arg1: memref<2xi32, #tpu.memory_space<smem>>, %arg2: memref<24x48xf32, #tpu.memory_space<vmem>>, %arg3: memref<24x32xf32, #tpu.memory_space<vmem>>, %arg4: memref<24x96xf32, #tpu.memory_space<vmem>>, %arg5: memref<64x256xf32, #tpu.memory_space<vmem>>, %arg6: memref<432x32xf32, #tpu.memory_space<vmem>>, %arg7: memref<9x128xf32, #tpu.memory_space<vmem>>, %arg8: memref<1x1x1xf32, #tpu.memory_space<vmem>>, %arg9: memref<1x1x10xf32, #tpu.memory_space<vmem>>) attributes {dimension_semantics = [#tpu.dimension_semantics<parallel>], iteration_bounds = array<i64: 2>, scalar_prefetch = 1 : i64, scratch_operands = 0 : i64, tpu.core_type = #tpu.core_type<tc>, window_params = [{transform_indices = @transform_0, window_bounds = array<i64: 24, 48>}, {pipeline_mode = #tpu.pipeline_mode<synchronous>, transform_indices = @transform_1, window_bounds = array<i64: 24, 32>}, {pipeline_mode = #tpu.pipeline_mode<synchronous>, transform_indices = @transform_2, window_bounds = array<i64: 24, 96>}, {pipeline_mode = #tpu.pipeline_mode<synchronous>, transform_indices = @transform_3, window_bounds = array<i64: 64, 256>}, {pipeline_mode = #tpu.pipeline_mode<synchronous>, transform_indices = @transform_4, window_bounds = array<i64: 432, 32>}, {pipeline_mode = #tpu.pipeline_mode<synchronous>, transform_indices = @transform_5, window_bounds = array<i64: 9, 128>}, {transform_indices = @transform_6, window_bounds = array<i64: 1, 1, 1>}, {transform_indices = @transform_7, window_bounds = array<i64: 1, 1, 10>}]} {
    %c336 = arith.constant 336 : index
    %c0 = arith.constant 0 : index
    %0 = vector.load %arg6[%c336, %c0] : memref<432x32xf32, #tpu.memory_space<vmem>>, vector<96x32xf32>
    %c0_0 = arith.constant 0 : index
    %c0_1 = arith.constant 0 : index
    %1 = vector.load %arg4[%c0_0, %c0_1] : memref<24x96xf32, #tpu.memory_space<vmem>>, vector<24x96xf32>
    %c256 = arith.constant 256 : index
    %c0_2 = arith.constant 0 : index
    %2 = vector.load %arg6[%c256, %c0_2] : memref<432x32xf32, #tpu.memory_space<vmem>>, vector<48x32xf32>
    %c0_3 = arith.constant 0 : index
    %c0_4 = arith.constant 0 : index
    %3 = vector.load %arg2[%c0_3, %c0_4] : memref<24x48xf32, #tpu.memory_space<vmem>>, vector<24x48xf32>
    %cst = arith.constant dense<0.000000e+00> : vector<24x32xf32>
    %4 = tpu.matmul %3, %2, %cst {dimension_numbers = #tpu.dot_dimension_numbers<[1], [0], [0], [1], [0, 0, 1, 1], [], []>} : vector<24x48xf32>, vector<48x32xf32>, vector<24x32xf32> -> vector<24x32xf32>
    %c0_5 = arith.constant 0 : index
    %c0_6 = arith.constant 0 : index
    %5 = vector.load %arg3[%c0_5, %c0_6] : memref<24x32xf32, #tpu.memory_space<vmem>>, vector<24x32xf32>
    %6 = arith.addf %4, %5 : vector<24x32xf32>
    %c0_7 = arith.constant 0 : index
    %c0_8 = arith.constant 0 : index
    %7 = vector.load %arg5[%c0_7, %c0_8] : memref<64x256xf32, #tpu.memory_space<vmem>>, vector<32x96xf32>
    %c0_9 = arith.constant 0 : index
    %c96 = arith.constant 96 : index
    %8 = vector.load %arg5[%c0_9, %c96] : memref<64x256xf32, #tpu.memory_space<vmem>>, vector<32x32xf32>
    %c0_10 = arith.constant 0 : index
    %c128 = arith.constant 128 : index
    %9 = vector.load %arg5[%c0_10, %c128] : memref<64x256xf32, #tpu.memory_space<vmem>>, vector<32x128xf32>
    %c0_11 = arith.constant 0 : index
    %c0_12 = arith.constant 0 : index
    %10 = vector.load %arg6[%c0_11, %c0_12] : memref<432x32xf32, #tpu.memory_space<vmem>>, vector<128x32xf32>
    %c0_13 = arith.constant 0 : index
    %c0_14 = arith.constant 0 : index
    %11 = vector.load %arg7[%c0_13, %c0_14] : memref<9x128xf32, #tpu.memory_space<vmem>>, vector<1x32xf32>
    %c0_15 = arith.constant 0 : index
    %c32 = arith.constant 32 : index
    %12 = vector.load %arg7[%c0_15, %c32] : memref<9x128xf32, #tpu.memory_space<vmem>>, vector<1x32xf32>
    %c0_16 = arith.constant 0 : index
    %c64 = arith.constant 64 : index
    %13 = vector.load %arg7[%c0_16, %c64] : memref<9x128xf32, #tpu.memory_space<vmem>>, vector<1x32xf32>
    %c0_17 = arith.constant 0 : index
    %c96_18 = arith.constant 96 : index
    %14 = vector.load %arg7[%c0_17, %c96_18] : memref<9x128xf32, #tpu.memory_space<vmem>>, vector<1x32xf32>
    %c1 = arith.constant 1 : index
    %c0_19 = arith.constant 0 : index
    %15 = vector.load %arg7[%c1, %c0_19] : memref<9x128xf32, #tpu.memory_space<vmem>>, vector<1x96xf32>
    %c1_20 = arith.constant 1 : index
    %c96_21 = arith.constant 96 : index
    %16 = vector.load %arg7[%c1_20, %c96_21] : memref<9x128xf32, #tpu.memory_space<vmem>>, vector<1x32xf32>
    %c2 = arith.constant 2 : index
    %c0_22 = arith.constant 0 : index
    %17 = vector.load %arg7[%c2, %c0_22] : memref<9x128xf32, #tpu.memory_space<vmem>>, vector<1x128xf32>
    %c3 = arith.constant 3 : index
    %c0_23 = arith.constant 0 : index
    %18 = vector.load %arg7[%c3, %c0_23] : memref<9x128xf32, #tpu.memory_space<vmem>>, vector<1x32xf32>
    %cst_24 = arith.constant dense<0.000000e+00> : vector<24xf32>
    %19 = vector.multi_reduction <add>, %6, %cst_24 [1] : vector<24x32xf32> to vector<24xf32>
    %20 = vector.shape_cast %19 : vector<24xf32> to vector<24x1xf32>
    %cst_25 = arith.constant 3.200000e+01 : f32
    %21 = vector.broadcast %cst_25 : f32 to vector<24x1xf32>
    %22 = arith.divf %20, %21 : vector<24x1xf32>
    %23 = vector.broadcast %22 : vector<24x1xf32> to vector<24x32xf32>
    %24 = arith.subf %6, %23 : vector<24x32xf32>
    %25 = arith.mulf %24, %24 : vector<24x32xf32>
    %cst_26 = arith.constant dense<0.000000e+00> : vector<24xf32>
    %26 = vector.multi_reduction <add>, %25, %cst_26 [1] : vector<24x32xf32> to vector<24xf32>
    %27 = vector.shape_cast %26 : vector<24xf32> to vector<24x1xf32>
    %cst_27 = arith.constant 3.200000e+01 : f32
    %28 = vector.broadcast %cst_27 : f32 to vector<24x1xf32>
    %29 = arith.divf %27, %28 : vector<24x1xf32>
    %cst_28 = arith.constant 9.99999997E-7 : f32
    %30 = vector.broadcast %cst_28 : f32 to vector<24x1xf32>
    %31 = arith.addf %29, %30 : vector<24x1xf32>
    %32 = math.rsqrt %31 : vector<24x1xf32>
    %33 = vector.broadcast %32 : vector<24x1xf32> to vector<24x32xf32>
    %34 = arith.mulf %24, %33 : vector<24x32xf32>
    %35 = vector.broadcast %11 : vector<1x32xf32> to vector<24x32xf32>
    %36 = arith.mulf %34, %35 : vector<24x32xf32>
    %37 = vector.broadcast %12 : vector<1x32xf32> to vector<24x32xf32>
    %38 = arith.addf %36, %37 : vector<24x32xf32>
    %cst_29 = arith.constant dense<0.000000e+00> : vector<24x96xf32>
    %39 = tpu.matmul %38, %7, %cst_29 {dimension_numbers = #tpu.dot_dimension_numbers<[1], [0], [0], [1], [0, 0, 1, 1], [], []>} : vector<24x32xf32>, vector<32x96xf32>, vector<24x96xf32> -> vector<24x96xf32>
    %40 = vector.broadcast %15 : vector<1x96xf32> to vector<24x96xf32>
    %41 = arith.addf %39, %40 : vector<24x96xf32>
    %42 = vector.extract_strided_slice %41 {offsets = [0, 0], sizes = [24, 32], strides = [1, 1]} : vector<24x96xf32> to vector<24x32xf32>
    %43 = vector.extract_strided_slice %41 {offsets = [0, 32], sizes = [24, 32], strides = [1, 1]} : vector<24x96xf32> to vector<24x32xf32>
    %44 = tpu.concatenate %43, %43, %43, %43 in 0 : vector<24x32xf32>, vector<24x32xf32>, vector<24x32xf32>, vector<24x32xf32> -> vector<96x32xf32>
    %45 = arith.mulf %44, %0 : vector<96x32xf32>
    %46 = vector.extract_strided_slice %41 {offsets = [0, 64], sizes = [24, 32], strides = [1, 1]} : vector<24x96xf32> to vector<24x32xf32>
    %47 = tpu.concatenate %46, %46, %46, %46 in 0 : vector<24x32xf32>, vector<24x32xf32>, vector<24x32xf32>, vector<24x32xf32> -> vector<96x32xf32>
    %48 = arith.mulf %47, %0 : vector<96x32xf32>
    %cst_30 = arith.constant dense<0.000000e+00> : vector<24x96xf32>
    %49 = tpu.matmul %42, %45, %cst_30 {dimension_numbers = #tpu.dot_dimension_numbers<[1], [1], [0], [0], [0, 0, 1, 0], [], []>} : vector<24x32xf32>, vector<96x32xf32>, vector<24x96xf32> -> vector<24x96xf32>
    %50 = arith.addf %49, %1 : vector<24x96xf32>
    %cst_31 = arith.constant dense<0xFF800000> : vector<24xf32>
    %51 = vector.multi_reduction <maximumf>, %50, %cst_31 [1] : vector<24x96xf32> to vector<24xf32>
    %52 = vector.shape_cast %51 : vector<24xf32> to vector<24x1xf32>
    %53 = vector.broadcast %52 : vector<24x1xf32> to vector<24x96xf32>
    %54 = arith.subf %50, %53 : vector<24x96xf32>
    %55 = math.exp %54 : vector<24x96xf32>
    %56 = vector.extract_strided_slice %55 {offsets = [0, 0], sizes = [24, 24], strides = [1, 1]} : vector<24x96xf32> to vector<24x24xf32>
    %cst_32 = arith.constant dense<0.000000e+00> : vector<24xf32>
    %57 = vector.multi_reduction <add>, %56, %cst_32 [1] : vector<24x24xf32> to vector<24xf32>
    %58 = vector.shape_cast %57 : vector<24xf32> to vector<24x1xf32>
    %59 = vector.extract_strided_slice %55 {offsets = [0, 24], sizes = [24, 24], strides = [1, 1]} : vector<24x96xf32> to vector<24x24xf32>
    %cst_33 = arith.constant dense<0.000000e+00> : vector<24xf32>
    %60 = vector.multi_reduction <add>, %59, %cst_33 [1] : vector<24x24xf32> to vector<24xf32>
    %61 = vector.shape_cast %60 : vector<24xf32> to vector<24x1xf32>
    %62 = vector.extract_strided_slice %55 {offsets = [0, 48], sizes = [24, 24], strides = [1, 1]} : vector<24x96xf32> to vector<24x24xf32>
    %cst_34 = arith.constant dense<0.000000e+00> : vector<24xf32>
    %63 = vector.multi_reduction <add>, %62, %cst_34 [1] : vector<24x24xf32> to vector<24xf32>
    %64 = vector.shape_cast %63 : vector<24xf32> to vector<24x1xf32>
    %65 = vector.extract_strided_slice %55 {offsets = [0, 72], sizes = [24, 24], strides = [1, 1]} : vector<24x96xf32> to vector<24x24xf32>
    %cst_35 = arith.constant dense<0.000000e+00> : vector<24xf32>
    %66 = vector.multi_reduction <add>, %65, %cst_35 [1] : vector<24x24xf32> to vector<24xf32>
    %67 = vector.shape_cast %66 : vector<24xf32> to vector<24x1xf32>
    %68 = tpu.concatenate %58, %61, %64, %67 in 1 : vector<24x1xf32>, vector<24x1xf32>, vector<24x1xf32>, vector<24x1xf32> -> vector<24x4xf32>
    %69 = tpu.reciprocal %68 {approx = true} : vector<24x4xf32> -> vector<24x4xf32>
    %70 = vector.extract_strided_slice %55 {offsets = [0, 0], sizes = [24, 24], strides = [1, 1]} : vector<24x96xf32> to vector<24x24xf32>
    %71 = vector.extract_strided_slice %69 {offsets = [0, 0], sizes = [24, 1], strides = [1, 1]} : vector<24x4xf32> to vector<24x1xf32>
    %72 = vector.broadcast %71 : vector<24x1xf32> to vector<24x24xf32>
    %73 = arith.mulf %70, %72 : vector<24x24xf32>
    %74 = vector.extract_strided_slice %55 {offsets = [0, 24], sizes = [24, 24], strides = [1, 1]} : vector<24x96xf32> to vector<24x24xf32>
    %75 = vector.extract_strided_slice %69 {offsets = [0, 1], sizes = [24, 1], strides = [1, 1]} : vector<24x4xf32> to vector<24x1xf32>
    %76 = vector.broadcast %75 : vector<24x1xf32> to vector<24x24xf32>
    %77 = arith.mulf %74, %76 : vector<24x24xf32>
    %78 = vector.extract_strided_slice %55 {offsets = [0, 48], sizes = [24, 24], strides = [1, 1]} : vector<24x96xf32> to vector<24x24xf32>
    %79 = vector.extract_strided_slice %69 {offsets = [0, 2], sizes = [24, 1], strides = [1, 1]} : vector<24x4xf32> to vector<24x1xf32>
    %80 = vector.broadcast %79 : vector<24x1xf32> to vector<24x24xf32>
    %81 = arith.mulf %78, %80 : vector<24x24xf32>
    %82 = vector.extract_strided_slice %55 {offsets = [0, 72], sizes = [24, 24], strides = [1, 1]} : vector<24x96xf32> to vector<24x24xf32>
    %83 = vector.extract_strided_slice %69 {offsets = [0, 3], sizes = [24, 1], strides = [1, 1]} : vector<24x4xf32> to vector<24x1xf32>
    %84 = vector.broadcast %83 : vector<24x1xf32> to vector<24x24xf32>
    %85 = arith.mulf %82, %84 : vector<24x24xf32>
    %86 = tpu.concatenate %73, %77, %81, %85 in 1 : vector<24x24xf32>, vector<24x24xf32>, vector<24x24xf32>, vector<24x24xf32> -> vector<24x96xf32>
    %cst_36 = arith.constant dense<0.000000e+00> : vector<96x32xf32>
    %87 = tpu.matmul %48, %8, %cst_36 {dimension_numbers = #tpu.dot_dimension_numbers<[1], [0], [0], [1], [0, 0, 1, 1], [], []>} : vector<96x32xf32>, vector<32x32xf32>, vector<96x32xf32> -> vector<96x32xf32>
    %cst_37 = arith.constant dense<0.000000e+00> : vector<24x32xf32>
    %88 = tpu.matmul %86, %87, %cst_37 {dimension_numbers = #tpu.dot_dimension_numbers<[1], [0], [0], [1], [0, 0, 1, 1], [], []>} : vector<24x96xf32>, vector<96x32xf32>, vector<24x32xf32> -> vector<24x32xf32>
    %89 = arith.addf %6, %88 : vector<24x32xf32>
    %90 = vector.broadcast %16 : vector<1x32xf32> to vector<24x32xf32>
    %91 = arith.addf %89, %90 : vector<24x32xf32>
    %cst_38 = arith.constant dense<0.000000e+00> : vector<24xf32>
    %92 = vector.multi_reduction <add>, %91, %cst_38 [1] : vector<24x32xf32> to vector<24xf32>
    %93 = vector.shape_cast %92 : vector<24xf32> to vector<24x1xf32>
    %cst_39 = arith.constant 3.200000e+01 : f32
    %94 = vector.broadcast %cst_39 : f32 to vector<24x1xf32>
    %95 = arith.divf %93, %94 : vector<24x1xf32>
    %96 = vector.broadcast %95 : vector<24x1xf32> to vector<24x32xf32>
    %97 = arith.subf %91, %96 : vector<24x32xf32>
    %98 = arith.mulf %97, %97 : vector<24x32xf32>
    %cst_40 = arith.constant dense<0.000000e+00> : vector<24xf32>
    %99 = vector.multi_reduction <add>, %98, %cst_40 [1] : vector<24x32xf32> to vector<24xf32>
    %100 = vector.shape_cast %99 : vector<24xf32> to vector<24x1xf32>
    %cst_41 = arith.constant 3.200000e+01 : f32
    %101 = vector.broadcast %cst_41 : f32 to vector<24x1xf32>
    %102 = arith.divf %100, %101 : vector<24x1xf32>
    %cst_42 = arith.constant 9.99999997E-7 : f32
    %103 = vector.broadcast %cst_42 : f32 to vector<24x1xf32>
    %104 = arith.addf %102, %103 : vector<24x1xf32>
    %105 = math.rsqrt %104 : vector<24x1xf32>
    %106 = vector.broadcast %105 : vector<24x1xf32> to vector<24x32xf32>
    %107 = arith.mulf %97, %106 : vector<24x32xf32>
    %108 = vector.broadcast %13 : vector<1x32xf32> to vector<24x32xf32>
    %109 = arith.mulf %107, %108 : vector<24x32xf32>
    %110 = vector.broadcast %14 : vector<1x32xf32> to vector<24x32xf32>
    %111 = arith.addf %109, %110 : vector<24x32xf32>
    %cst_43 = arith.constant dense<0.000000e+00> : vector<24x128xf32>
    %112 = tpu.matmul %111, %9, %cst_43 {dimension_numbers = #tpu.dot_dimension_numbers<[1], [0], [0], [1], [0, 0, 1, 1], [], []>} : vector<24x32xf32>, vector<32x128xf32>, vector<24x128xf32> -> vector<24x128xf32>
    %113 = vector.broadcast %17 : vector<1x128xf32> to vector<24x128xf32>
    %114 = arith.addf %112, %113 : vector<24x128xf32>
    %cst_44 = arith.constant 5.000000e-01 : f32
    %115 = vector.broadcast %cst_44 : f32 to vector<24x128xf32>
    %116 = arith.mulf %115, %114 : vector<24x128xf32>
    %cst_45 = arith.constant 4.471500e-02 : f32
    %117 = vector.broadcast %cst_45 : f32 to vector<24x128xf32>
    %118 = arith.mulf %117, %114 : vector<24x128xf32>
    %119 = arith.mulf %118, %114 : vector<24x128xf32>
    %120 = arith.mulf %119, %114 : vector<24x128xf32>
    %121 = arith.addf %114, %120 : vector<24x128xf32>
    %cst_46 = arith.constant 0.797884583 : f32
    %122 = vector.broadcast %cst_46 : f32 to vector<24x128xf32>
    %123 = arith.mulf %122, %121 : vector<24x128xf32>
    %124 = math.tanh %123 : vector<24x128xf32>
    %cst_47 = arith.constant 1.000000e+00 : f32
    %125 = vector.broadcast %cst_47 : f32 to vector<24x128xf32>
    %126 = arith.addf %125, %124 : vector<24x128xf32>
    %127 = arith.mulf %116, %126 : vector<24x128xf32>
    %cst_48 = arith.constant dense<0.000000e+00> : vector<24x32xf32>
    %128 = tpu.matmul %127, %10, %cst_48 {dimension_numbers = #tpu.dot_dimension_numbers<[1], [0], [0], [1], [0, 0, 1, 1], [], []>} : vector<24x128xf32>, vector<128x32xf32>, vector<24x32xf32> -> vector<24x32xf32>
    %129 = arith.addf %91, %128 : vector<24x32xf32>
    %130 = vector.broadcast %18 : vector<1x32xf32> to vector<24x32xf32>
    %131 = arith.addf %129, %130 : vector<24x32xf32>
    %c32_49 = arith.constant 32 : index
    %c0_50 = arith.constant 0 : index
    %132 = vector.load %arg5[%c32_49, %c0_50] : memref<64x256xf32, #tpu.memory_space<vmem>>, vector<32x96xf32>
    %c32_51 = arith.constant 32 : index
    %c96_52 = arith.constant 96 : index
    %133 = vector.load %arg5[%c32_51, %c96_52] : memref<64x256xf32, #tpu.memory_space<vmem>>, vector<32x32xf32>
    %c32_53 = arith.constant 32 : index
    %c128_54 = arith.constant 128 : index
    %134 = vector.load %arg5[%c32_53, %c128_54] : memref<64x256xf32, #tpu.memory_space<vmem>>, vector<32x128xf32>
    %c128_55 = arith.constant 128 : index
    %c0_56 = arith.constant 0 : index
    %135 = vector.load %arg6[%c128_55, %c0_56] : memref<432x32xf32, #tpu.memory_space<vmem>>, vector<128x32xf32>
    %c4 = arith.constant 4 : index
    %c0_57 = arith.constant 0 : index
    %136 = vector.load %arg7[%c4, %c0_57] : memref<9x128xf32, #tpu.memory_space<vmem>>, vector<1x32xf32>
    %c4_58 = arith.constant 4 : index
    %c32_59 = arith.constant 32 : index
    %137 = vector.load %arg7[%c4_58, %c32_59] : memref<9x128xf32, #tpu.memory_space<vmem>>, vector<1x32xf32>
    %c4_60 = arith.constant 4 : index
    %c64_61 = arith.constant 64 : index
    %138 = vector.load %arg7[%c4_60, %c64_61] : memref<9x128xf32, #tpu.memory_space<vmem>>, vector<1x32xf32>
    %c4_62 = arith.constant 4 : index
    %c96_63 = arith.constant 96 : index
    %139 = vector.load %arg7[%c4_62, %c96_63] : memref<9x128xf32, #tpu.memory_space<vmem>>, vector<1x32xf32>
    %c5 = arith.constant 5 : index
    %c0_64 = arith.constant 0 : index
    %140 = vector.load %arg7[%c5, %c0_64] : memref<9x128xf32, #tpu.memory_space<vmem>>, vector<1x96xf32>
    %c5_65 = arith.constant 5 : index
    %c96_66 = arith.constant 96 : index
    %141 = vector.load %arg7[%c5_65, %c96_66] : memref<9x128xf32, #tpu.memory_space<vmem>>, vector<1x32xf32>
    %c6 = arith.constant 6 : index
    %c0_67 = arith.constant 0 : index
    %142 = vector.load %arg7[%c6, %c0_67] : memref<9x128xf32, #tpu.memory_space<vmem>>, vector<1x128xf32>
    %c7 = arith.constant 7 : index
    %c0_68 = arith.constant 0 : index
    %143 = vector.load %arg7[%c7, %c0_68] : memref<9x128xf32, #tpu.memory_space<vmem>>, vector<1x32xf32>
    %cst_69 = arith.constant dense<0.000000e+00> : vector<24xf32>
    %144 = vector.multi_reduction <add>, %131, %cst_69 [1] : vector<24x32xf32> to vector<24xf32>
    %145 = vector.shape_cast %144 : vector<24xf32> to vector<24x1xf32>
    %cst_70 = arith.constant 3.200000e+01 : f32
    %146 = vector.broadcast %cst_70 : f32 to vector<24x1xf32>
    %147 = arith.divf %145, %146 : vector<24x1xf32>
    %148 = vector.broadcast %147 : vector<24x1xf32> to vector<24x32xf32>
    %149 = arith.subf %131, %148 : vector<24x32xf32>
    %150 = arith.mulf %149, %149 : vector<24x32xf32>
    %cst_71 = arith.constant dense<0.000000e+00> : vector<24xf32>
    %151 = vector.multi_reduction <add>, %150, %cst_71 [1] : vector<24x32xf32> to vector<24xf32>
    %152 = vector.shape_cast %151 : vector<24xf32> to vector<24x1xf32>
    %cst_72 = arith.constant 3.200000e+01 : f32
    %153 = vector.broadcast %cst_72 : f32 to vector<24x1xf32>
    %154 = arith.divf %152, %153 : vector<24x1xf32>
    %cst_73 = arith.constant 9.99999997E-7 : f32
    %155 = vector.broadcast %cst_73 : f32 to vector<24x1xf32>
    %156 = arith.addf %154, %155 : vector<24x1xf32>
    %157 = math.rsqrt %156 : vector<24x1xf32>
    %158 = vector.broadcast %157 : vector<24x1xf32> to vector<24x32xf32>
    %159 = arith.mulf %149, %158 : vector<24x32xf32>
    %160 = vector.broadcast %136 : vector<1x32xf32> to vector<24x32xf32>
    %161 = arith.mulf %159, %160 : vector<24x32xf32>
    %162 = vector.broadcast %137 : vector<1x32xf32> to vector<24x32xf32>
    %163 = arith.addf %161, %162 : vector<24x32xf32>
    %cst_74 = arith.constant dense<0.000000e+00> : vector<24x96xf32>
    %164 = tpu.matmul %163, %132, %cst_74 {dimension_numbers = #tpu.dot_dimension_numbers<[1], [0], [0], [1], [0, 0, 1, 1], [], []>} : vector<24x32xf32>, vector<32x96xf32>, vector<24x96xf32> -> vector<24x96xf32>
    %165 = vector.broadcast %140 : vector<1x96xf32> to vector<24x96xf32>
    %166 = arith.addf %164, %165 : vector<24x96xf32>
    %167 = vector.extract_strided_slice %166 {offsets = [0, 0], sizes = [24, 32], strides = [1, 1]} : vector<24x96xf32> to vector<24x32xf32>
    %168 = vector.extract_strided_slice %166 {offsets = [0, 32], sizes = [24, 32], strides = [1, 1]} : vector<24x96xf32> to vector<24x32xf32>
    %169 = tpu.concatenate %168, %168, %168, %168 in 0 : vector<24x32xf32>, vector<24x32xf32>, vector<24x32xf32>, vector<24x32xf32> -> vector<96x32xf32>
    %170 = arith.mulf %169, %0 : vector<96x32xf32>
    %171 = vector.extract_strided_slice %166 {offsets = [0, 64], sizes = [24, 32], strides = [1, 1]} : vector<24x96xf32> to vector<24x32xf32>
    %172 = tpu.concatenate %171, %171, %171, %171 in 0 : vector<24x32xf32>, vector<24x32xf32>, vector<24x32xf32>, vector<24x32xf32> -> vector<96x32xf32>
    %173 = arith.mulf %172, %0 : vector<96x32xf32>
    %cst_75 = arith.constant dense<0.000000e+00> : vector<24x96xf32>
    %174 = tpu.matmul %167, %170, %cst_75 {dimension_numbers = #tpu.dot_dimension_numbers<[1], [1], [0], [0], [0, 0, 1, 0], [], []>} : vector<24x32xf32>, vector<96x32xf32>, vector<24x96xf32> -> vector<24x96xf32>
    %175 = arith.addf %174, %1 : vector<24x96xf32>
    %cst_76 = arith.constant dense<0xFF800000> : vector<24xf32>
    %176 = vector.multi_reduction <maximumf>, %175, %cst_76 [1] : vector<24x96xf32> to vector<24xf32>
    %177 = vector.shape_cast %176 : vector<24xf32> to vector<24x1xf32>
    %178 = vector.broadcast %177 : vector<24x1xf32> to vector<24x96xf32>
    %179 = arith.subf %175, %178 : vector<24x96xf32>
    %180 = math.exp %179 : vector<24x96xf32>
    %181 = vector.extract_strided_slice %180 {offsets = [0, 0], sizes = [24, 24], strides = [1, 1]} : vector<24x96xf32> to vector<24x24xf32>
    %cst_77 = arith.constant dense<0.000000e+00> : vector<24xf32>
    %182 = vector.multi_reduction <add>, %181, %cst_77 [1] : vector<24x24xf32> to vector<24xf32>
    %183 = vector.shape_cast %182 : vector<24xf32> to vector<24x1xf32>
    %184 = vector.extract_strided_slice %180 {offsets = [0, 24], sizes = [24, 24], strides = [1, 1]} : vector<24x96xf32> to vector<24x24xf32>
    %cst_78 = arith.constant dense<0.000000e+00> : vector<24xf32>
    %185 = vector.multi_reduction <add>, %184, %cst_78 [1] : vector<24x24xf32> to vector<24xf32>
    %186 = vector.shape_cast %185 : vector<24xf32> to vector<24x1xf32>
    %187 = vector.extract_strided_slice %180 {offsets = [0, 48], sizes = [24, 24], strides = [1, 1]} : vector<24x96xf32> to vector<24x24xf32>
    %cst_79 = arith.constant dense<0.000000e+00> : vector<24xf32>
    %188 = vector.multi_reduction <add>, %187, %cst_79 [1] : vector<24x24xf32> to vector<24xf32>
    %189 = vector.shape_cast %188 : vector<24xf32> to vector<24x1xf32>
    %190 = vector.extract_strided_slice %180 {offsets = [0, 72], sizes = [24, 24], strides = [1, 1]} : vector<24x96xf32> to vector<24x24xf32>
    %cst_80 = arith.constant dense<0.000000e+00> : vector<24xf32>
    %191 = vector.multi_reduction <add>, %190, %cst_80 [1] : vector<24x24xf32> to vector<24xf32>
    %192 = vector.shape_cast %191 : vector<24xf32> to vector<24x1xf32>
    %193 = tpu.concatenate %183, %186, %189, %192 in 1 : vector<24x1xf32>, vector<24x1xf32>, vector<24x1xf32>, vector<24x1xf32> -> vector<24x4xf32>
    %194 = tpu.reciprocal %193 {approx = true} : vector<24x4xf32> -> vector<24x4xf32>
    %195 = vector.extract_strided_slice %180 {offsets = [0, 0], sizes = [24, 24], strides = [1, 1]} : vector<24x96xf32> to vector<24x24xf32>
    %196 = vector.extract_strided_slice %194 {offsets = [0, 0], sizes = [24, 1], strides = [1, 1]} : vector<24x4xf32> to vector<24x1xf32>
    %197 = vector.broadcast %196 : vector<24x1xf32> to vector<24x24xf32>
    %198 = arith.mulf %195, %197 : vector<24x24xf32>
    %199 = vector.extract_strided_slice %180 {offsets = [0, 24], sizes = [24, 24], strides = [1, 1]} : vector<24x96xf32> to vector<24x24xf32>
    %200 = vector.extract_strided_slice %194 {offsets = [0, 1], sizes = [24, 1], strides = [1, 1]} : vector<24x4xf32> to vector<24x1xf32>
    %201 = vector.broadcast %200 : vector<24x1xf32> to vector<24x24xf32>
    %202 = arith.mulf %199, %201 : vector<24x24xf32>
    %203 = vector.extract_strided_slice %180 {offsets = [0, 48], sizes = [24, 24], strides = [1, 1]} : vector<24x96xf32> to vector<24x24xf32>
    %204 = vector.extract_strided_slice %194 {offsets = [0, 2], sizes = [24, 1], strides = [1, 1]} : vector<24x4xf32> to vector<24x1xf32>
    %205 = vector.broadcast %204 : vector<24x1xf32> to vector<24x24xf32>
    %206 = arith.mulf %203, %205 : vector<24x24xf32>
    %207 = vector.extract_strided_slice %180 {offsets = [0, 72], sizes = [24, 24], strides = [1, 1]} : vector<24x96xf32> to vector<24x24xf32>
    %208 = vector.extract_strided_slice %194 {offsets = [0, 3], sizes = [24, 1], strides = [1, 1]} : vector<24x4xf32> to vector<24x1xf32>
    %209 = vector.broadcast %208 : vector<24x1xf32> to vector<24x24xf32>
    %210 = arith.mulf %207, %209 : vector<24x24xf32>
    %211 = tpu.concatenate %198, %202, %206, %210 in 1 : vector<24x24xf32>, vector<24x24xf32>, vector<24x24xf32>, vector<24x24xf32> -> vector<24x96xf32>
    %cst_81 = arith.constant dense<0.000000e+00> : vector<96x32xf32>
    %212 = tpu.matmul %173, %133, %cst_81 {dimension_numbers = #tpu.dot_dimension_numbers<[1], [0], [0], [1], [0, 0, 1, 1], [], []>} : vector<96x32xf32>, vector<32x32xf32>, vector<96x32xf32> -> vector<96x32xf32>
    %cst_82 = arith.constant dense<0.000000e+00> : vector<24x32xf32>
    %213 = tpu.matmul %211, %212, %cst_82 {dimension_numbers = #tpu.dot_dimension_numbers<[1], [0], [0], [1], [0, 0, 1, 1], [], []>} : vector<24x96xf32>, vector<96x32xf32>, vector<24x32xf32> -> vector<24x32xf32>
    %214 = arith.addf %131, %213 : vector<24x32xf32>
    %215 = vector.broadcast %141 : vector<1x32xf32> to vector<24x32xf32>
    %216 = arith.addf %214, %215 : vector<24x32xf32>
    %cst_83 = arith.constant dense<0.000000e+00> : vector<24xf32>
    %217 = vector.multi_reduction <add>, %216, %cst_83 [1] : vector<24x32xf32> to vector<24xf32>
    %218 = vector.shape_cast %217 : vector<24xf32> to vector<24x1xf32>
    %cst_84 = arith.constant 3.200000e+01 : f32
    %219 = vector.broadcast %cst_84 : f32 to vector<24x1xf32>
    %220 = arith.divf %218, %219 : vector<24x1xf32>
    %221 = vector.broadcast %220 : vector<24x1xf32> to vector<24x32xf32>
    %222 = arith.subf %216, %221 : vector<24x32xf32>
    %223 = arith.mulf %222, %222 : vector<24x32xf32>
    %cst_85 = arith.constant dense<0.000000e+00> : vector<24xf32>
    %224 = vector.multi_reduction <add>, %223, %cst_85 [1] : vector<24x32xf32> to vector<24xf32>
    %225 = vector.shape_cast %224 : vector<24xf32> to vector<24x1xf32>
    %cst_86 = arith.constant 3.200000e+01 : f32
    %226 = vector.broadcast %cst_86 : f32 to vector<24x1xf32>
    %227 = arith.divf %225, %226 : vector<24x1xf32>
    %cst_87 = arith.constant 9.99999997E-7 : f32
    %228 = vector.broadcast %cst_87 : f32 to vector<24x1xf32>
    %229 = arith.addf %227, %228 : vector<24x1xf32>
    %230 = math.rsqrt %229 : vector<24x1xf32>
    %231 = vector.broadcast %230 : vector<24x1xf32> to vector<24x32xf32>
    %232 = arith.mulf %222, %231 : vector<24x32xf32>
    %233 = vector.broadcast %138 : vector<1x32xf32> to vector<24x32xf32>
    %234 = arith.mulf %232, %233 : vector<24x32xf32>
    %235 = vector.broadcast %139 : vector<1x32xf32> to vector<24x32xf32>
    %236 = arith.addf %234, %235 : vector<24x32xf32>
    %cst_88 = arith.constant dense<0.000000e+00> : vector<24x128xf32>
    %237 = tpu.matmul %236, %134, %cst_88 {dimension_numbers = #tpu.dot_dimension_numbers<[1], [0], [0], [1], [0, 0, 1, 1], [], []>} : vector<24x32xf32>, vector<32x128xf32>, vector<24x128xf32> -> vector<24x128xf32>
    %238 = vector.broadcast %142 : vector<1x128xf32> to vector<24x128xf32>
    %239 = arith.addf %237, %238 : vector<24x128xf32>
    %cst_89 = arith.constant 5.000000e-01 : f32
    %240 = vector.broadcast %cst_89 : f32 to vector<24x128xf32>
    %241 = arith.mulf %240, %239 : vector<24x128xf32>
    %cst_90 = arith.constant 4.471500e-02 : f32
    %242 = vector.broadcast %cst_90 : f32 to vector<24x128xf32>
    %243 = arith.mulf %242, %239 : vector<24x128xf32>
    %244 = arith.mulf %243, %239 : vector<24x128xf32>
    %245 = arith.mulf %244, %239 : vector<24x128xf32>
    %246 = arith.addf %239, %245 : vector<24x128xf32>
    %cst_91 = arith.constant 0.797884583 : f32
    %247 = vector.broadcast %cst_91 : f32 to vector<24x128xf32>
    %248 = arith.mulf %247, %246 : vector<24x128xf32>
    %249 = math.tanh %248 : vector<24x128xf32>
    %cst_92 = arith.constant 1.000000e+00 : f32
    %250 = vector.broadcast %cst_92 : f32 to vector<24x128xf32>
    %251 = arith.addf %250, %249 : vector<24x128xf32>
    %252 = arith.mulf %241, %251 : vector<24x128xf32>
    %cst_93 = arith.constant dense<0.000000e+00> : vector<24x32xf32>
    %253 = tpu.matmul %252, %135, %cst_93 {dimension_numbers = #tpu.dot_dimension_numbers<[1], [0], [0], [1], [0, 0, 1, 1], [], []>} : vector<24x128xf32>, vector<128x32xf32>, vector<24x32xf32> -> vector<24x32xf32>
    %254 = arith.addf %216, %253 : vector<24x32xf32>
    %255 = vector.broadcast %143 : vector<1x32xf32> to vector<24x32xf32>
    %256 = arith.addf %254, %255 : vector<24x32xf32>
    %c8 = arith.constant 8 : index
    %c0_94 = arith.constant 0 : index
    %257 = vector.load %arg7[%c8, %c0_94] : memref<9x128xf32, #tpu.memory_space<vmem>>, vector<1x32xf32>
    %c8_95 = arith.constant 8 : index
    %c32_96 = arith.constant 32 : index
    %258 = vector.load %arg7[%c8_95, %c32_96] : memref<9x128xf32, #tpu.memory_space<vmem>>, vector<1x32xf32>
    %c8_97 = arith.constant 8 : index
    %c64_98 = arith.constant 64 : index
    %259 = vector.load %arg7[%c8_97, %c64_98] : memref<9x128xf32, #tpu.memory_space<vmem>>, vector<1x10xf32>
    %c304 = arith.constant 304 : index
    %c0_99 = arith.constant 0 : index
    %260 = vector.load %arg6[%c304, %c0_99] : memref<432x32xf32, #tpu.memory_space<vmem>>, vector<32x10xf32>
    %cst_100 = arith.constant dense<0.000000e+00> : vector<24xf32>
    %261 = vector.multi_reduction <add>, %256, %cst_100 [1] : vector<24x32xf32> to vector<24xf32>
    %262 = vector.shape_cast %261 : vector<24xf32> to vector<24x1xf32>
    %cst_101 = arith.constant 3.200000e+01 : f32
    %263 = vector.broadcast %cst_101 : f32 to vector<24x1xf32>
    %264 = arith.divf %262, %263 : vector<24x1xf32>
    %265 = vector.broadcast %264 : vector<24x1xf32> to vector<24x32xf32>
    %266 = arith.subf %256, %265 : vector<24x32xf32>
    %267 = arith.mulf %266, %266 : vector<24x32xf32>
    %cst_102 = arith.constant dense<0.000000e+00> : vector<24xf32>
    %268 = vector.multi_reduction <add>, %267, %cst_102 [1] : vector<24x32xf32> to vector<24xf32>
    %269 = vector.shape_cast %268 : vector<24xf32> to vector<24x1xf32>
    %cst_103 = arith.constant 3.200000e+01 : f32
    %270 = vector.broadcast %cst_103 : f32 to vector<24x1xf32>
    %271 = arith.divf %269, %270 : vector<24x1xf32>
    %cst_104 = arith.constant 9.99999997E-7 : f32
    %272 = vector.broadcast %cst_104 : f32 to vector<24x1xf32>
    %273 = arith.addf %271, %272 : vector<24x1xf32>
    %274 = math.rsqrt %273 : vector<24x1xf32>
    %275 = vector.broadcast %274 : vector<24x1xf32> to vector<24x32xf32>
    %276 = arith.mulf %266, %275 : vector<24x32xf32>
    %277 = vector.broadcast %257 : vector<1x32xf32> to vector<24x32xf32>
    %278 = arith.mulf %276, %277 : vector<24x32xf32>
    %279 = vector.broadcast %258 : vector<1x32xf32> to vector<24x32xf32>
    %280 = arith.addf %278, %279 : vector<24x32xf32>
    %281 = vector.extract_strided_slice %280 {offsets = [0, 0], sizes = [1, 32], strides = [1, 1]} : vector<24x32xf32> to vector<1x32xf32>
    %cst_105 = arith.constant dense<0.000000e+00> : vector<1x10xf32>
    %282 = tpu.matmul %281, %260, %cst_105 {dimension_numbers = #tpu.dot_dimension_numbers<[1], [0], [0], [1], [0, 0, 1, 1], [], []>} : vector<1x32xf32>, vector<32x10xf32>, vector<1x10xf32> -> vector<1x10xf32>
    %283 = arith.addf %282, %259 : vector<1x10xf32>
    %284 = vector.shape_cast %283 : vector<1x10xf32> to vector<1x1x10xf32>
    %c0_106 = arith.constant 0 : index
    %c0_107 = arith.constant 0 : index
    %c0_108 = arith.constant 0 : index
    %285 = vector.load %arg9[%c0_106, %c0_107, %c0_108] : memref<1x1x10xf32, #tpu.memory_space<vmem>>, vector<1x1x10xf32>
    tpu.vector_store %arg9[%c0_106, %c0_107, %c0_108], %284 {strides = array<i32>} : memref<1x1x10xf32, #tpu.memory_space<vmem>>, vector<1x1x10xf32>,
    %cst_109 = arith.constant dense<0xFF800000> : vector<1xf32>
    %286 = vector.multi_reduction <maximumf>, %283, %cst_109 [1] : vector<1x10xf32> to vector<1xf32>
    %287 = vector.shape_cast %286 : vector<1xf32> to vector<1x1xf32>
    %288 = vector.broadcast %287 : vector<1x1xf32> to vector<1x10xf32>
    %289 = arith.subf %283, %288 : vector<1x10xf32>
    %290 = math.exp %289 : vector<1x10xf32>
    %cst_110 = arith.constant dense<0.000000e+00> : vector<1xf32>
    %291 = vector.multi_reduction <add>, %290, %cst_110 [1] : vector<1x10xf32> to vector<1xf32>
    %292 = vector.shape_cast %291 : vector<1xf32> to vector<1x1xf32>
    %293 = math.log %292 : vector<1x1xf32>
    %294 = arith.addf %287, %293 : vector<1x1xf32>
    %295 = tpu.iota {dimensions = array<i32: 1>} : vector<1x10xi32>
    %c1_i32 = arith.constant 1 : i32
    %296 = arith.muli %arg0, %c1_i32 : i32
    %c0_i32 = arith.constant 0 : i32
    %297 = arith.addi %296, %c0_i32 : i32
    %298 = arith.index_cast %297 : i32 to index
    %299 = memref.load %arg1[%298] : memref<2xi32, #tpu.memory_space<smem>>
    %300 = vector.broadcast %299 : i32 to vector<1x10xi32>
    %301 = arith.cmpi eq, %295, %300 : vector<1x10xi32>
    %302 = arith.extui %301 : vector<1x10xi1> to vector<1x10xi32>
    %303 = arith.sitofp %302 : vector<1x10xi32> to vector<1x10xf32>
    %304 = arith.mulf %303, %283 : vector<1x10xf32>
    %305 = vector.shape_cast %304 : vector<1x10xf32> to vector<1x1x10xf32>
    %cst_111 = arith.constant dense<0.000000e+00> : vector<1xf32>
    %306 = vector.multi_reduction <add>, %305, %cst_111 [1, 2] : vector<1x1x10xf32> to vector<1xf32>
    %307 = vector.shape_cast %306 : vector<1xf32> to vector<1x1x1xf32>
    %308 = vector.extract %307[0, 0, 0] : f32 from vector<1x1x1xf32>
    %cst_112 = arith.constant 0.000000e+00 : f32
    %309 = arith.addf %cst_112, %308 : f32
    %310 = vector.shape_cast %294 : vector<1x1xf32> to vector<1x1x1xf32>
    %cst_113 = arith.constant dense<0.000000e+00> : vector<1xf32>
    %311 = vector.multi_reduction <add>, %310, %cst_113 [1, 2] : vector<1x1x1xf32> to vector<1xf32>
    %312 = vector.shape_cast %311 : vector<1xf32> to vector<1x1x1xf32>
    %313 = vector.extract %312[0, 0, 0] : f32 from vector<1x1x1xf32>
    %314 = arith.subf %313, %309 : f32
    %315 = vector.broadcast %314 : f32 to vector<1x1x1xf32>
    %c0_114 = arith.constant 0 : index
    %c0_115 = arith.constant 0 : index
    %c0_116 = arith.constant 0 : index
    %316 = vector.load %arg8[%c0_114, %c0_115, %c0_116] : memref<1x1x1xf32, #tpu.memory_space<vmem>>, vector<1x1x1xf32>
    tpu.vector_store %arg8[%c0_114, %c0_115, %c0_116], %315 {strides = array<i32>} : memref<1x1x1xf32, #tpu.memory_space<vmem>>, vector<1x1x1xf32>,
    return
  }
  func.func @transform_0(%arg0: i32, %arg1: memref<2xi32, #tpu.memory_space<smem>>) -> (i32, i32) {
    %c0_i32 = arith.constant 0 : i32
    %c0_i32_0 = arith.constant 0 : i32
    return %arg0, %c0_i32 : i32, i32
  }
  func.func @transform_1(%arg0: i32, %arg1: memref<2xi32, #tpu.memory_space<smem>>) -> (i32, i32) {
    %c0_i32 = arith.constant 0 : i32
    %c0_i32_0 = arith.constant 0 : i32
    %c0_i32_1 = arith.constant 0 : i32
    return %c0_i32, %c0_i32_0 : i32, i32
  }
  func.func @transform_2(%arg0: i32, %arg1: memref<2xi32, #tpu.memory_space<smem>>) -> (i32, i32) {
    %c0_i32 = arith.constant 0 : i32
    %c0_i32_0 = arith.constant 0 : i32
    %c0_i32_1 = arith.constant 0 : i32
    return %c0_i32, %c0_i32_0 : i32, i32
  }
  func.func @transform_3(%arg0: i32, %arg1: memref<2xi32, #tpu.memory_space<smem>>) -> (i32, i32) {
    %c0_i32 = arith.constant 0 : i32
    %c0_i32_0 = arith.constant 0 : i32
    %c0_i32_1 = arith.constant 0 : i32
    return %c0_i32, %c0_i32_0 : i32, i32
  }
  func.func @transform_4(%arg0: i32, %arg1: memref<2xi32, #tpu.memory_space<smem>>) -> (i32, i32) {
    %c0_i32 = arith.constant 0 : i32
    %c0_i32_0 = arith.constant 0 : i32
    %c0_i32_1 = arith.constant 0 : i32
    return %c0_i32, %c0_i32_0 : i32, i32
  }
  func.func @transform_5(%arg0: i32, %arg1: memref<2xi32, #tpu.memory_space<smem>>) -> (i32, i32) {
    %c0_i32 = arith.constant 0 : i32
    %c0_i32_0 = arith.constant 0 : i32
    %c0_i32_1 = arith.constant 0 : i32
    return %c0_i32, %c0_i32_0 : i32, i32
  }
  func.func @transform_6(%arg0: i32, %arg1: memref<2xi32, #tpu.memory_space<smem>>) -> (i32, i32, i32) {
    %c0_i32 = arith.constant 0 : i32
    %c0_i32_0 = arith.constant 0 : i32
    %c0_i32_1 = arith.constant 0 : i32
    return %arg0, %c0_i32, %c0_i32_0 : i32, i32, i32
  }
  func.func @transform_7(%arg0: i32, %arg1: memref<2xi32, #tpu.memory_space<smem>>) -> (i32, i32, i32) {
    %c0_i32 = arith.constant 0 : i32
    %c0_i32_0 = arith.constant 0 : i32
    %c0_i32_1 = arith.constant 0 : i32
    return %arg0, %c0_i32, %c0_i32_0 : i32, i32, i32
  }
}

</mosaic_0001>

<bundles_post_ra>
// kernel: vit_forward.1
= control target key start
LH: loop header
LB: loop body
LE: loop exit
PB: predicated region body
PF: predicated region fallthrough
CT: control target
= control target key end

     0   :  { %s5275_s0 = inlined_call_operand.vmem [shape: s32[2], index: 0, kind: input, shape index: {}]   ;;  %s5276_s1 = inlined_call_operand.vmem [shape: f32[48,48], index: 1, kind: input, shape index: {}]   ;;  %s5277_s2 = inlined_call_operand.vmem [shape: f32[24,32], index: 2, kind: input, shape index: {}]   ;;  %s5278_s3 = inlined_call_operand.vmem [shape: f32[24,96], index: 3, kind: input, shape index: {}]   ;;  %s5279_s4 = inlined_call_operand.vmem [shape: f32[64,256], index: 4, kind: input, shape index: {}]   ;;  %s5280_s5 = inlined_call_operand.vmem [shape: f32[432,32], index: 5, kind: input, shape index: {}]   ;;  %s5281_s6 = inlined_call_operand.vmem [shape: f32[9,128], index: 6, kind: input, shape index: {}]   ;;  %s5282_s7 = inlined_call_operand.vmem [shape: f32[2,1,1], index: 7, kind: output, shape index: {0}]   ;;  %s5283_s8 = inlined_call_operand.hbm [shape: f32[2,1,10], index: 8, kind: output, shape index: {1}]  }
   0x1   :  { %s14_s29 = sshll.u32 %s5275_s0, 4  ;;  %s15_s29 = int_to_ptr.vmem [resolvable:$true] %s14_s29 }
   0x2   :  { %s3934_s30 = scalar_lea.vmem %s15_s29, 16  ;;  %p3939_p1 = scmp.lt.s32.totalorder %s15_s29, %s15_s29 }
   0x3   :  { %p3935_p0 = scmp.ne.s32.totalorder %s15_s29, %s3934_s30  ;;  %p3940_p2 = scmp.lt.s32.totalorder %s3934_s30, %s3934_s30 }
   0x5   :  { %p3941_p3 = por %p3940_p2, %p3939_p1 }
   0x7   :  { %p3942_p4 = pnand %p3941_p3, %p3935_p0 }
   0x9   :  { %3945 = shalt.err (!%p3942_p4)  }
   0xa   :  { %s4012_s9 = smov [#allocation3]  }
   0xb   :  { %17 = dma.vmem_to_smem %s15_s29, 16, %s4012_s9, [#allocation2] }
   0xc   :  { %3990 = dma.done.wait [#allocation2], 16 }
   0xd   :  { %3991 = vsyncadd [#allocation2], 4294967280 }
   0xe   :  { %19 = sfence }
   0xf   :  { %20 = vsyncpa [#allocation5], 0 }
  0x10   :  { %22 = vsyncpa [#allocation5 + $0x1], 0  ;;  %s4075_s10 = smov 0   ;;  %s4077_s11 = smov 0  }
  0x11   :  { %s4079_s0 = smov 0   ;;  %s4081_s12 = smov 0  }
  0x12 LB: > { %s4096_s13 = sadd.s32 4294967295, %s4010_s12   ;;  %s2886_s14 = sadd.s32 4294967294, %s4010_s12   ;;  %s4010_s12 = sphi %s4081_s12, %s5294_s12   ;;  %s4006_s0 = sphi %s4079_s0, %s5293_s0   ;;  %s4002_s11 = sphi %s4077_s11, %s5292_s11   ;;  %s3998_s10 = sphi %s4075_s10, %s5291_s10  }
  0x13   : > { %s4100_s15 = sadd.s32 1, %s4010_s12   ;;  %s192_s16 = sadd.s32 1, %s4006_s0 }
  0x14   : > { %s189_s17 = ssub.s32 %s4010_s12, %s4100_s15  ;;  %p202_p5 = scmp.ne.s32.totalorder %s4006_s0, %s4002_s11 }
  0x15   : > { %p190_p6 = scmp.eq.s32.totalorder %s189_s17, 0  ;;  %p203_p7 = scmp.eq.s32.totalorder %s4096_s13, 1 }
  0x16   : > { %p208_p8 = scmp.ne.s32.totalorder %s4002_s11, %s3998_s10  ;;  %p209_p9 = scmp.eq.s32.totalorder %s2886_s14, 1 }
  0x17   : > { %s4111_s18 = scalar_select %p190_p6, %s4006_s0, %s192_s16  }
  0x18   : > { %p4113_p10 = por %p203_p7, %p202_p5  ;;  %p4117_p11 = por %p209_p9, %p208_p8 }
  0x19   : > { %p2889_p12 = scmp.ge.s32.totalorder %s4010_s12, 1  ;;  %p251_p13 = scmp.lt.s32.totalorder %s4010_s12, 3 }
  0x1b   : > { %p252_p0 = pnand %p2889_p12, %p251_p13 }
  0x1c   : > { %v309_v0 = vld [vmem:[%s5280_s5 + $0x100] sm:$0xff] (!%p252_p0)  ;;  %v310_v1 = vld [vmem:[%s5280_s5 + $0x108] sm:$0xff] (!%p252_p0)  ;;  %v311_v2 = vld [vmem:[%s5280_s5 + $0x110] sm:$0xff] (!%p252_p0)  ;;  %v4013_v3 = vmov (!%p252_p0), 0.0|0.0   ;;  %vm4014_vm0 = vmmov (!%p252_p0), 0   ;;  %v4015_v6 = vmov (!%p252_p0), 0.0  }
  0x1d   : > { %255 = sbr.rel (%p252_p0) target bundleno = 6224 (0x1850), region = 44  ;;  %3517 = vmatprep.subr.bf16.mxu0 (!%p252_p0), %v4013_v3  ;;  %v3518_v4 = vpack.c.bf16 (!%p252_p0), %v310_v1, %v309_v0  ;;  %v312_v5 = vld [vmem:[%s5280_s5 + $0x118] sm:$0xff] (!%p252_p0)  ;;  %3163 = vmatprep.mubr.msk.f32.mxu0 (!%p252_p0), %vm4014_vm0, %v4015_v6  ;;  %v313_v8 = vld [vmem:[%s5280_s5 + $0x120] sm:$0xff] (!%p252_p0)  ;;  %v314_v9 = vld [vmem:[%s5280_s5 + $0x128] sm:$0xff] (!%p252_p0)  ;;  %vm321_vm1 = vcmask (!%p252_p0), 392192   ;;  %vm439_vm2 = vcmask (!%p252_p0), 261120  }
  0x1e   : > { %s285_s29 = smul.u32 (!%p252_p0), 3, %s4096_s13  ;;  %3532 = vmatprep.subr.bf16.mxu1 (!%p252_p0), %v4013_v3  ;;  %3213 = vmatprep.mubr.msk.f32.mxu1 (!%p252_p0), %vm4014_vm0, %v4015_v6  ;;  %v3521_v7 = vpack.c.bf16 (!%p252_p0), %v312_v5, %v311_v2  ;;  %v3524_v10 = vpack.c.bf16 (!%p252_p0), %v314_v9, %v313_v8  ;;  %v318_v14 = vld [vmem:[%s5277_s2] sm:$0xff] (!%p252_p0)  ;;  %v319_v18 = vld [vmem:[%s5277_s2 + $0x8] sm:$0xff] (!%p252_p0)  ;;  %v320_v23 = vld [vmem:[%s5277_s2 + $0x10] sm:$0xff] (!%p252_p0)  ;;  %s4016_s22 = smov (!%p252_p0), 96   ;;  %vm844_vm4 = vcmask (!%p252_p0), 785408  }
  0x1f   : > { %3519 = vmatpush3.bf16.msra.mxu0 (!%p252_p0), %v3518_v4  ;;  %v4205_v44 = vld [vmem:[%s5281_s6] ss:$0 sm:$0xff] (!%p252_p0)  ;;  %v4215_v46 = vld [vmem:[%s5279_s4 + $0x10] sm:$0xff] (!%p252_p0)  ;;  %v4242_v52 = vld [vmem:[%s5280_s5 + $0x168] sm:$0xff] (!%p252_p0)  ;;  %s4017_s9 = smov (!%p252_p0), 32   ;;  %s4019_s24 = smov (!%p252_p0), 104  }
  0x20   : > { %p286_p1 = scmp.lt.s32.totalorder (!%p252_p0), %s285_s29, 5  ;;  %3520 = vmatprep.subr.bf16.mxu0 (!%p252_p0), %v4013_v3  ;;  %v4210_v45 = vld [vmem:[%s5279_s4] sm:$0xff] (!%p252_p0)  ;;  %v4229_v49 = vld [vmem:[%s5279_s4 + $0x30] sm:$0xff] (!%p252_p0)  ;;  %v4251_v53 = vld [vmem:[%s5280_s5 + $0x158] sm:$0xff] (!%p252_p0)  ;;  %s4020_s25 = smov (!%p252_p0), 80   ;;  %vm863_vm5 = vcmask (!%p252_p0), 195584  }
  0x21   : > { %v3527_v47 = vpack.c.bf16 (!%p252_p0), %v4215_v46, %v4210_v45  ;;  %v4224_v48 = vld [vmem:[%s5279_s4 + $0x20] sm:$0xff] (!%p252_p0)  ;;  %v4237_v51 = vld [vmem:[%s5280_s5 + $0x150] sm:$0xff] (!%p252_p0)  ;;  %v4256_v54 = vld [vmem:[%s5280_s5 + $0x178] sm:$0xff] (!%p252_p0)  ;;  %s5284_s26 = smov (!%p252_p0), 56   ;;  %vm930_vm6 = vcmask (!%p252_p0), 7168   ;;  %vm934_vm7 = vcmask (!%p252_p0), 15360  }
  0x22   : > { %v3530_v50 = vpack.c.bf16 (!%p252_p0), %v4229_v49, %v4224_v48  ;;  %v4265_v55 = vld [vmem:[%s5280_s5 + $0x160] sm:$0xff] (!%p252_p0)  ;;  %v4270_v56 = vld [vmem:[%s5280_s5 + $0x188] sm:$0xff] (!%p252_p0)  ;;  %v4279_v57 = vld [vmem:[%s5280_s5 + $0x170] sm:$0xff] (!%p252_p0)  ;;  %vm938_vm8 = vcmask (!%p252_p0), 23552   ;;  %vm1014_vm9 = vcmask (!%p252_p0), 588800   ;;  %vm2754_vm10 = vcmask (!%p252_p0), 73728  }
  0x23   : > { %3522 = vmatpush3.bf16.msra.mxu0 (!%p252_p0), %v3521_v7  ;;  %v4284_v58 = vld [vmem:[%s5280_s5 + $0x198] sm:$0xff] (!%p252_p0)  ;;  %v4293_v59 = vld [vmem:[%s5280_s5 + $0x180] sm:$0xff] (!%p252_p0)  ;;  %v4298_v60 = vld [vmem:[%s5280_s5 + $0x1a8] sm:$0xff] (!%p252_p0) }
  0x24   : > { %s5296_s29 = smov (!%p286_p1, %s285_s29), 5  ;;  %3523 = vmatprep.subr.bf16.mxu0 %v4013_v3  ;;  %v4307_v61 = vld [vmem:[%s5280_s5 + $0x190] sm:$0xff]  ;;  %v4314_v62 = vld [vmem:[%s5280_s5 + $0x1a0] sm:$0xff]  ;;  %vm4425_vm3 = vmpackc.low %vm439_vm2, %vm439_vm2 }
  0x25   : > { %s2890_s17 = sshll.u32 %s5296_s29, 3  ;;  %s4018_s29 = smov 64  }
  0x26   : > { %s289_s23 = scalar_lea.vmem %s5276_s1, %s2890_s17  ;;  %s4026_s17 = smov [#allocation4]  }
  0x27   : > { %3525 = vmatpush3.bf16.msra.mxu0 %v3524_v10  ;;  %v315_v11 = vld [vmem:[%s289_s23] sm:$0xff]  ;;  %v316_v12 = vld [vmem:[%s289_s23 + $0x8] sm:$0xff]  ;;  %v317_v13 = vld [vmem:[%s289_s23 + $0x10] sm:$0xff]  ;;  %s5290_s23 = smov 56   ;;  %s3950_s21 = sshll.u32 %s4026_s17, 4  ;;  %s3951_s21 = int_to_ptr.vmem [resolvable:$false] %s3950_s21 }
  0x28   : > { %3526 = vmatprep.subr.bf16.mxu0 %v4013_v3 }
  0x2a   : > { %3164 = vmatmul.mubr.msk.f32.vlgmr.msra.gmra.mrb[0].mxu0 %vm321_vm1, %v315_v11 }
  0x2b   : > { %3166 = vmatprep.mubr.msk.f32.mxu0 %vm4014_vm0, %v4015_v6  ;;  %3528 = vmatpush3.bf16.msra.mxu0 %v3527_v47 }
  0x2c   : > { %3529 = vmatprep.subr.bf16.mxu0 %v4013_v3 }
  0x2e   : > { %3167 = vmatmul.mubr.msk.f32.gmra.mrb[2].mxu0 %vm321_vm1, %v316_v12 }
  0x2f   : > { %3169 = vmatprep.mubr.msk.f32.mxu0 %vm4014_vm0, %v4015_v6  ;;  %3531 = vmatpush3.bf16.msra.mxu0 %v3530_v50 }
  0x32   : > { %3170 = vmatmul.mubr.msk.f32.gmra.mrb[4].mxu0 %vm321_vm1, %v317_v13 }
  0x33   : > { %3180 = vmatprep.mubr.msk.f32.mxu0 %vm4014_vm0, %v4015_v6 }
  0xfd   : > { %v397_v15 = vpop.f32.mrb[0].mxu0 }
  0xfe   : > { %v4166_v16 = vadd.f32 %v397_v15, %v318_v14  ;;  %v3165_v17 = vpop.f32.mrb[1].mxu0 }
 0x100   : > { %v440_v19 = vsel %vm439_vm2, %v4166_v16, 0.0 }
 0x101   : > { %441 = vadd.xlane.f32.xlu0 %v440_v19  ;;  %v402_v20 = vpop.f32.mrb[2].mxu0 }
 0x102   : > { %v4173_v21 = vadd.f32 %v402_v20, %v319_v18  ;;  %v3168_v22 = vpop.f32.mrb[3].mxu0 }
 0x104   : > { %v443_v24 = vsel %vm439_vm2, %v4173_v21, 0.0 }
 0x105   : > { %444 = vadd.xlane.f32.xlu0 %v443_v24  ;;  %v407_v25 = vpop.f32.mrb[4].mxu0 }
 0x106   : > { %v4180_v26 = vadd.f32 %v407_v25, %v320_v23  ;;  %v3171_v27 = vpop.f32.mrb[5].mxu0 }
 0x108   : > { %v446_v28 = vsel %vm439_vm2, %v4180_v26, 0.0 }
 0x109   : > { %447 = vadd.xlane.f32.xlu1 %v446_v28 }
 0x18e   : > { %v442_v29 = vpop.xlane.xlu0 %441 }
 0x18f   : > { %v450_v30 = vmul.f32 0.03125, %v442_v29 }
 0x191   : > { %v4185_v31 = vsub.f32 %v4166_v16, %v450_v30 }
 0x192   : > { %v445_v32 = vpop.xlane.xlu0 %444 }
 0x193   : > { %v451_v33 = vmul.f32 0.03125, %v445_v32  ;;  %v456_v34 = vmul.f32 %v4185_v31, %v4185_v31  ;;  %v4346_v32 = vld [vmem:[%s5281_s6 + $0x1] ss:$0 sm:$0xff] }
 0x195   : > { %v4190_v35 = vsub.f32 %v4173_v21, %v451_v33  ;;  %v459_v36 = vsel %vm439_vm2, %v456_v34, 0.0 }
 0x196   : > { %460 = vadd.xlane.f32.xlu1 %v459_v36  ;;  %v448_v37 = vpop.xlane.xlu1 %447 }
 0x197   : > { %v452_v38 = vmul.f32 0.03125, %v448_v37  ;;  %v457_v39 = vmul.f32 %v4190_v35, %v4190_v35 }
 0x199   : > { %v4196_v40 = vsub.f32 %v4180_v26, %v452_v38  ;;  %v462_v41 = vsel %vm439_vm2, %v457_v39, 0.0 }
 0x19a   : > { %463 = vadd.xlane.f32.xlu0 %v462_v41 }
 0x19b   : > { %v458_v42 = vmul.f32 %v4196_v40, %v4196_v40 }
 0x19d   : > { %v465_v43 = vsel %vm439_vm2, %v458_v42, 0.0 }
 0x19e   : > { %466 = vadd.xlane.f32.xlu1 %v465_v43 }
 0x1af   : > { %599 = vrot.lane.b32.xlu1 %v4237_v51, %s4017_s9 }
 0x1b0   : > { %488 = vrot.lane.b32.xlu0 %v4205_v44, %s4016_s22 }
 0x1b3   : > { %601 = vrot.lane.b32.xlu1 %v4251_v53, %s4017_s9 }
 0x1b4   : > { %605 = vrot.lane.b32.xlu0 %v4242_v52, %s4017_s9 }
 0x1b7   : > { %603 = vrot.lane.b32.xlu1 %v4265_v55, %s4017_s9 }
 0x1b8   : > { %609 = vrot.lane.b32.xlu0 %v4256_v54, %s4017_s9 }
 0x1bb   : > { %607 = vrot.lane.b32.xlu1 %v4279_v57, %s4017_s9 }
 0x1bc   : > { %613 = vrot.lane.b32.xlu0 %v4270_v56, %s4017_s9 }
 0x1bf   : > { %611 = vrot.lane.b32.xlu1 %v4293_v59, %s4017_s9 }
 0x1c0   : > { %617 = vrot.lane.b32.xlu0 %v4284_v58, %s4017_s9 }
 0x1c3   : > { %615 = vrot.lane.b32.xlu1 %v4307_v61, %s4017_s9 }
 0x1c4   : > { %621 = vrot.lane.b32.xlu0 %v4298_v60, %s4017_s9 }
 0x1c7   : > { %619 = vrot.lane.b32.xlu1 %v4314_v62, %s4017_s9 }
 0x223   : > { %v461_v63 = vpop.xlane.xlu1 %460 }
 0x224   : > { %v468_v0 = vmul.f32 0.03125, %v461_v63 }
 0x226   : > { %v471_v1 = vadd.f32 1e-06, %v468_v0 }
 0x227   : > { %v464_v2 = vpop.xlane.xlu0 %463 }
 0x228   : > { %3865 = vrsqrt.f32 %v471_v1  ;;  %v469_v4 = vmul.f32 0.03125, %v464_v2 }
 0x22a   : > { %v472_v5 = vadd.f32 1e-06, %v469_v4 }
 0x22b   : > { %v467_v7 = vpop.xlane.xlu1 %466  ;;  %v489_v12 = vpop.permute.xlu0 %488 }
 0x22c   : > { %3867 = vrsqrt.f32 %v472_v5  ;;  %v470_v8 = vmul.f32 0.03125, %v467_v7 }
 0x22e   : > { %v473_v9 = vadd.f32 1e-06, %v470_v8 }
 0x22f   : > { %v4331_v25 = vpop.permute.xlu1 %599  ;;  %v4335_v28 = vpop.permute.xlu0 %605 }
 0x230   : > { %3869 = vrsqrt.f32 %v473_v9 }
 0x232   : > { %v3866_v10 = vpop.eup %3865 }
 0x233   : > { %v477_v11 = vmul.f32 %v3866_v10, %v4185_v31  ;;  %v4333_v27 = vpop.permute.xlu1 %601  ;;  %v4339_v30 = vpop.permute.xlu0 %609 }
 0x235   : > { %v484_v13 = vmul.f32 %v4205_v44, %v477_v11 }
 0x236   : > { %v3868_v14 = vpop.eup %3867 }
 0x237   : > { %v478_v15 = vmul.f32 %v3868_v14, %v4190_v35  ;;  %v491_v17 = vadd.f32 %v489_v12, %v484_v13  ;;  %v4337_v29 = vpop.permute.xlu1 %603  ;;  %v4348_v35 = vpop.permute.xlu0 %613 }
 0x239   : > { %v485_v18 = vmul.f32 %v4205_v44, %v478_v15  ;;  %3181 = vmatmul.mubr.msk.f32.vlgmr.msra.gmra.mrb[6].mxu0 %vm439_vm2, %v491_v17 }
 0x23a   : > { %v3870_v19 = vpop.eup %3869  ;;  %3183 = vmatprep.mubr.msk.f32.mxu0 %vm4014_vm0, %v4015_v6 }
 0x23b   : > { %v479_v20 = vmul.f32 %v3870_v19, %v4196_v40  ;;  %v492_v22 = vadd.f32 %v489_v12, %v485_v18  ;;  %v4341_v31 = vpop.permute.xlu1 %607  ;;  %v4365_v0 = vpop.permute.xlu0 %617 }
 0x23d   : > { %v486_v23 = vmul.f32 %v4205_v44, %v479_v20  ;;  %3184 = vmatmul.mubr.msk.f32.gmra.mrb[8].mxu0 %vm439_vm2, %v492_v22 }
 0x23e   : > { %3186 = vmatprep.mubr.msk.f32.mxu0 %vm4014_vm0, %v4015_v6 }
 0x23f   : > { %v493_v24 = vadd.f32 %v489_v12, %v486_v23  ;;  %v4353_v37 = vpop.permute.xlu1 %611  ;;  %v4382_v12 = vpop.permute.xlu0 %621 }
 0x241   : > { %3187 = vmatmul.mubr.msk.f32.gmra.mrb[10].mxu0 %vm439_vm2, %v493_v24 }
 0x243   : > { %v4367_v1 = vpop.permute.xlu1 %615 }
 0x247   : > { %v4390_v15 = vpop.permute.xlu1 %619 }
 0x30c   : > { %v573_v33 = vpop.f32.mrb[6].mxu0 }
 0x30d   : > { %v3182_v34 = vpop.f32.mrb[7].mxu0  ;;  %v4351_v36 = vadd.f32 %v4346_v32, %v573_v33 }
 0x30f   : > { %v635_v41 = vmul.f32 %v4331_v25, %v4351_v36  ;;  %v638_v7 = vmul.f32 %v4335_v28, %v4351_v36  ;;  %v644_v13 = vmul.f32 %v4365_v0, %v4351_v36  ;;  %v641_v14 = vmul.f32 %v4353_v37, %v4351_v36 }
 0x310   : > { %v578_v38 = vpop.f32.mrb[8].mxu0 }
 0x311   : > { %v4356_v39 = vadd.f32 %v4346_v32, %v578_v38  ;;  %v3185_v40 = vpop.f32.mrb[9].mxu0 }
 0x313   : > { %v636_v42 = vmul.f32 %v4333_v27, %v4356_v39  ;;  %v639_v2 = vmul.f32 %v4341_v31, %v4356_v39  ;;  %v642_v11 = vmul.f32 %v4348_v35, %v4356_v39  ;;  %v645_v20 = vmul.f32 %v4390_v15, %v4356_v39 }
 0x314   : > { %v583_v43 = vpop.f32.mrb[10].mxu0 }
 0x315   : > { %v4363_v47 = vadd.f32 %v4346_v32, %v583_v43  ;;  %v3188_v50 = vpop.f32.mrb[11].mxu0  ;;  %v3761_v63 = vpack.i.bf16 %v636_v42, %v635_v41  ;;  %v3776_v19 = vpack.i.bf16 %v642_v11, %v641_v14 }
 0x317   : > { %3762 = vrot.lane.b32.xlu1 %v3761_v63, %s4016_s22  ;;  %v640_v4 = vmul.f32 %v4339_v30, %v4363_v47  ;;  %v637_v5 = vmul.f32 %v4337_v29, %v4363_v47  ;;  %v643_v10 = vmul.f32 %v4367_v1, %v4363_v47  ;;  %v646_v17 = vmul.f32 %v4382_v12, %v4363_v47 }
 0x319   : > { %v3771_v8 = vpack.i.bf16 %v640_v4, %v639_v2  ;;  %v3766_v9 = vpack.i.bf16 %v638_v7, %v637_v5  ;;  %v3781_v18 = vpack.i.bf16 %v644_v13, %v643_v10  ;;  %v3786_v22 = vpack.i.bf16 %v646_v17, %v645_v20 }
 0x31b   : > { %3772 = vrot.lane.b32.xlu1 %v3771_v8, %s4016_s22  ;;  %3767 = vrot.lane.b32.xlu0 %v3766_v9, %s4016_s22 }
 0x31f   : > { %3782 = vrot.lane.b32.xlu1 %v3781_v18, %s4016_s22  ;;  %3777 = vrot.lane.b32.xlu0 %v3776_v19, %s4016_s22 }
 0x323   : > { %647 = vrot.lane.b32.xlu1 %v4237_v51, %s4018_s29  ;;  %3787 = vrot.lane.b32.xlu0 %v3786_v22, %s4016_s22 }
 0x327   : > { %651 = vrot.lane.b32.xlu1 %v4265_v55, %s4018_s29  ;;  %649 = vrot.lane.b32.xlu0 %v4251_v53, %s4018_s29  ;;  %v3791_v55 = vpack.i.bf16 %v4215_v46, %v4210_v45 }
 0x32b   : > { %655 = vrot.lane.b32.xlu1 %v4279_v57, %s4018_s29  ;;  %653 = vrot.lane.b32.xlu0 %v4242_v52, %s4018_s29 }
 0x32f   : > { %659 = vrot.lane.b32.xlu1 %v4293_v59, %s4018_s29  ;;  %657 = vrot.lane.b32.xlu0 %v4256_v54, %s4018_s29 }
 0x333   : > { %663 = vrot.lane.b32.xlu1 %v4307_v61, %s4018_s29  ;;  %661 = vrot.lane.b32.xlu0 %v4270_v56, %s4018_s29 }
 0x337   : > { %667 = vrot.lane.b32.xlu1 %v4314_v62, %s4018_s29  ;;  %665 = vrot.lane.b32.xlu0 %v4284_v58, %s4018_s29  ;;  %v3796_v58 = vpack.i.bf16 %v4229_v49, %v4224_v48 }
 0x33b   : > { %669 = vrot.lane.b32.xlu0 %v4298_v60, %s4018_s29  ;;  %3792 = vrot.lane.b32.xlu1 %v3791_v55, %s4017_s9 }
 0x33f   : > { %3797 = vrot.lane.b32.xlu1 %v3796_v58, %s4017_s9  ;;  %v306_v58 = vld [vmem:[%s5278_s3] sm:$0xff] }
 0x389   : > { %v3763_v51 = vpop.permute.xlu1 %3762 }
 0x38a   : > { %v3765_v52 = vunpack.i.h.bf16 %v3763_v51  ;;  %v3764_v53 = vunpack.i.l.bf16 %v3763_v51 }
 0x38c   : > { %v3533_v56 = vpack.c.bf16 %v3765_v52, %v3764_v53 }
 0x38d   : > { %v3773_v57 = vpop.permute.xlu1 %3772  ;;  %v3768_v59 = vpop.permute.xlu0 %3767 }
 0x38e   : > { %3535 = vmatpush3.bf16.xpose.msk.msra.mxu1 %vm4425_vm3, %v3533_v56  ;;  %v3770_v60 = vunpack.i.h.bf16 %v3768_v59  ;;  %v3769_v61 = vunpack.i.l.bf16 %v3768_v59  ;;  %v3775_v48 = vunpack.i.h.bf16 %v3773_v57  ;;  %v3774_v49 = vunpack.i.l.bf16 %v3773_v57 }
 0x38f   : > { %3536 = vmatprep.subr.bf16.mxu1 %v4013_v3 }
 0x390   : > { %v3537_v23 = vpack.c.bf16 %v3770_v60, %v3769_v61  ;;  %v3541_v24 = vpack.c.bf16 %v3775_v48, %v3774_v49 }
 0x391   : > { %v3783_v62 = vpop.permute.xlu1 %3782  ;;  %v3778_v33 = vpop.permute.xlu0 %3777 }
 0x392   : > { %v3780_v34 = vunpack.i.h.bf16 %v3778_v33  ;;  %v3779_v38 = vunpack.i.l.bf16 %v3778_v33  ;;  %v3785_v41 = vunpack.i.h.bf16 %v3783_v62  ;;  %v3784_v42 = vunpack.i.l.bf16 %v3783_v62 }
 0x394   : > { %v3545_v40 = vpack.c.bf16 %v3780_v34, %v3779_v38  ;;  %v3549_v43 = vpack.c.bf16 %v3785_v41, %v3784_v42 }
 0x395   : > { %v4438_v45 = vpop.permute.xlu1 %647  ;;  %v3788_v50 = vpop.permute.xlu0 %3787 }
 0x396   : > { %v683_v46 = vmul.f32 %v4438_v45, %v4351_v36  ;;  %3539 = vmatpush3.bf16.xpose.msk.msra.mxu1 %vm4425_vm3, %v3537_v23  ;;  %v3790_v63 = vunpack.i.h.bf16 %v3788_v50  ;;  %v3789_v2 = vunpack.i.l.bf16 %v3788_v50  ;;  %v307_v23 = vld [vmem:[%s5278_s3 + $0x8] sm:$0xff] }
 0x397   : > { %3540 = vmatprep.subr.bf16.mxu1 %v4013_v3 }
 0x398   : > { %1030 = vrot.lane.b32.xlu0 %v683_v46, %s4018_s29  ;;  %v3553_v4 = vpack.c.bf16 %v3790_v63, %v3789_v2 }
 0x399   : > { %v4470_v5 = vpop.permute.xlu0 %649  ;;  %v4483_v14 = vpop.permute.xlu1 %651 }
 0x39a   : > { %v685_v41 = vmul.f32 %v4483_v14, %v4363_v47 }
 0x39d   : > { %v4472_v7 = vpop.permute.xlu0 %653  ;;  %v4485_v17 = vpop.permute.xlu1 %655 }
 0x39e   : > { %3543 = vmatpush3.bf16.xpose.msk.msra.mxu1 %vm4425_vm3, %v3541_v24  ;;  %v686_v42 = vmul.f32 %v4472_v7, %v4351_v36 }
 0x39f   : > { %3544 = vmatprep.subr.bf16.mxu1 %v4013_v3 }
 0x3a1   : > { %v4474_v8 = vpop.permute.xlu0 %657  ;;  %v4487_v18 = vpop.permute.xlu1 %659 }
 0x3a2   : > { %v688_v50 = vmul.f32 %v4474_v8, %v4363_v47  ;;  %v689_v63 = vmul.f32 %v4487_v18, %v4351_v36 }
 0x3a5   : > { %v4476_v9 = vpop.permute.xlu0 %661  ;;  %v4489_v19 = vpop.permute.xlu1 %663 }
 0x3a6   : > { %3547 = vmatpush3.bf16.xpose.msk.msra.mxu1 %vm4425_vm3, %v3545_v40  ;;  %v684_v40 = vmul.f32 %v4470_v5, %v4356_v39  ;;  %v690_v2 = vmul.f32 %v4476_v9, %v4356_v39 }
 0x3a7   : > { %3548 = vmatprep.subr.bf16.mxu1 %v4013_v3 }
 0x3a9   : > { %v4478_v10 = vpop.permute.xlu0 %665  ;;  %v4491_v20 = vpop.permute.xlu1 %667 }
 0x3ad   : > { %v4480_v11 = vpop.permute.xlu0 %669  ;;  %v3793_v22 = vpop.permute.xlu1 %3792 }
 0x3ae   : > { %3551 = vmatpush3.bf16.xpose.msk.msra.mxu1 %vm4425_vm3, %v3549_v43  ;;  %v3795_v51 = vunpack.i.h.bf16 %v3793_v22  ;;  %v3794_v52 = vunpack.i.l.bf16 %v3793_v22  ;;  %v687_v43 = vmul.f32 %v4485_v17, %v4356_v39  ;;  %v308_v22 = vld [vmem:[%s5278_s3 + $0x10] sm:$0xff] }
 0x3af   : > { %3552 = vmatprep.subr.bf16.mxu1 %v4013_v3 }
 0x3b0   : > { %v3556_v53 = vpack.c.bf16 %v3795_v51, %v3794_v52  ;;  %v693_v51 = vmul.f32 %v4491_v20, %v4356_v39 }
 0x3b1   : > { %v3798_v55 = vpop.permute.xlu1 %3797 }
 0x3b2   : > { %v3800_v56 = vunpack.i.h.bf16 %v3798_v55  ;;  %v3799_v57 = vunpack.i.l.bf16 %v3798_v55  ;;  %3557 = vmatprep.subr.bf16.mxu0 %v3556_v53 }
 0x3b3   : > { %3559 = vmatpush3.bf16.msra.mxu0 %v3556_v53  ;;  %v694_v53 = vmul.f32 %v4480_v11, %v4363_v47 }
 0x3b4   : > { %v3560_v59 = vpack.c.bf16 %v3800_v56, %v3799_v57 }
 0x3b6   : > { %3555 = vmatpush3.bf16.xpose.msk.msra.mxu1 %vm4425_vm3, %v3553_v4  ;;  %3561 = vmatprep.subr.bf16.mxu0 %v3560_v59  ;;  %v691_v4 = vmul.f32 %v4489_v19, %v4363_v47 }
 0x3b7   : > { %3588 = vmatprep.subr.bf16.mxu1 %v4013_v3  ;;  %3563 = vmatpush3.bf16.msra.mxu0 %v3560_v59 }
 0x3b8   : > { %3564 = vmatprep.subr.bf16.mxu0 %v4013_v3 }
 0x3bd   : > { %3214 = vmatmul.mubr.msk.f32.vlgmr.msra.gmra.mrb[0].mxu1 %vm439_vm2, %v4351_v36 }
 0x3be   : > { %3216 = vmatprep.mubr.msk.f32.mxu1 %vm4014_vm0, %v4015_v6 }
 0x3c1   : > { %3217 = vmatmul.mubr.msk.f32.gmra.mrb[2].mxu1 %vm439_vm2, %v4356_v39 }
 0x3c2   : > { %3219 = vmatprep.mubr.msk.f32.mxu1 %vm4014_vm0, %v4015_v6 }
 0x3c5   : > { %3220 = vmatmul.mubr.msk.f32.gmra.mrb[4].mxu1 %vm439_vm2, %v4363_v47 }
 0x3c6   : > { %3330 = vmatprep.mubr.msk.f32.mxu1 %vm4014_vm0, %v4015_v6 }
 0x40a   : > { %v1031_v13 = vpop.permute.xlu0 %1030 }
 0x40b   : > { %3230 = vmatprep.mubr.msk.f32.mxu0 %vm439_vm2, %v1031_v13  ;;  %v692_v13 = vmul.f32 %v4478_v10, %v4351_v36 }
 0x490   : > { %v830_v60 = vpop.f32.mrb[0].mxu1 }
 0x491   : > { %v831_v61 = vadd.f32 %v830_v60, %v306_v58  ;;  %v3215_v62 = vpop.f32.mrb[1].mxu1 }
 0x493   : > { %v845_v46 = vsel %vm844_vm4, %v831_v61, -inf }
 0x494   : > { %846 = vmax.xlane.f32.xlu0 %v845_v46  ;;  %v835_v48 = vpop.f32.mrb[2].mxu1 }
 0x495   : > { %v836_v49 = vadd.f32 %v835_v48, %v307_v23  ;;  %v3218_v24 = vpop.f32.mrb[3].mxu1 }
 0x497   : > { %v848_v33 = vsel %vm844_vm4, %v836_v49, -inf }
 0x498   : > { %849 = vmax.xlane.f32.xlu1 %v848_v33  ;;  %v840_v34 = vpop.f32.mrb[4].mxu1 }
 0x499   : > { %v3221_v38 = vpop.f32.mrb[5].mxu1  ;;  %v841_v52 = vadd.f32 %v840_v34, %v308_v22 }
 0x49b   : > { %v851_v55 = vsel %vm844_vm4, %v841_v52, -inf }
 0x4a9   : > { %1032 = vrot.lane.b32.xlu1 %v684_v40, %s4018_s29 }
 0x4aa   : > { %1034 = vrot.lane.b32.xlu0 %v685_v41, %s4018_s29 }
 0x4ae   : > { %1036 = vrot.lane.b32.xlu0 %v686_v42, %s4018_s29 }
 0x4b2   : > { %1038 = vrot.lane.b32.xlu0 %v687_v43, %s4018_s29 }
 0x4b6   : > { %1040 = vrot.lane.b32.xlu0 %v688_v50, %s4018_s29 }
 0x4ba   : > { %1042 = vrot.lane.b32.xlu0 %v689_v63, %s4018_s29 }
 0x4be   : > { %1044 = vrot.lane.b32.xlu0 %v690_v2, %s4018_s29 }
 0x4c2   : > { %1046 = vrot.lane.b32.xlu0 %v691_v4, %s4018_s29 }
 0x4c6   : > { %1048 = vrot.lane.b32.xlu0 %v692_v13, %s4018_s29 }
 0x4ca   : > { %1050 = vrot.lane.b32.xlu0 %v693_v51, %s4018_s29 }
 0x4cd   : > { %852 = vmax.xlane.f32.xlu1 %v851_v55 }
 0x4ce   : > { %1052 = vrot.lane.b32.xlu0 %v694_v53, %s4018_s29 }
 0x521   : > { %v847_v36 = vpop.xlane.xlu0 %846 }
 0x522   : > { %v854_v56 = vsub.f32 %v831_v61, %v847_v36 }
 0x524   : > { %v857_v57 = vmul.f32 1.442695, %v854_v56 }
 0x525   : > { %v1035_v59 = vpop.permute.xlu0 %1034  ;;  %v850_v58 = vpop.xlane.xlu1 %849 }
 0x526   : > { %3871 = vpow2.f32 %v857_v57  ;;  %v855_v60 = vsub.f32 %v836_v49, %v850_v58 }
 0x528   : > { %v859_v23 = vmul.f32 1.442695, %v855_v60 }
 0x529   : > { %v1037_v62 = vpop.permute.xlu0 %1036  ;;  %v1033_v39 = vpop.permute.xlu1 %1032 }
 0x52a   : > { %3231 = vmatmul.mubr.msk.f32.vlgmr.msra.gmra.mrb[12].mxu0 %vm439_vm2, %v1033_v39  ;;  %3873 = vpow2.f32 %v859_v23  ;;  %v4023_v39 = vmov 0  }
 0x52b   : > { %3233 = vmatprep.mubr.msk.f32.mxu0 %vm439_vm2, %v1035_v59  ;;  %3801 = vset.pattern.permute.xlu0 %v4023_v39 }
 0x52d   : > { %v1039_v47 = vpop.permute.xlu0 %1038 }
 0x52e   : > { %3234 = vmatmul.mubr.msk.f32.gmra.mrb[14].mxu0 %vm439_vm2, %v1037_v62  ;;  %v4022_v62 = vmov 1  }
 0x52f   : > { %3236 = vmatprep.mubr.msk.f32.mxu0 %vm439_vm2, %v1039_v47  ;;  %3802 = vset.pattern.permute.xlu1 %v4022_v62 }
 0x530   : > { %v4543_v46 = vpop.eup %3871 }
 0x531   : > { %876 = vrot.lane.b32.xlu0 %v4543_v46, %s4019_s24  ;;  %v1041_v61 = vpop.permute.xlu0 %1040  ;;  %894 = vrot.lane.b32.xlu1 %v4543_v46, %s4020_s25  ;;  %v864_v2 = vsel %vm863_vm5, %v4543_v46, 0.0 }
 0x532   : > { %3237 = vmatmul.mubr.msk.f32.gmra.mrb[16].mxu0 %vm439_vm2, %v1041_v61 }
 0x534   : > { %v4553_v49 = vpop.eup %3873 }
 0x535   : > { %912 = vrot.lane.b32.xlu0 %v4543_v46, %s5284_s26  ;;  %v1043_v48 = vpop.permute.xlu0 %1042  ;;  %v867_v63 = vsel %vm863_vm5, %v4553_v49, 0.0 }
 0x536   : > { %3239 = vmatprep.mubr.msk.f32.mxu0 %vm439_vm2, %v1043_v48 }
 0x539   : > { %v1045_v24 = vpop.permute.xlu0 %1044  ;;  %878 = vrot.lane.b32.xlu0 %v4553_v49, %s4019_s24 }
 0x53a   : > { %3240 = vmatmul.mubr.msk.f32.gmra.mrb[18].mxu0 %vm439_vm2, %v1045_v24 }
 0x53d   : > { %v1047_v33 = vpop.permute.xlu0 %1046  ;;  %896 = vrot.lane.b32.xlu0 %v4553_v49, %s4020_s25 }
 0x53e   : > { %3242 = vmatprep.mubr.msk.f32.mxu0 %vm439_vm2, %v1047_v33 }
 0x541   : > { %v1049_v34 = vpop.permute.xlu0 %1048  ;;  %914 = vrot.lane.b32.xlu0 %v4553_v49, %s5284_s26 }
 0x542   : > { %3243 = vmatmul.mubr.msk.f32.gmra.mrb[20].mxu0 %vm439_vm2, %v1049_v34 }
 0x545   : > { %v1051_v38 = vpop.permute.xlu0 %1050 }
 0x546   : > { %3245 = vmatprep.mubr.msk.f32.mxu0 %vm439_vm2, %v1051_v38 }
 0x549   : > { %v1053_v40 = vpop.permute.xlu0 %1052 }
 0x54a   : > { %3246 = vmatmul.mubr.msk.f32.gmra.mrb[22].mxu0 %vm439_vm2, %v1053_v40 }
 0x54b   : > { %3272 = vmatprep.mubr.msk.f32.mxu0 %vm4014_vm0, %v4015_v6 }
 0x55a   : > { %v853_v41 = vpop.xlane.xlu1 %852 }
 0x55b   : > { %v856_v42 = vsub.f32 %v841_v52, %v853_v41 }
 0x55d   : > { %v861_v43 = vmul.f32 1.442695, %v856_v42 }
 0x55f   : > { %3875 = vpow2.f32 %v861_v43 }
 0x569   : > { %v4568_v50 = vpop.eup %3875 }
 0x56a   : > { %898 = vrot.lane.b32.xlu1 %v4568_v50, %s4020_s25  ;;  %880 = vrot.lane.b32.xlu0 %v4568_v50, %s4019_s24  ;;  %v870_v60 = vsel %vm863_vm5, %v4568_v50, 0.0 }
 0x56e   : > { %916 = vrot.lane.b32.xlu0 %v4568_v50, %s5284_s26  ;;  %s2976_s26 = sshll.u32 %s4096_s13, 4 }
 0x56f   : > { %s5232_s30 = scalar_lea.hbm %s5283_s8, %s2976_s26 }
 0x58d   : > { %868 = vadd.xlane.f32.xlu0 %v867_v63 }
 0x58e   : > { %865 = vadd.xlane.f32.xlu1 %v864_v2 }
 0x5a3   : > { %v877_v4 = vpop.permute.xlu0 %876  ;;  %v895_v22 = vpop.permute.xlu1 %894 }
 0x5a4   : > { %v885_v13 = vsel %vm863_vm5, %v877_v4, 0.0  ;;  %v903_v53 = vsel %vm863_vm5, %v895_v22, 0.0 }
 0x5a5   : > { %886 = vadd.xlane.f32.xlu0 %v885_v13 }
 0x5a7   : > { %v913_v51 = vpop.permute.xlu0 %912 }
 0x5a8   : > { %v921_v52 = vsel %vm863_vm5, %v913_v51, 0.0 }
 0x5a9   : > { %922 = vadd.xlane.f32.xlu1 %v921_v52  ;;  %904 = vadd.xlane.f32.xlu0 %v903_v53 }
 0x5ab   : > { %v879_v55 = vpop.permute.xlu0 %878 }
 0x5ac   : > { %v888_v36 = vsel %vm863_vm5, %v879_v55, 0.0 }
 0x5ad   : > { %889 = vadd.xlane.f32.xlu1 %v888_v36 }
 0x5af   : > { %v897_v56 = vpop.permute.xlu0 %896 }
 0x5b0   : > { %v906_v57 = vsel %vm863_vm5, %v897_v56, 0.0 }
 0x5b1   : > { %907 = vadd.xlane.f32.xlu0 %v906_v57 }
 0x5b3   : > { %v915_v59 = vpop.permute.xlu0 %914 }
 0x5b4   : > { %v924_v58 = vsel %vm863_vm5, %v915_v59, 0.0 }
 0x5b5   : > { %925 = vadd.xlane.f32.xlu1 %v924_v58  ;;  %871 = vadd.xlane.f32.xlu0 %v870_v60 }
 0x5dc   : > { %v881_v23 = vpop.permute.xlu0 %880  ;;  %v899_v47 = vpop.permute.xlu1 %898 }
 0x5dd   : > { %v891_v61 = vsel %vm863_vm5, %v881_v23, 0.0  ;;  %v909_v48 = vsel %vm863_vm5, %v899_v47, 0.0 }
 0x5de   : > { %892 = vadd.xlane.f32.xlu1 %v891_v61  ;;  %910 = vadd.xlane.f32.xlu0 %v909_v48 }
 0x5e0   : > { %v917_v24 = vpop.permute.xlu0 %916 }
 0x5e1   : > { %v927_v33 = vsel %vm863_vm5, %v917_v24, 0.0 }
 0x5e2   : > { %928 = vadd.xlane.f32.xlu1 %v927_v33 }
 0x5fd   : > { %v3232_v34 = vpop.f32.mrb[12].mxu0 }
 0x5fe   : > { %v1160_v38 = vpop.f32.mrb[13].mxu0 }
 0x5ff   : > { %v3565_v40 = vpack.c.bf16 %v3232_v34, %v1160_v38 }
 0x601   : > { %v3235_v41 = vpop.f32.mrb[14].mxu0  ;;  %3566 = vmatpush3.bf16.msra.mxu0 %v3565_v40 }
 0x602   : > { %v1170_v42 = vpop.f32.mrb[15].mxu0  ;;  %3567 = vmatprep.subr.bf16.mxu0 %v4013_v3 }
 0x603   : > { %v3568_v43 = vpack.c.bf16 %v3235_v41, %v1170_v42 }
 0x605   : > { %v3238_v63 = vpop.f32.mrb[16].mxu0  ;;  %3569 = vmatpush3.bf16.msra.mxu0 %v3568_v43 }
 0x606   : > { %v1180_v2 = vpop.f32.mrb[17].mxu0  ;;  %3570 = vmatprep.subr.bf16.mxu0 %v4013_v3 }
 0x607   : > { %v3571_v4 = vpack.c.bf16 %v3238_v63, %v1180_v2  ;;  %v4024_v63 = vmov 2   ;;  %v4025_v2 = vmov 3  }
 0x609   : > { %3572 = vmatpush3.bf16.msra.mxu0 %v3571_v4 }
 0x60a   : > { %3573 = vmatprep.subr.bf16.mxu0 %v4013_v3 }
 0x60d   : > { %v3241_v13 = vpop.f32.mrb[18].mxu0 }
 0x60e   : > { %v1190_v22 = vpop.f32.mrb[19].mxu0 }
 0x60f   : > { %v3574_v51 = vpack.c.bf16 %v3241_v13, %v1190_v22 }
 0x611   : > { %3575 = vmatpush3.bf16.msra.mxu0 %v3574_v51 }
 0x612   : > { %3576 = vmatprep.subr.bf16.mxu0 %v4013_v3 }
 0x615   : > { %v3244_v52 = vpop.f32.mrb[20].mxu0 }
 0x616   : > { %v1200_v53 = vpop.f32.mrb[21].mxu0 }
 0x617   : > { %v3577_v55 = vpack.c.bf16 %v3244_v52, %v1200_v53 }
 0x619   : > { %3578 = vmatpush3.bf16.msra.mxu0 %v3577_v55 }
 0x61a   : > { %3579 = vmatprep.subr.bf16.mxu0 %v4013_v3  ;;  %v869_v59 = vpop.xlane.xlu0 %868 }
 0x61b   : > { %v866_v58 = vpop.xlane.xlu1 %865 }
 0x61d   : > { %v3247_v36 = vpop.f32.mrb[22].mxu0 }
 0x61e   : > { %v1210_v56 = vpop.f32.mrb[23].mxu0 }
 0x61f   : > { %v3580_v57 = vpack.c.bf16 %v3247_v36, %v1210_v56 }
 0x621   : > { %3581 = vmatpush3.bf16.msra.mxu0 %v3580_v57 }
 0x622   : > { %3582 = vmatprep.subr.bf16.mxu0 %v4013_v3 }
 0x632   : > { %v887_v60 = vpop.xlane.xlu0 %886 }
 0x633   : > { %v931_v23 = vsel %vm930_vm6, %v866_v58, %v887_v60 }
 0x636   : > { %v905_v47 = vpop.xlane.xlu0 %904  ;;  %v923_v61 = vpop.xlane.xlu1 %922 }
 0x637   : > { %v935_v48 = vsel %vm934_vm7, %v931_v23, %v905_v47 }
 0x638   : > { %v939_v24 = vsel %vm938_vm8, %v935_v48, %v923_v61 }
 0x639   : > { %3877 = vrcp.f32 %v939_v24 }
 0x63a   : > { %v890_v33 = vpop.xlane.xlu1 %889 }
 0x63b   : > { %v932_v41 = vsel %vm930_vm6, %v869_v59, %v890_v33 }
 0x63e   : > { %v908_v34 = vpop.xlane.xlu0 %907 }
 0x63f   : > { %v936_v42 = vsel %vm934_vm7, %v932_v41, %v908_v34 }
 0x642   : > { %v926_v38 = vpop.xlane.xlu1 %925  ;;  %v872_v13 = vpop.xlane.xlu0 %871 }
 0x643   : > { %v3878_v40 = vpop.eup %3877  ;;  %v940_v43 = vsel %vm938_vm8, %v936_v42, %v926_v38 }
 0x644   : > { %964 = vperm.xlu1 %3802, %v3878_v40   ;;  %947 = vperm.xlu0 %3801, %v3878_v40   ;;  %3879 = vrcp.f32 %v940_v43 }
 0x648   : > { %3803 = vset.pattern.permute.xlu1 %v4024_v63  ;;  %3810 = vset.pattern.permute.xlu0 %v4022_v62 }
 0x649   : > { %979 = vperm.xlu1 %3803, %v3878_v40  }
 0x64d   : > { %3804 = vset.pattern.permute.xlu1 %v4025_v2 }
 0x64e   : > { %994 = vperm.xlu1 %3804, %v3878_v40   ;;  %v3880_v4 = vpop.eup %3879 }
 0x652   : > { %3805 = vset.pattern.permute.xlu1 %v4023_v39 }
 0x653   : > { %952 = vperm.xlu1 %3805, %v3880_v4  }
 0x657   : > { %3806 = vset.pattern.permute.xlu1 %v4022_v62 }
 0x658   : > { %968 = vperm.xlu1 %3806, %v3880_v4  }
 0x65c   : > { %3807 = vset.pattern.permute.xlu1 %v4024_v63 }
 0x65d   : > { %983 = vperm.xlu1 %3807, %v3880_v4  }
 0x661   : > { %3808 = vset.pattern.permute.xlu1 %v4025_v2 }
 0x662   : > { %998 = vperm.xlu1 %3808, %v3880_v4  }
 0x666   : > { %3809 = vset.pattern.permute.xlu1 %v4023_v39 }
 0x66b   : > { %v893_v22 = vpop.xlane.xlu1 %892  ;;  %v911_v51 = vpop.xlane.xlu0 %910 }
 0x66c   : > { %v933_v52 = vsel %vm930_vm6, %v872_v13, %v893_v22 }
 0x66d   : > { %v937_v53 = vsel %vm934_vm7, %v933_v52, %v911_v51 }
 0x66f   : > { %v929_v55 = vpop.xlane.xlu1 %928 }
 0x670   : > { %v941_v36 = vsel %vm938_vm8, %v937_v53, %v929_v55 }
 0x671   : > { %3881 = vrcp.f32 %v941_v36 }
 0x67b   : > { %v3882_v56 = vpop.eup %3881 }
 0x67c   : > { %972 = vperm.xlu0 %3810, %v3882_v56   ;;  %957 = vperm.xlu1 %3809, %v3882_v56  }
 0x680   : > { %3811 = vset.pattern.permute.xlu1 %v4024_v63  ;;  %1312 = vrot.lane.b32.xlu0 %v4346_v32, %s4017_s9 }
 0x681   : > { %987 = vperm.xlu1 %3811, %v3882_v56  }
 0x685   : > { %3812 = vset.pattern.permute.xlu1 %v4025_v2 }
 0x686   : > { %1002 = vperm.xlu1 %3812, %v3882_v56  }
 0x68a   : > { %3853 = vset.pattern.permute.xlu1 %v4023_v39 }
 0x6c3   : > { %v965_v57 = vpop.permute.xlu1 %964  ;;  %v948_v59 = vpop.permute.xlu0 %947 }
 0x6c4   : > { %v960_v60 = vmul.f32 %v4543_v46, %v948_v59  ;;  %v975_v23 = vmul.f32 %v4543_v46, %v965_v57 }
 0x6c6   : > { %v1008_v48 = vsel %vm863_vm5, %v960_v60, %v975_v23 }
 0x6c8   : > { %v980_v58 = vpop.permute.xlu1 %979 }
 0x6c9   : > { %v990_v47 = vmul.f32 %v4543_v46, %v980_v58 }
 0x6cb   : > { %v1011_v24 = vsel %vm321_vm1, %v1008_v48, %v990_v47 }
 0x6cd   : > { %v995_v61 = vpop.permute.xlu1 %994 }
 0x6ce   : > { %v1005_v32 = vmul.f32 %v4543_v46, %v995_v61 }
 0x6d0   : > { %v1015_v33 = vsel %vm1014_vm9, %v1011_v24, %v1005_v32 }
 0x6d1   : > { %3273 = vmatmul.mubr.msk.f32.vlgmr.msra.gmra.mrb[24].mxu0 %vm844_vm4, %v1015_v33 }
 0x6d2   : > { %v953_v34 = vpop.permute.xlu1 %952  ;;  %3275 = vmatprep.mubr.msk.f32.mxu0 %vm4014_vm0, %v4015_v6 }
 0x6d3   : > { %v961_v43 = vmul.f32 %v4553_v49, %v953_v34 }
 0x6d7   : > { %v969_v38 = vpop.permute.xlu1 %968 }
 0x6d8   : > { %v976_v41 = vmul.f32 %v4553_v49, %v969_v38 }
 0x6da   : > { %v1009_v46 = vsel %vm863_vm5, %v961_v43, %v976_v41 }
 0x6dc   : > { %v984_v40 = vpop.permute.xlu1 %983 }
 0x6dd   : > { %v991_v42 = vmul.f32 %v4553_v49, %v984_v40 }
 0x6df   : > { %v1012_v22 = vsel %vm321_vm1, %v1009_v46, %v991_v42 }
 0x6e1   : > { %v999_v4 = vpop.permute.xlu1 %998 }
 0x6e2   : > { %v1006_v13 = vmul.f32 %v4553_v49, %v999_v4 }
 0x6e4   : > { %v1016_v51 = vsel %vm1014_vm9, %v1012_v22, %v1006_v13 }
 0x6e5   : > { %3276 = vmatmul.mubr.msk.f32.gmra.mrb[26].mxu0 %vm844_vm4, %v1016_v51 }
 0x6e6   : > { %3278 = vmatprep.mubr.msk.f32.mxu0 %vm4014_vm0, %v4015_v6 }
 0x6fb   : > { %v958_v52 = vpop.permute.xlu1 %957  ;;  %v973_v53 = vpop.permute.xlu0 %972 }
 0x6fc   : > { %v977_v36 = vmul.f32 %v4568_v50, %v973_v53  ;;  %v962_v56 = vmul.f32 %v4568_v50, %v958_v52 }
 0x6fe   : > { %v1010_v49 = vsel %vm863_vm5, %v962_v56, %v977_v36 }
 0x6ff   : > { %v1313_v61 = vpop.permute.xlu0 %1312 }
 0x700   : > { %v988_v55 = vpop.permute.xlu1 %987 }
 0x701   : > { %v992_v57 = vmul.f32 %v4568_v50, %v988_v55 }
 0x703   : > { %v1013_v60 = vsel %vm321_vm1, %v1010_v49, %v992_v57 }
 0x705   : > { %v1003_v59 = vpop.permute.xlu1 %1002 }
 0x706   : > { %v1007_v58 = vmul.f32 %v4568_v50, %v1003_v59 }
 0x708   : > { %v1017_v23 = vsel %vm1014_vm9, %v1013_v60, %v1007_v58  ;;  %v415_v58 = vld [vmem:[%s5279_s4 + $0x8] sm:$0xff]  ;;  %v416_v60 = vld [vmem:[%s5279_s4 + $0x18] sm:$0xff] }
 0x709   : > { %3279 = vmatmul.mubr.msk.f32.gmra.mrb[28].mxu0 %vm844_vm4, %v1017_v23  ;;  %v3583_v23 = vpack.c.bf16 %v416_v60, %v415_v58 }
 0x70a   : > { %3289 = vmatprep.mubr.msk.f32.mxu0 %vm4014_vm0, %v4015_v6 }
 0x70b   : > { %3584 = vmatpush3.bf16.msra.mxu0 %v3583_v23 }
 0x70c   : > { %3585 = vmatprep.subr.bf16.mxu0 %v4013_v3 }
 0x7a4   : > { %v1294_v47 = vpop.f32.mrb[24].mxu0 }
 0x7a5   : > { %v1308_v48 = vadd.f32 %v1294_v47, %v4166_v16  ;;  %v3274_v32 = vpop.f32.mrb[25].mxu0 }
 0x7a6   : > { %v418_v32 = vld [vmem:[%s5279_s4 + $0x38] sm:$0xff] }
 0x7a7   : > { %v4652_v24 = vadd.f32 %v1313_v61, %v1308_v48  ;;  %v417_v48 = vld [vmem:[%s5279_s4 + $0x28] sm:$0xff] }
 0x7a9   : > { %v1318_v33 = vsel %vm439_vm2, %v4652_v24, 0.0 }
 0x7aa   : > { %1319 = vadd.xlane.f32.xlu1 %v1318_v33  ;;  %v3586_v33 = vpack.c.bf16 %v418_v32, %v417_v48  ;;  %v421_v48 = vld [vmem:[%s5280_s5 + $0x10] sm:$0xff]  ;;  %v422_v32 = vld [vmem:[%s5280_s5 + $0x18] sm:$0xff] }
 0x7ac   : > { %3587 = vmatpush3.bf16.msra.mxu0 %v3586_v33  ;;  %v3592_v33 = vpack.c.bf16 %v422_v32, %v421_v48 }
 0x7ad   : > { %3612 = vmatprep.subr.bf16.mxu0 %v4013_v3 }
 0x7b8   : > { %v1299_v50 = vpop.f32.mrb[26].mxu0 }
 0x7b9   : > { %v1309_v34 = vadd.f32 %v1299_v50, %v4173_v21  ;;  %v3277_v38 = vpop.f32.mrb[27].mxu0  ;;  %v419_v50 = vld [vmem:[%s5280_s5] sm:$0xff] }
 0x7bb   : > { %v4657_v40 = vadd.f32 %v1313_v61, %v1309_v34  ;;  %v420_v34 = vld [vmem:[%s5280_s5 + $0x8] sm:$0xff] }
 0x7bc   : > { %v3589_v38 = vpack.c.bf16 %v420_v34, %v419_v50  ;;  %v424_v50 = vld [vmem:[%s5280_s5 + $0x28] sm:$0xff] }
 0x7bd   : > { %v1321_v41 = vsel %vm439_vm2, %v4657_v40, 0.0 }
 0x7be   : > { %1322 = vadd.xlane.f32.xlu0 %v1321_v41  ;;  %3590 = vmatpush3.bf16.msra.mxu1 %v3589_v38  ;;  %v425_v38 = vld [vmem:[%s5280_s5 + $0x30] sm:$0xff] }
 0x7bf   : > { %3591 = vmatprep.subr.bf16.mxu1 %v4013_v3 }
 0x7c2   : > { %3593 = vmatpush3.bf16.msra.mxu1 %v3592_v33 }
 0x7c3   : > { %3594 = vmatprep.subr.bf16.mxu1 %v4013_v3 }
 0x7dc   : > { %v1304_v42 = vpop.f32.mrb[28].mxu0 }
 0x7dd   : > { %v1310_v16 = vadd.f32 %v1304_v42, %v4180_v26  ;;  %v3280_v43 = vpop.f32.mrb[29].mxu0 }
 0x7df   : > { %v4662_v4 = vadd.f32 %v1313_v61, %v1310_v16 }
 0x7e1   : > { %v1324_v46 = vsel %vm439_vm2, %v4662_v4, 0.0 }
 0x7e2   : > { %1325 = vadd.xlane.f32.xlu0 %v1324_v46 }
 0x837   : > { %v1320_v13 = vpop.xlane.xlu1 %1319 }
 0x838   : > { %v1327_v22 = vmul.f32 0.03125, %v1320_v13 }
 0x83a   : > { %v1330_v21 = vsub.f32 %v4652_v24, %v1327_v22 }
 0x83c   : > { %v1333_v51 = vmul.f32 %v1330_v21, %v1330_v21 }
 0x83e   : > { %v1336_v52 = vsel %vm439_vm2, %v1333_v51, 0.0 }
 0x83f   : > { %1337 = vadd.xlane.f32.xlu1 %v1336_v52 }
 0x84b   : > { %v1323_v53 = vpop.xlane.xlu0 %1322 }
 0x84c   : > { %v1328_v55 = vmul.f32 0.03125, %v1323_v53 }
 0x84e   : > { %v1331_v36 = vsub.f32 %v4657_v40, %v1328_v55 }
 0x850   : > { %v1334_v26 = vmul.f32 %v1331_v36, %v1331_v36 }
 0x852   : > { %v1339_v56 = vsel %vm439_vm2, %v1334_v26, 0.0 }
 0x853   : > { %1340 = vadd.xlane.f32.xlu0 %v1339_v56 }
 0x869   : > { %1357 = vrot.lane.b32.xlu0 %v4205_v44, %s4018_s29 }
 0x86f   : > { %v1326_v57 = vpop.xlane.xlu0 %1325 }
 0x870   : > { %v1329_v59 = vmul.f32 0.03125, %v1326_v57 }
 0x872   : > { %v1332_v49 = vsub.f32 %v4662_v4, %v1329_v59 }
 0x874   : > { %v1335_v47 = vmul.f32 %v1332_v49, %v1332_v49 }
 0x876   : > { %v1342_v61 = vsel %vm439_vm2, %v1335_v47, 0.0 }
 0x877   : > { %1343 = vadd.xlane.f32.xlu1 %v1342_v61 }
 0x888   : > { %1363 = vrot.lane.b32.xlu1 %v4205_v44, %s4017_s9 }
 0x8cc   : > { %v1338_v41 = vpop.xlane.xlu1 %1337 }
 0x8cd   : > { %v1345_v16 = vmul.f32 0.03125, %v1338_v41  ;;  %v426_v41 = vld [vmem:[%s5280_s5 + $0x38] sm:$0xff] }
 0x8cf   : > { %v1348_v44 = vadd.f32 1e-06, %v1345_v16  ;;  %v427_v16 = vld [vmem:[%s5280_s5 + $0x40] sm:$0xff] }
 0x8d1   : > { %3883 = vrsqrt.f32 %v1348_v44 }
 0x8db   : > { %v3884_v13 = vpop.eup %3883 }
 0x8dc   : > { %v1354_v53 = vmul.f32 %v3884_v13, %v1330_v21  ;;  %v430_v13 = vld [vmem:[%s5280_s5 + $0x58] sm:$0xff] }
 0x8e0   : > { %v1341_v42 = vpop.xlane.xlu0 %1340 }
 0x8e1   : > { %v1346_v43 = vmul.f32 0.03125, %v1341_v42  ;;  %v3598_v42 = vpack.c.bf16 %v426_v41, %v425_v38 }
 0x8e3   : > { %v1349_v46 = vadd.f32 1e-06, %v1346_v43  ;;  %v428_v43 = vld [vmem:[%s5280_s5 + $0x48] sm:$0xff] }
 0x8e4   : > { %v1358_v51 = vpop.permute.xlu0 %1357  ;;  %v3601_v44 = vpack.c.bf16 %v428_v43, %v427_v16 }
 0x8e5   : > { %3885 = vrsqrt.f32 %v1349_v46  ;;  %v1360_v56 = vmul.f32 %v1358_v51, %v1354_v53  ;;  %v429_v46 = vld [vmem:[%s5280_s5 + $0x50] sm:$0xff] }
 0x8ef   : > { %v3886_v22 = vpop.eup %3885 }
 0x8f0   : > { %v1355_v26 = vmul.f32 %v3886_v22, %v1331_v36  ;;  %v3604_v22 = vpack.c.bf16 %v430_v13, %v429_v46 }
 0x8f2   : > { %v1361_v60 = vmul.f32 %v1358_v51, %v1355_v26  ;;  %v434_v26 = vld [vmem:[%s5280_s5 + $0x78] sm:$0xff] }
 0x904   : > { %v1344_v52 = vpop.xlane.xlu1 %1343 }
 0x905   : > { %v1347_v55 = vmul.f32 0.03125, %v1344_v52  ;;  %v432_v52 = vld [vmem:[%s5280_s5 + $0x68] sm:$0xff] }
 0x907   : > { %v1350_v57 = vadd.f32 1e-06, %v1347_v55  ;;  %v433_v55 = vld [vmem:[%s5280_s5 + $0x70] sm:$0xff] }
 0x908   : > { %v1364_v59 = vpop.permute.xlu1 %1363 }
 0x909   : > { %3887 = vrsqrt.f32 %v1350_v57  ;;  %v1366_v58 = vadd.f32 %v1364_v59, %v1360_v56  ;;  %v1367_v23 = vadd.f32 %v1364_v59, %v1361_v60  ;;  %v3610_v56 = vpack.c.bf16 %v434_v26, %v433_v55  ;;  %v2929_v57 = vld [vmem:[%s5281_s6 + $0x2] ss:$0 sm:$0xff] }
 0x90b   : > { %3290 = vmatmul.mubr.msk.f32.vlgmr.msra.gmra.mrb[30].mxu0 %vm439_vm2, %v1366_v58 }
 0x90c   : > { %3292 = vmatprep.mubr.msk.f32.mxu0 %vm4014_vm0, %v4015_v6 }
 0x90f   : > { %3293 = vmatmul.mubr.msk.f32.gmra.mrb[32].mxu0 %vm439_vm2, %v1367_v23 }
 0x910   : > { %3295 = vmatprep.mubr.msk.f32.mxu0 %vm4014_vm0, %v4015_v6 }
 0x913   : > { %v3888_v21 = vpop.eup %3887 }
 0x914   : > { %v1356_v47 = vmul.f32 %v3888_v21, %v1332_v49  ;;  %v423_v49 = vld [vmem:[%s5280_s5 + $0x20] sm:$0xff] }
 0x915   : > { %v3595_v34 = vpack.c.bf16 %v424_v50, %v423_v49 }
 0x916   : > { %v1362_v36 = vmul.f32 %v1358_v51, %v1356_v47  ;;  %v431_v51 = vld [vmem:[%s5280_s5 + $0x60] sm:$0xff] }
 0x917   : > { %3596 = vmatpush3.bf16.msra.mxu1 %v3595_v34  ;;  %v3607_v53 = vpack.c.bf16 %v432_v52, %v431_v51 }
 0x918   : > { %v1368_v61 = vadd.f32 %v1364_v59, %v1362_v36  ;;  %3597 = vmatprep.subr.bf16.mxu1 %v4013_v3 }
 0x91a   : > { %3296 = vmatmul.mubr.msk.f32.gmra.mrb[34].mxu0 %vm439_vm2, %v1368_v61 }
 0x91b   : > { %3347 = vmatprep.mubr.msk.f32.mxu0 %vm4014_vm0, %v4015_v6  ;;  %3599 = vmatpush3.bf16.msra.mxu1 %v3598_v42 }
 0x91c   : > { %3600 = vmatprep.subr.bf16.mxu1 %v4013_v3 }
 0x91f   : > { %3602 = vmatpush3.bf16.msra.mxu1 %v3601_v44 }
 0x920   : > { %3603 = vmatprep.subr.bf16.mxu1 %v4013_v3 }
 0x923   : > { %3605 = vmatpush3.bf16.msra.mxu1 %v3604_v22 }
 0x924   : > { %3606 = vmatprep.subr.bf16.mxu1 %v4013_v3 }
 0x927   : > { %3608 = vmatpush3.bf16.msra.mxu1 %v3607_v53 }
 0x928   : > { %3609 = vmatprep.subr.bf16.mxu1 %v4013_v3 }
 0x92b   : > { %3611 = vmatpush3.bf16.msra.mxu1 %v3610_v56 }
 0x9de   : > { %v1448_v59 = vpop.f32.mrb[30].mxu0 }
 0x9df   : > { %v1449_v58 = vadd.f32 %v2929_v57, %v1448_v59  ;;  %v3291_v60 = vpop.f32.mrb[31].mxu0 }
 0x9e1   : > { %v1465_v23 = vmul.f32 0.044715, %v1449_v58  ;;  %v1462_v51 = vmul.f32 0.5, %v1449_v58 }
 0x9e2   : > { %v1453_v21 = vpop.f32.mrb[32].mxu0 }
 0x9e3   : > { %v1468_v47 = vmul.f32 %v1465_v23, %v1449_v58  ;;  %v1454_v36 = vadd.f32 %v2929_v57, %v1453_v21  ;;  %v3294_v61 = vpop.f32.mrb[33].mxu0 }
 0x9e4   : > { %v2933_v61 = vld [vmem:[%s5281_s6 + $0x3] ss:$0 sm:$0xff] }
 0x9e5   : > { %v1471_v48 = vmul.f32 %v1468_v47, %v1449_v58  ;;  %v1466_v32 = vmul.f32 0.044715, %v1454_v36  ;;  %v1463_v59 = vmul.f32 0.5, %v1454_v36 }
 0x9e7   : > { %v1474_v33 = vadd.f32 %v1471_v48, %v1449_v58  ;;  %v1469_v49 = vmul.f32 %v1466_v32, %v1454_v36 }
 0x9e9   : > { %v1477_v50 = vmul.f32 0.7978846, %v1474_v33  ;;  %v1472_v34 = vmul.f32 %v1469_v49, %v1454_v36 }
 0x9eb   : > { %3889 = vtanh.f32 %v1477_v50  ;;  %v1475_v38 = vadd.f32 %v1472_v34, %v1454_v36 }
 0x9ed   : > { %v1458_v41 = vpop.f32.mrb[34].mxu0  ;;  %v1478_v42 = vmul.f32 0.7978846, %v1475_v38 }
 0x9ee   : > { %v1459_v16 = vadd.f32 %v2929_v57, %v1458_v41  ;;  %v3297_v43 = vpop.f32.mrb[35].mxu0 }
 0x9ef   : > { %3891 = vtanh.f32 %v1478_v42 }
 0x9f0   : > { %v1467_v44 = vmul.f32 0.044715, %v1459_v16  ;;  %v1464_v21 = vmul.f32 0.5, %v1459_v16 }
 0x9f2   : > { %v1470_v46 = vmul.f32 %v1467_v44, %v1459_v16 }
 0x9f4   : > { %v1473_v13 = vmul.f32 %v1470_v46, %v1459_v16 }
 0x9f5   : > { %v3890_v22 = vpop.eup %3889 }
 0x9f6   : > { %v1483_v52 = vadd.f32 1.0, %v3890_v22  ;;  %v1476_v53 = vadd.f32 %v1473_v13, %v1459_v16 }
 0x9f8   : > { %v1486_v55 = vmul.f32 %v1483_v52, %v1462_v51  ;;  %v1479_v26 = vmul.f32 0.7978846, %v1476_v53 }
 0x9f9   : > { %v3892_v56 = vpop.eup %3891 }
 0x9fa   : > { %3331 = vmatmul.mubr.f32.vlgmr.msra.gmra.mrb[6].mxu1 %v1486_v55  ;;  %v1484_v60 = vadd.f32 1.0, %v3892_v56  ;;  %3893 = vtanh.f32 %v1479_v26 }
 0x9fb   : > { %3333 = vmatprep.mubr.msk.f32.mxu1 %vm4014_vm0, %v4015_v6 }
 0x9fc   : > { %v1487_v57 = vmul.f32 %v1484_v60, %v1463_v59 }
 0x9fe   : > { %3334 = vmatmul.mubr.f32.gmra.mrb[8].mxu1 %v1487_v57 }
 0x9ff   : > { %3336 = vmatprep.mubr.msk.f32.mxu1 %vm4014_vm0, %v4015_v6 }
 0xa04   : > { %v3894_v23 = vpop.eup %3893 }
 0xa05   : > { %v1485_v58 = vadd.f32 1.0, %v3894_v23 }
 0xa07   : > { %v1488_v47 = vmul.f32 %v1485_v58, %v1464_v21  ;;  %v4788_v58 = vld [vmem:[%s5279_s4 + $0x40] sm:$0xff] }
 0xa09   : > { %3337 = vmatmul.mubr.f32.gmra.mrb[10].mxu1 %v1488_v47  ;;  %v4793_v47 = vld [vmem:[%s5279_s4 + $0x50] sm:$0xff] }
 0xacd   : > { %v1555_v36 = vpop.f32.mrb[6].mxu1 }
 0xace   : > { %v1569_v48 = vadd.f32 %v1555_v36, %v4652_v24  ;;  %v3332_v32 = vpop.f32.mrb[7].mxu1  ;;  %v3613_v36 = vpack.c.bf16 %v4793_v47, %v4788_v58 }
 0xacf   : > { %v4813_v32 = vld [vmem:[%s5279_s4 + $0x70] sm:$0xff] }
 0xad0   : > { %v4765_v33 = vadd.f32 %v2933_v61, %v1569_v48  ;;  %3614 = vmatpush3.bf16.msra.mxu0 %v3613_v36  ;;  %v4808_v48 = vld [vmem:[%s5279_s4 + $0x60] sm:$0xff] }
 0xad1   : > { %v1560_v49 = vpop.f32.mrb[8].mxu1  ;;  %3615 = vmatprep.subr.bf16.mxu0 %v4013_v3 }
 0xad2   : > { %v1570_v50 = vadd.f32 %v1560_v49, %v4657_v40  ;;  %v3335_v34 = vpop.f32.mrb[9].mxu1  ;;  %v1607_v38 = vsel %vm439_vm2, %v4765_v33, 0.0  ;;  %v3616_v49 = vpack.c.bf16 %v4813_v32, %v4808_v48 }
 0xad3   : > { %1608 = vadd.xlane.f32.xlu1 %v1607_v38 }
 0xad4   : > { %v4770_v41 = vadd.f32 %v2933_v61, %v1570_v50  ;;  %3617 = vmatpush3.bf16.msra.mxu0 %v3616_v49 }
 0xad5   : > { %3618 = vmatprep.subr.bf16.mxu0 %v4013_v3 }
 0xad6   : > { %v1610_v42 = vsel %vm439_vm2, %v4770_v41, 0.0 }
 0xad7   : > { %1611 = vadd.xlane.f32.xlu0 %v1610_v42 }
 0xadc   : > { %v1565_v16 = vpop.f32.mrb[10].mxu1 }
 0xadd   : > { %v1571_v24 = vadd.f32 %v1565_v16, %v4662_v4  ;;  %v3338_v43 = vpop.f32.mrb[11].mxu1 }
 0xadf   : > { %v4775_v44 = vadd.f32 %v2933_v61, %v1571_v24  ;;  %v4798_v61 = vld [vmem:[%s5281_s6 + $0x4] ss:$0 sm:$0xff] }
 0xae1   : > { %v1613_v40 = vsel %vm439_vm2, %v4775_v44, 0.0 }
 0xae2   : > { %1614 = vadd.xlane.f32.xlu0 %v1613_v40 }
 0xb60   : > { %v1609_v46 = vpop.xlane.xlu1 %1608 }
 0xb61   : > { %v1616_v13 = vmul.f32 0.03125, %v1609_v46 }
 0xb63   : > { %v1619_v22 = vsub.f32 %v4765_v33, %v1616_v13 }
 0xb64   : > { %v1612_v51 = vpop.xlane.xlu0 %1611 }
 0xb65   : > { %v1617_v52 = vmul.f32 0.03125, %v1612_v51  ;;  %v1622_v53 = vmul.f32 %v1619_v22, %v1619_v22 }
 0xb67   : > { %v1620_v55 = vsub.f32 %v4770_v41, %v1617_v52  ;;  %v1625_v26 = vsel %vm439_vm2, %v1622_v53, 0.0 }
 0xb68   : > { %1626 = vadd.xlane.f32.xlu1 %v1625_v26 }
 0xb69   : > { %v1623_v4 = vmul.f32 %v1620_v55, %v1620_v55 }
 0xb6b   : > { %v1628_v56 = vsel %vm439_vm2, %v1623_v4, 0.0 }
 0xb6c   : > { %1629 = vadd.xlane.f32.xlu0 %v1628_v56 }
 0xb6f   : > { %v1615_v59 = vpop.xlane.xlu0 %1614 }
 0xb70   : > { %v1618_v60 = vmul.f32 0.03125, %v1615_v59 }
 0xb72   : > { %v1621_v57 = vsub.f32 %v4775_v44, %v1618_v60 }
 0xb74   : > { %v1624_v23 = vmul.f32 %v1621_v57, %v1621_v57 }
 0xb76   : > { %v1631_v21 = vsel %vm439_vm2, %v1624_v23, 0.0 }
 0xb77   : > { %1632 = vadd.xlane.f32.xlu1 %v1631_v21 }
 0xb82   : > { %1654 = vrot.lane.b32.xlu0 %v4798_v61, %s4016_s22 }
 0xbf5   : > { %v1627_v50 = vpop.xlane.xlu1 %1626 }
 0xbf6   : > { %v1634_v34 = vmul.f32 0.03125, %v1627_v50 }
 0xbf8   : > { %v1637_v38 = vadd.f32 1e-06, %v1634_v34 }
 0xbf9   : > { %v1630_v42 = vpop.xlane.xlu0 %1629 }
 0xbfa   : > { %3895 = vrsqrt.f32 %v1637_v38  ;;  %v1635_v16 = vmul.f32 0.03125, %v1630_v42 }
 0xbfc   : > { %v1638_v24 = vadd.f32 1e-06, %v1635_v16 }
 0xbfd   : > { %v1655_v51 = vpop.permute.xlu0 %1654 }
 0xbfe   : > { %3897 = vrsqrt.f32 %v1638_v24 }
 0xc04   : > { %v3896_v43 = vpop.eup %3895  ;;  %v1633_v40 = vpop.xlane.xlu1 %1632 }
 0xc05   : > { %v1636_v46 = vmul.f32 0.03125, %v1633_v40  ;;  %v1643_v13 = vmul.f32 %v3896_v43, %v1619_v22 }
 0xc07   : > { %v1639_v52 = vadd.f32 1e-06, %v1636_v46  ;;  %v1650_v53 = vmul.f32 %v4798_v61, %v1643_v13 }
 0xc08   : > { %v3898_v26 = vpop.eup %3897 }
 0xc09   : > { %3899 = vrsqrt.f32 %v1639_v52  ;;  %v1644_v4 = vmul.f32 %v3898_v26, %v1620_v55  ;;  %v1657_v56 = vadd.f32 %v1655_v51, %v1650_v53  ;;  %v4833_v55 = vld [vmem:[%s5281_s6 + $0x5] ss:$0 sm:$0xff] }
 0xc0b   : > { %v1651_v59 = vmul.f32 %v4798_v61, %v1644_v4  ;;  %3348 = vmatmul.mubr.msk.f32.vlgmr.msra.gmra.mrb[36].mxu0 %vm439_vm2, %v1657_v56 }
 0xc0c   : > { %3350 = vmatprep.mubr.msk.f32.mxu0 %vm4014_vm0, %v4015_v6 }
 0xc0d   : > { %v1658_v60 = vadd.f32 %v1655_v51, %v1651_v59 }
 0xc0f   : > { %3351 = vmatmul.mubr.msk.f32.gmra.mrb[38].mxu0 %vm439_vm2, %v1658_v60 }
 0xc10   : > { %3353 = vmatprep.mubr.msk.f32.mxu0 %vm4014_vm0, %v4015_v6 }
 0xc13   : > { %v3900_v22 = vpop.eup %3899 }
 0xc14   : > { %v1645_v23 = vmul.f32 %v3900_v22, %v1621_v57 }
 0xc16   : > { %v1652_v21 = vmul.f32 %v4798_v61, %v1645_v23 }
 0xc18   : > { %v1659_v36 = vadd.f32 %v1655_v51, %v1652_v21 }
 0xc1a   : > { %3354 = vmatmul.mubr.msk.f32.gmra.mrb[40].mxu0 %vm439_vm2, %v1659_v36 }
 0xc1b   : > { %3380 = vmatprep.mubr.msk.f32.mxu0 %vm4014_vm0, %v4015_v6 }
 0xcde   : > { %v1739_v49 = vpop.f32.mrb[36].mxu0 }
 0xcdf   : > { %v3349_v50 = vpop.f32.mrb[37].mxu0  ;;  %v4836_v34 = vadd.f32 %v4833_v55, %v1739_v49 }
 0xce1   : > { %v1753_v16 = vmul.f32 %v4836_v34, %v4331_v25 }
 0xce2   : > { %v1744_v38 = vpop.f32.mrb[38].mxu0 }
 0xce3   : > { %v4839_v57 = vadd.f32 %v4833_v55, %v1744_v38  ;;  %v3352_v42 = vpop.f32.mrb[39].mxu0 }
 0xce5   : > { %v1754_v24 = vmul.f32 %v4839_v57, %v4333_v27  ;;  %v1757_v51 = vmul.f32 %v4839_v57, %v4341_v31  ;;  %v1756_v27 = vmul.f32 %v4836_v34, %v4335_v28  ;;  %v1760_v56 = vmul.f32 %v4839_v57, %v4348_v35 }
 0xce6   : > { %v3843_v35 = vpack.i.bf16 %v4793_v47, %v4788_v58  ;;  %v1769_v58 = vmul.f32 %v4839_v57, %v4485_v17 }
 0xce7   : > { %v3813_v43 = vpack.i.bf16 %v1754_v24, %v1753_v16 }
 0xce9   : > { %3814 = vrot.lane.b32.xlu1 %v3813_v43, %s4016_s22 }
 0xced   : > { %v1749_v40 = vpop.f32.mrb[40].mxu0 }
 0xcee   : > { %v4847_v46 = vadd.f32 %v4833_v55, %v1749_v40  ;;  %v3355_v13 = vpop.f32.mrb[41].mxu0 }
 0xcf0   : > { %v1758_v52 = vmul.f32 %v4847_v46, %v4339_v30  ;;  %v1755_v25 = vmul.f32 %v4847_v46, %v4337_v29  ;;  %v1761_v4 = vmul.f32 %v4847_v46, %v4367_v1  ;;  %v1762_v30 = vmul.f32 %v4836_v34, %v4365_v0 }
 0xcf1   : > { %v1759_v29 = vmul.f32 %v4836_v34, %v4353_v37  ;;  %v1764_v59 = vmul.f32 %v4847_v46, %v4382_v12  ;;  %v1763_v1 = vmul.f32 %v4839_v57, %v4390_v15  ;;  %v3848_v37 = vpack.i.bf16 %v4813_v32, %v4808_v48 }
 0xcf2   : > { %v3823_v53 = vpack.i.bf16 %v1758_v52, %v1757_v51  ;;  %v3818_v26 = vpack.i.bf16 %v1756_v27, %v1755_v25  ;;  %v3833_v31 = vpack.i.bf16 %v1762_v30, %v1761_v4  ;;  %v1765_v0 = vmul.f32 %v4836_v34, %v4438_v45 }
 0xcf3   : > { %v3828_v28 = vpack.i.bf16 %v1760_v56, %v1759_v29  ;;  %v3838_v60 = vpack.i.bf16 %v1764_v59, %v1763_v1  ;;  %v1766_v12 = vmul.f32 %v4839_v57, %v4470_v5  ;;  %v1768_v15 = vmul.f32 %v4836_v34, %v4472_v7 }
 0xcf4   : > { %3824 = vrot.lane.b32.xlu0 %v3823_v53, %s4016_s22  ;;  %3819 = vrot.lane.b32.xlu1 %v3818_v26, %s4016_s22  ;;  %v1771_v45 = vmul.f32 %v4836_v34, %v4487_v18  ;;  %v1767_v5 = vmul.f32 %v4847_v46, %v4483_v14  ;;  %v1772_v7 = vmul.f32 %v4839_v57, %v4476_v9 }
 0xcf5   : > { %v1770_v17 = vmul.f32 %v4847_v46, %v4474_v8  ;;  %v1774_v18 = vmul.f32 %v4836_v34, %v4478_v10  ;;  %v1775_v14 = vmul.f32 %v4839_v57, %v4491_v20  ;;  %v1776_v9 = vmul.f32 %v4847_v46, %v4480_v11 }
 0xcf8   : > { %3834 = vrot.lane.b32.xlu0 %v3833_v31, %s4016_s22  ;;  %3829 = vrot.lane.b32.xlu1 %v3828_v28, %s4016_s22 }
 0xcfc   : > { %3844 = vrot.lane.b32.xlu0 %v3843_v35, %s4017_s9  ;;  %3839 = vrot.lane.b32.xlu1 %v3838_v60, %s4016_s22 }
 0xd00   : > { %3849 = vrot.lane.b32.xlu0 %v3848_v37, %s4017_s9 }
 0xd04   : > { %2106 = vrot.lane.b32.xlu0 %v1765_v0, %s4018_s29 }
 0xd08   : > { %2108 = vrot.lane.b32.xlu0 %v1766_v12, %s4018_s29 }
 0xd0c   : > { %2112 = vrot.lane.b32.xlu0 %v1768_v15, %s4018_s29 }
 0xd10   : > { %2114 = vrot.lane.b32.xlu0 %v1769_v58, %s4018_s29 }
 0xd14   : > { %2118 = vrot.lane.b32.xlu0 %v1771_v45, %s4018_s29 }
 0xd18   : > { %2110 = vrot.lane.b32.xlu0 %v1767_v5, %s4018_s29 }
 0xd1c   : > { %2120 = vrot.lane.b32.xlu0 %v1772_v7, %s4018_s29 }
 0xd20   : > { %2116 = vrot.lane.b32.xlu0 %v1770_v17, %s4018_s29  ;;  %v3931_v17 = vld [vmem:[%s5278_s3] sm:$0xff] }
 0xd24   : > { %2124 = vrot.lane.b32.xlu0 %v1774_v18, %s4018_s29 }
 0xd28   : > { %2126 = vrot.lane.b32.xlu0 %v1775_v14, %s4018_s29 }
 0xd2c   : > { %2128 = vrot.lane.b32.xlu0 %v1776_v9, %s4018_s29 }
 0xd5b   : > { %v3815_v47 = vpop.permute.xlu1 %3814 }
 0xd5c   : > { %v3817_v48 = vunpack.i.h.bf16 %v3815_v47  ;;  %v3816_v8 = vunpack.i.l.bf16 %v3815_v47 }
 0xd5e   : > { %v3619_v32 = vpack.c.bf16 %v3817_v48, %v3816_v8 }
 0xd60   : > { %3621 = vmatpush3.bf16.xpose.msk.msra.mxu0 %vm4425_vm3, %v3619_v32 }
 0xd61   : > { %3622 = vmatprep.subr.bf16.mxu0 %v4013_v3 }
 0xd66   : > { %v3825_v10 = vpop.permute.xlu0 %3824  ;;  %v3820_v22 = vpop.permute.xlu1 %3819 }
 0xd67   : > { %v3822_v23 = vunpack.i.h.bf16 %v3820_v22  ;;  %v3821_v20 = vunpack.i.l.bf16 %v3820_v22  ;;  %v3827_v11 = vunpack.i.h.bf16 %v3825_v10  ;;  %v3826_v49 = vunpack.i.l.bf16 %v3825_v10 }
 0xd69   : > { %v3623_v21 = vpack.c.bf16 %v3822_v23, %v3821_v20  ;;  %v3627_v16 = vpack.c.bf16 %v3827_v11, %v3826_v49  ;;  %v1773_v11 = vmul.f32 %v4847_v46, %v4489_v19 }
 0xd6a   : > { %v3835_v36 = vpop.permute.xlu0 %3834  ;;  %v3830_v43 = vpop.permute.xlu1 %3829 }
 0xd6b   : > { %3625 = vmatpush3.bf16.xpose.msk.msra.mxu0 %vm4425_vm3, %v3623_v21  ;;  %v3832_v52 = vunpack.i.h.bf16 %v3830_v43  ;;  %v3831_v25 = vunpack.i.l.bf16 %v3830_v43  ;;  %v3837_v56 = vunpack.i.h.bf16 %v3835_v36  ;;  %v3836_v30 = vunpack.i.l.bf16 %v3835_v36 }
 0xd6c   : > { %3626 = vmatprep.subr.bf16.mxu0 %v4013_v3 }
 0xd6d   : > { %v3631_v26 = vpack.c.bf16 %v3832_v52, %v3831_v25  ;;  %v3635_v31 = vpack.c.bf16 %v3837_v56, %v3836_v30 }
 0xd6e   : > { %v3845_v50 = vpop.permute.xlu0 %3844  ;;  %v3840_v28 = vpop.permute.xlu1 %3839 }
 0xd6f   : > { %v3847_v38 = vunpack.i.h.bf16 %v3845_v50  ;;  %v3846_v42 = vunpack.i.l.bf16 %v3845_v50  ;;  %v3842_v35 = vunpack.i.h.bf16 %v3840_v28  ;;  %v3841_v1 = vunpack.i.l.bf16 %v3840_v28 }
 0xd71   : > { %v3642_v24 = vpack.c.bf16 %v3847_v38, %v3846_v42  ;;  %v3639_v37 = vpack.c.bf16 %v3842_v35, %v3841_v1 }
 0xd72   : > { %v3850_v40 = vpop.permute.xlu0 %3849 }
 0xd73   : > { %v3852_v13 = vunpack.i.h.bf16 %v3850_v40  ;;  %v3851_v51 = vunpack.i.l.bf16 %v3850_v40  ;;  %3629 = vmatpush3.bf16.xpose.msk.msra.mxu0 %vm4425_vm3, %v3627_v16  ;;  %3643 = vmatprep.subr.bf16.mxu1 %v3642_v24 }
 0xd74   : > { %3645 = vmatpush3.bf16.msra.mxu1 %v3642_v24  ;;  %3630 = vmatprep.subr.bf16.mxu0 %v4013_v3 }
 0xd75   : > { %v3646_v27 = vpack.c.bf16 %v3852_v13, %v3851_v51 }
 0xd76   : > { %v2107_v53 = vpop.permute.xlu0 %2106 }
 0xd77   : > { %3647 = vmatprep.subr.bf16.mxu1 %v3646_v27  ;;  %3397 = vmatprep.mubr.msk.f32.mxu1 %vm439_vm2, %v2107_v53 }
 0xd78   : > { %3649 = vmatpush3.bf16.msra.mxu1 %v3646_v27 }
 0xd79   : > { %3650 = vmatprep.subr.bf16.mxu1 %v4013_v3 }
 0xd7a   : > { %v2109_v4 = vpop.permute.xlu0 %2108 }
 0xd7b   : > { %3633 = vmatpush3.bf16.xpose.msk.msra.mxu0 %vm4425_vm3, %v3631_v26  ;;  %3398 = vmatmul.mubr.msk.f32.vlgmr.msra.gmra.mrb[12].mxu1 %vm439_vm2, %v2109_v4 }
 0xd7c   : > { %3634 = vmatprep.subr.bf16.mxu0 %v4013_v3 }
 0xd7e   : > { %v2113_v29 = vpop.permute.xlu0 %2112 }
 0xd82   : > { %v2115_v59 = vpop.permute.xlu0 %2114 }
 0xd83   : > { %3637 = vmatpush3.bf16.xpose.msk.msra.mxu0 %vm4425_vm3, %v3635_v31 }
 0xd84   : > { %3638 = vmatprep.subr.bf16.mxu0 %v4013_v3 }
 0xd86   : > { %v2119_v60 = vpop.permute.xlu0 %2118 }
 0xd8a   : > { %v2111_v0 = vpop.permute.xlu0 %2110 }
 0xd8b   : > { %3641 = vmatpush3.bf16.xpose.msk.msra.mxu0 %vm4425_vm3, %v3639_v37  ;;  %3400 = vmatprep.mubr.msk.f32.mxu1 %vm439_vm2, %v2111_v0 }
 0xd8c   : > { %3401 = vmatmul.mubr.msk.f32.gmra.mrb[14].mxu1 %vm439_vm2, %v2113_v29  ;;  %3668 = vmatprep.subr.bf16.mxu0 %v4013_v3 }
 0xd8d   : > { %3403 = vmatprep.mubr.msk.f32.mxu1 %vm439_vm2, %v2115_v59 }
 0xd8e   : > { %v2121_v12 = vpop.permute.xlu0 %2120 }
 0xd92   : > { %v2117_v15 = vpop.permute.xlu0 %2116  ;;  %3381 = vmatmul.mubr.msk.f32.vlgmr.msra.gmra.mrb[42].mxu0 %vm439_vm2, %v4836_v34 }
 0xd93   : > { %3404 = vmatmul.mubr.msk.f32.gmra.mrb[16].mxu1 %vm439_vm2, %v2117_v15  ;;  %3383 = vmatprep.mubr.msk.f32.mxu0 %vm4014_vm0, %v4015_v6 }
 0xd94   : > { %3406 = vmatprep.mubr.msk.f32.mxu1 %vm439_vm2, %v2119_v60 }
 0xd96   : > { %3384 = vmatmul.mubr.msk.f32.gmra.mrb[44].mxu0 %vm439_vm2, %v4839_v57  ;;  %v2125_v49 = vpop.permute.xlu0 %2124 }
 0xd97   : > { %3407 = vmatmul.mubr.msk.f32.gmra.mrb[18].mxu1 %vm439_vm2, %v2121_v12  ;;  %3386 = vmatprep.mubr.msk.f32.mxu0 %vm4014_vm0, %v4015_v6 }
 0xd9a   : > { %3387 = vmatmul.mubr.msk.f32.gmra.mrb[46].mxu0 %vm439_vm2, %v4847_v46  ;;  %v2127_v42 = vpop.permute.xlu0 %2126 }
 0xd9b   : > { %3456 = vmatprep.mubr.msk.f32.mxu0 %vm4014_vm0, %v4015_v6 }
 0xd9e   : > { %v2129_v43 = vpop.permute.xlu0 %2128 }
 0xe4e   : > { %v3399_v54 = vpop.f32.mrb[12].mxu1 }
 0xe4f   : > { %v2236_v34 = vpop.f32.mrb[13].mxu1 }
 0xe50   : > { %v3651_v58 = vpack.c.bf16 %v3399_v54, %v2236_v34 }
 0xe52   : > { %3652 = vmatpush3.bf16.msra.mxu1 %v3651_v58 }
 0xe53   : > { %3653 = vmatprep.subr.bf16.mxu1 %v4013_v3 }
 0xe5f   : > { %v3402_v45 = vpop.f32.mrb[14].mxu1 }
 0xe60   : > { %v2246_v5 = vpop.f32.mrb[15].mxu1 }
 0xe61   : > { %v3654_v57 = vpack.c.bf16 %v3402_v45, %v2246_v5 }
 0xe63   : > { %3655 = vmatpush3.bf16.msra.mxu1 %v3654_v57 }
 0xe64   : > { %3656 = vmatprep.subr.bf16.mxu1 %v4013_v3 }
 0xe65   : > { %v1912_v7 = vpop.f32.mrb[42].mxu0 }
 0xe66   : > { %v1913_v18 = vadd.f32 %v3931_v17, %v1912_v7  ;;  %v3382_v14 = vpop.f32.mrb[43].mxu0  ;;  %v3405_v9 = vpop.f32.mrb[16].mxu1 }
 0xe67   : > { %v2256_v47 = vpop.f32.mrb[17].mxu1 }
 0xe68   : > { %v3657_v48 = vpack.c.bf16 %v3405_v9, %v2256_v47  ;;  %v1926_v8 = vsel %vm844_vm4, %v1913_v18, -inf }
 0xe69   : > { %1927 = vmax.xlane.f32.xlu1 %v1926_v8  ;;  %v4958_v32 = vpop.f32.mrb[44].mxu0  ;;  %v3932_v8 = vld [vmem:[%s5278_s3 + $0x8] sm:$0xff] }
 0xe6a   : > { %v3385_v10 = vpop.f32.mrb[45].mxu0  ;;  %v3408_v22 = vpop.f32.mrb[18].mxu1  ;;  %3658 = vmatpush3.bf16.msra.mxu1 %v3657_v48 }
 0xe6b   : > { %v2266_v23 = vpop.f32.mrb[19].mxu1  ;;  %3659 = vmatprep.subr.bf16.mxu1 %v4013_v3  ;;  %v1918_v10 = vadd.f32 %v3932_v8, %v4958_v32 }
 0xe6c   : > { %v3660_v20 = vpack.c.bf16 %v3408_v22, %v2266_v23  ;;  %v3933_v23 = vld [vmem:[%s5278_s3 + $0x10] sm:$0xff] }
 0xe6d   : > { %v4961_v21 = vpop.f32.mrb[46].mxu0 }
 0xe6e   : > { %v3388_v36 = vpop.f32.mrb[47].mxu0  ;;  %3661 = vmatpush3.bf16.msra.mxu1 %v3660_v20  ;;  %v1929_v20 = vsel %vm844_vm4, %v1918_v10, -inf }
 0xe6f   : > { %3662 = vmatprep.subr.bf16.mxu1 %v4013_v3 }
 0xe7a   : > { %2122 = vrot.lane.b32.xlu1 %v1773_v11, %s4018_s29 }
 0xef6   : > { %v1928_v50 = vpop.xlane.xlu1 %1927 }
 0xef7   : > { %v1935_v38 = vsub.f32 %v1913_v18, %v1928_v50 }
 0xef9   : > { %v1938_v16 = vmul.f32 1.442695, %v1935_v38 }
 0xefa   : > { %v2123_v24 = vpop.permute.xlu1 %2122 }
 0xefb   : > { %3901 = vpow2.f32 %v1938_v16  ;;  %3409 = vmatprep.mubr.msk.f32.mxu1 %vm439_vm2, %v2123_v24 }
 0xefc   : > { %3410 = vmatmul.mubr.msk.f32.gmra.mrb[20].mxu1 %vm439_vm2, %v2125_v49 }
 0xefd   : > { %3412 = vmatprep.mubr.msk.f32.mxu1 %vm439_vm2, %v2127_v42 }
 0xf00   : > { %3413 = vmatmul.mubr.msk.f32.gmra.mrb[22].mxu1 %vm439_vm2, %v2129_v43 }
 0xf01   : > { %3439 = vmatprep.mubr.msk.f32.mxu1 %vm4014_vm0, %v4015_v6 }
 0xf05   : > { %v3902_v19 = vpop.eup %3901 }
 0xf06   : > { %1974 = vrot.lane.b32.xlu1 %v3902_v19, %s4020_s25  ;;  %1956 = vrot.lane.b32.xlu0 %v3902_v19, %s4019_s24  ;;  %v1944_v46 = vsel %vm863_vm5, %v3902_v19, 0.0 }
 0xf0a   : > { %1992 = vrot.lane.b32.xlu0 %v3902_v19, %s5290_s23 }
 0xf2a   : > { %1945 = vadd.xlane.f32.xlu1 %v1944_v46 }
 0xf78   : > { %v1957_v40 = vpop.permute.xlu0 %1956  ;;  %v1975_v51 = vpop.permute.xlu1 %1974 }
 0xf79   : > { %v1965_v13 = vsel %vm863_vm5, %v1957_v40, 0.0  ;;  %v1983_v52 = vsel %vm863_vm5, %v1975_v51, 0.0  ;;  %v1584_v51 = vld [vmem:[%s5279_s4 + $0x58] sm:$0xff] }
 0xf7a   : > { %1966 = vadd.xlane.f32.xlu0 %v1965_v13  ;;  %v1583_v13 = vld [vmem:[%s5279_s4 + $0x48] sm:$0xff] }
 0xf7c   : > { %v1993_v25 = vpop.permute.xlu0 %1992 }
 0xf7d   : > { %v2001_v27 = vsel %vm863_vm5, %v1993_v25, 0.0  ;;  %v1586_v25 = vld [vmem:[%s5279_s4 + $0x78] sm:$0xff] }
 0xf7e   : > { %1984 = vadd.xlane.f32.xlu0 %v1983_v52  ;;  %v3669_v52 = vpack.c.bf16 %v1584_v51, %v1583_v13 }
 0xf80   : > { %3670 = vmatpush3.bf16.msra.mxu0 %v3669_v52  ;;  %v1593_v52 = vld [vmem:[%s5280_s5 + $0xb0] sm:$0xff] }
 0xf81   : > { %3671 = vmatprep.subr.bf16.mxu0 %v4013_v3 }
 0xf82   : > { %2002 = vadd.xlane.f32.xlu0 %v2001_v27 }
 0xfb7   : > { %v1946_v59 = vpop.xlane.xlu1 %1945 }
 0xfcf   : > { %v3411_v53 = vpop.f32.mrb[20].mxu1 }
 0xfd0   : > { %v2276_v26 = vpop.f32.mrb[21].mxu1 }
 0xfd1   : > { %v3663_v4 = vpack.c.bf16 %v3411_v53, %v2276_v26 }
 0xfd3   : > { %v3414_v56 = vpop.f32.mrb[22].mxu1  ;;  %3664 = vmatpush3.bf16.msra.mxu1 %v3663_v4 }
 0xfd4   : > { %v2286_v30 = vpop.f32.mrb[23].mxu1  ;;  %3665 = vmatprep.subr.bf16.mxu1 %v4013_v3 }
 0xfd5   : > { %v3666_v29 = vpack.c.bf16 %v3414_v56, %v2286_v30 }
 0xfd7   : > { %3667 = vmatpush3.bf16.msra.mxu1 %v3666_v29 }
 0xfd8   : > { %3674 = vmatprep.subr.bf16.mxu1 %v4013_v3 }
0x1007   : > { %v1967_v31 = vpop.xlane.xlu0 %1966 }
0x1008   : > { %v2010_v35 = vsel %vm930_vm6, %v1946_v59, %v1967_v31 }
0x100b   : > { %v1985_v28 = vpop.xlane.xlu0 %1984 }
0x100c   : > { %v2013_v1 = vsel %vm934_vm7, %v2010_v35, %v1985_v28 }
0x100f   : > { %v2003_v60 = vpop.xlane.xlu0 %2002 }
0x1010   : > { %v2016_v37 = vsel %vm938_vm8, %v2013_v1, %v2003_v60 }
0x1011   : > { %3903 = vrcp.f32 %v2016_v37 }
0x101b   : > { %v3904_v0 = vpop.eup %3903 }
0x101c   : > { %2041 = vperm.xlu0 %3810, %v3904_v0   ;;  %2024 = vperm.xlu1 %3853, %v3904_v0  }
0x1020   : > { %3854 = vset.pattern.permute.xlu1 %v4024_v63  ;;  %3856 = vset.pattern.permute.xlu0 %v4023_v39 }
0x1021   : > { %2056 = vperm.xlu1 %3854, %v3904_v0  }
0x1025   : > { %3855 = vset.pattern.permute.xlu1 %v4025_v2 }
0x1026   : > { %2071 = vperm.xlu1 %3855, %v3904_v0  }
0x102a   : > { %2388 = vrot.lane.b32.xlu1 %v4833_v55, %s4017_s9 }
0x102b   : > { %3857 = vset.pattern.permute.xlu1 %v4022_v62 }
0x109b   : > { %v2025_v12 = vpop.permute.xlu1 %2024  ;;  %v2042_v15 = vpop.permute.xlu0 %2041 }
0x109c   : > { %v2052_v34 = vmul.f32 %v3902_v19, %v2042_v15  ;;  %v2037_v58 = vmul.f32 %v3902_v19, %v2025_v12 }
0x109e   : > { %v2085_v57 = vsel %vm863_vm5, %v2037_v58, %v2052_v34 }
0x10a0   : > { %v2057_v54 = vpop.permute.xlu1 %2056 }
0x10a1   : > { %v2067_v45 = vmul.f32 %v3902_v19, %v2057_v54 }
0x10a3   : > { %v2088_v17 = vsel %vm321_vm1, %v2085_v57, %v2067_v45 }
0x10a5   : > { %v2072_v5 = vpop.permute.xlu1 %2071 }
0x10a6   : > { %v2082_v7 = vmul.f32 %v3902_v19, %v2072_v5 }
0x10a8   : > { %v2091_v18 = vsel %vm1014_vm9, %v2088_v17, %v2082_v7 }
0x10a9   : > { %3440 = vmatmul.mubr.msk.f32.vlgmr.msra.gmra.mrb[24].mxu1 %vm844_vm4, %v2091_v18  ;;  %v4997_v14 = vpop.permute.xlu1 %2388 }
0x10aa   : > { %3442 = vmatprep.mubr.msk.f32.mxu1 %vm4014_vm0, %v4015_v6 }
0x117c   : > { %v2370_v55 = vpop.f32.mrb[24].mxu1 }
0x117d   : > { %v2384_v9 = vadd.f32 %v2370_v55, %v4765_v33  ;;  %v3441_v47 = vpop.f32.mrb[25].mxu1  ;;  %v1923_v33 = vadd.f32 %v3933_v23, %v4961_v21 }
0x117f   : > { %v5001_v48 = vadd.f32 %v4997_v14, %v2384_v9  ;;  %v1932_v36 = vsel %vm844_vm4, %v1923_v33, -inf }
0x1181   : > { %v2394_v22 = vsel %vm439_vm2, %v5001_v48, 0.0 }
0x1182   : > { %2395 = vadd.xlane.f32.xlu0 %v2394_v22 }
0x1186   : > { %1930 = vmax.xlane.f32.xlu0 %v1929_v20 }
0x118a   : > { %1933 = vmax.xlane.f32.xlu0 %v1932_v36 }
0x11a0   : > { %2433 = vrot.lane.b32.xlu0 %v4798_v61, %s4018_s29 }
0x120f   : > { %v2396_v32 = vpop.xlane.xlu0 %2395 }
0x1210   : > { %v2403_v11 = vmul.f32 0.03125, %v2396_v32 }
0x1212   : > { %v2406_v49 = vsub.f32 %v5001_v48, %v2403_v11 }
0x1213   : > { %v1931_v50 = vpop.xlane.xlu0 %1930 }
0x1214   : > { %v1936_v38 = vsub.f32 %v1918_v10, %v1931_v50  ;;  %v2409_v42 = vmul.f32 %v2406_v49, %v2406_v49  ;;  %v1587_v50 = vld [vmem:[%s5280_s5 + $0x80] sm:$0xff] }
0x1216   : > { %v1940_v16 = vmul.f32 1.442695, %v1936_v38  ;;  %v2412_v24 = vsel %vm439_vm2, %v2409_v42, 0.0  ;;  %v1588_v38 = vld [vmem:[%s5280_s5 + $0x88] sm:$0xff] }
0x1217   : > { %2413 = vadd.xlane.f32.xlu1 %v2412_v24  ;;  %v1934_v21 = vpop.xlane.xlu0 %1933  ;;  %v3675_v42 = vpack.c.bf16 %v1588_v38, %v1587_v50  ;;  %v1590_v24 = vld [vmem:[%s5280_s5 + $0x98] sm:$0xff] }
0x1218   : > { %3905 = vpow2.f32 %v1940_v16  ;;  %v1937_v43 = vsub.f32 %v1923_v33, %v1934_v21  ;;  %v1589_v16 = vld [vmem:[%s5280_s5 + $0x90] sm:$0xff] }
0x1219   : > { %3676 = vmatpush3.bf16.msra.mxu1 %v3675_v42  ;;  %v3678_v21 = vpack.c.bf16 %v1590_v24, %v1589_v16 }
0x121a   : > { %v1942_v19 = vmul.f32 1.442695, %v1937_v43  ;;  %3677 = vmatprep.subr.bf16.mxu1 %v4013_v3  ;;  %v1591_v43 = vld [vmem:[%s5280_s5 + $0xa0] sm:$0xff] }
0x121b   : > { %v5055_v29 = vpop.permute.xlu0 %2433 }
0x121c   : > { %3907 = vpow2.f32 %v1942_v19  ;;  %v1592_v19 = vld [vmem:[%s5280_s5 + $0xa8] sm:$0xff] }
0x121d   : > { %3679 = vmatpush3.bf16.msra.mxu1 %v3678_v21  ;;  %v3681_v13 = vpack.c.bf16 %v1592_v19, %v1591_v43 }
0x121e   : > { %3680 = vmatprep.subr.bf16.mxu1 %v4013_v3 }
0x1221   : > { %3682 = vmatpush3.bf16.msra.mxu1 %v3681_v13 }
0x1222   : > { %v5019_v46 = vpop.eup %3905  ;;  %3683 = vmatprep.subr.bf16.mxu1 %v4013_v3 }
0x1223   : > { %1994 = vrot.lane.b32.xlu0 %v5019_v46, %s5290_s23  ;;  %v1947_v53 = vsel %vm863_vm5, %v5019_v46, 0.0 }
0x1226   : > { %v5023_v40 = vpop.eup %3907 }
0x1227   : > { %1978 = vrot.lane.b32.xlu0 %v5023_v40, %s4020_s25  ;;  %v1950_v5 = vsel %vm863_vm5, %v5023_v40, 0.0 }
0x1228   : > { %2439 = vrot.lane.b32.xlu1 %v4798_v61, %s4017_s9  ;;  %v1585_v61 = vld [vmem:[%s5279_s4 + $0x68] sm:$0xff]  ;;  %s3952_s9 = scalar_lea.vmem %s3951_s21, 32 }
0x1229   : > { %v3672_v27 = vpack.c.bf16 %v1586_v25, %v1585_v61  ;;  %v1594_v61 = vld [vmem:[%s5280_s5 + $0xb8] sm:$0xff] }
0x122a   : > { %v3684_v25 = vpack.c.bf16 %v1594_v61, %v1593_v52 }
0x122b   : > { %3673 = vmatpush3.bf16.msra.mxu0 %v3672_v27  ;;  %v1596_v27 = vld [vmem:[%s5280_s5 + $0xc8] sm:$0xff] }
0x122c   : > { %1958 = vrot.lane.b32.xlu1 %v5019_v46, %s4019_s24  ;;  %3698 = vmatprep.subr.bf16.mxu0 %v4013_v3 }
0x122d   : > { %3685 = vmatpush3.bf16.msra.mxu1 %v3684_v25 }
0x122e   : > { %3686 = vmatprep.subr.bf16.mxu1 %v4013_v3 }
0x1230   : > { %1976 = vrot.lane.b32.xlu1 %v5019_v46, %s4020_s25  ;;  %s2770_s25 = sld [smem:[#allocation3 + %s4096_s13]] }
0x1234   : > { %1960 = vrot.lane.b32.xlu1 %v5023_v40, %s4019_s24 }
0x1238   : > { %1996 = vrot.lane.b32.xlu1 %v5023_v40, %s5290_s23 }
0x1246   : > { %1948 = vadd.xlane.f32.xlu0 %v1947_v53 }
0x1295   : > { %v1995_v1 = vpop.permute.xlu0 %1994 }
0x1296   : > { %v2004_v12 = vsel %vm863_vm5, %v1995_v1, 0.0 }
0x1299   : > { %v1979_v57 = vpop.permute.xlu0 %1978 }
0x129a   : > { %v1989_v7 = vsel %vm863_vm5, %v1979_v57, 0.0 }
0x12a4   : > { %v2414_v26 = vpop.xlane.xlu1 %2413 }
0x12a5   : > { %v2421_v4 = vmul.f32 0.03125, %v2414_v26  ;;  %v1598_v26 = vld [vmem:[%s5280_s5 + $0xd8] sm:$0xff] }
0x12a7   : > { %v2424_v56 = vadd.f32 1e-06, %v2421_v4 }
0x12a8   : > { %v5053_v30 = vpop.permute.xlu1 %2439 }
0x12a9   : > { %3909 = vrsqrt.f32 %v2424_v56  ;;  %v1599_v56 = vld [vmem:[%s5280_s5 + $0xe0] sm:$0xff] }
0x12ac   : > { %v1959_v31 = vpop.permute.xlu1 %1958 }
0x12ad   : > { %v1968_v28 = vsel %vm863_vm5, %v1959_v31, 0.0 }
0x12ae   : > { %1969 = vadd.xlane.f32.xlu1 %v1968_v28  ;;  %v1601_v28 = vld [vmem:[%s5280_s5 + $0xf0] sm:$0xff] }
0x12b0   : > { %v1977_v59 = vpop.permute.xlu1 %1976 }
0x12b1   : > { %v1986_v35 = vsel %vm863_vm5, %v1977_v59, 0.0  ;;  %v1602_v59 = vld [vmem:[%s5280_s5 + $0xf8] sm:$0xff] }
0x12b2   : > { %1987 = vadd.xlane.f32.xlu0 %v1986_v35  ;;  %v3696_v35 = vpack.c.bf16 %v1602_v59, %v1601_v28 }
0x12b3   : > { %v3910_v60 = vpop.eup %3909 }
0x12b4   : > { %v2430_v37 = vmul.f32 %v3910_v60, %v2406_v49  ;;  %v1961_v0 = vpop.permute.xlu1 %1960 }
0x12b5   : > { %v1971_v15 = vsel %vm863_vm5, %v1961_v0, 0.0 }
0x12b6   : > { %v2436_v54 = vmul.f32 %v5055_v29, %v2430_v37  ;;  %1972 = vadd.xlane.f32.xlu1 %v1971_v15  ;;  %2005 = vadd.xlane.f32.xlu0 %v2004_v12 }
0x12b8   : > { %v2442_v34 = vadd.f32 %v5053_v30, %v2436_v54  ;;  %v1997_v58 = vpop.permute.xlu1 %1996 }
0x12b9   : > { %v2007_v45 = vsel %vm863_vm5, %v1997_v58, 0.0 }
0x12ba   : > { %2008 = vadd.xlane.f32.xlu1 %v2007_v45  ;;  %3457 = vmatmul.mubr.msk.f32.vlgmr.msra.gmra.mrb[48].mxu0 %vm439_vm2, %v2442_v34 }
0x12bb   : > { %1951 = vadd.xlane.f32.xlu0 %v1950_v5  ;;  %3459 = vmatprep.mubr.msk.f32.mxu0 %vm4014_vm0, %v4015_v6 }
0x12bf   : > { %1990 = vadd.xlane.f32.xlu0 %v1989_v7 }
0x12d3   : > { %v1949_v17 = vpop.xlane.xlu0 %1948 }
0x133b   : > { %v1970_v18 = vpop.xlane.xlu1 %1969 }
0x133c   : > { %v2011_v9 = vsel %vm930_vm6, %v1949_v17, %v1970_v18 }
0x133f   : > { %v1988_v55 = vpop.xlane.xlu0 %1987 }
0x1340   : > { %v2014_v47 = vsel %vm934_vm7, %v2011_v9, %v1988_v55 }
0x1343   : > { %v2006_v8 = vpop.xlane.xlu0 %2005  ;;  %v1973_v23 = vpop.xlane.xlu1 %1972 }
0x1344   : > { %v2017_v10 = vsel %vm938_vm8, %v2014_v47, %v2006_v8 }
0x1345   : > { %3911 = vrcp.f32 %v2017_v10 }
0x1347   : > { %v2009_v11 = vpop.xlane.xlu1 %2008 }
0x1348   : > { %v1952_v22 = vpop.xlane.xlu0 %1951 }
0x1349   : > { %v2012_v20 = vsel %vm930_vm6, %v1952_v22, %v1973_v23 }
0x134c   : > { %v1991_v33 = vpop.xlane.xlu0 %1990 }
0x134d   : > { %v2015_v36 = vsel %vm934_vm7, %v2012_v20, %v1991_v33 }
0x134e   : > { %v2018_v49 = vsel %vm938_vm8, %v2015_v36, %v2009_v11 }
0x134f   : > { %v3912_v32 = vpop.eup %3911  ;;  %3913 = vrcp.f32 %v2018_v49 }
0x1350   : > { %2045 = vperm.xlu1 %3857, %v3912_v32   ;;  %2029 = vperm.xlu0 %3856, %v3912_v32  }
0x1354   : > { %3858 = vset.pattern.permute.xlu1 %v4024_v63  ;;  %3864 = vset.pattern.permute.xlu0 %v4025_v2 }
0x1355   : > { %2060 = vperm.xlu1 %3858, %v3912_v32  }
0x1359   : > { %3859 = vset.pattern.permute.xlu1 %v4025_v2  ;;  %v3914_v51 = vpop.eup %3913 }
0x135a   : > { %2075 = vperm.xlu1 %3859, %v3912_v32  }
0x135e   : > { %3860 = vset.pattern.permute.xlu1 %v4023_v39  ;;  %v1595_v39 = vld [vmem:[%s5280_s5 + $0xc0] sm:$0xff] }
0x135f   : > { %2034 = vperm.xlu1 %3860, %v3914_v51   ;;  %v3687_v53 = vpack.c.bf16 %v1596_v27, %v1595_v39  ;;  %v2973_v39 = vld [vmem:[%s5281_s6 + $0x7] ss:$0 sm:$0xff] }
0x1361   : > { %3688 = vmatpush3.bf16.msra.mxu1 %v3687_v53 }
0x1362   : > { %3689 = vmatprep.subr.bf16.mxu1 %v4013_v3 }
0x1363   : > { %3861 = vset.pattern.permute.xlu1 %v4022_v62  ;;  %v1597_v62 = vld [vmem:[%s5280_s5 + $0xd0] sm:$0xff] }
0x1364   : > { %2049 = vperm.xlu1 %3861, %v3914_v51   ;;  %v3690_v4 = vpack.c.bf16 %v1598_v26, %v1597_v62 }
0x1366   : > { %3691 = vmatpush3.bf16.msra.mxu1 %v3690_v4 }
0x1367   : > { %3692 = vmatprep.subr.bf16.mxu1 %v4013_v3 }
0x1368   : > { %3862 = vset.pattern.permute.xlu1 %v4024_v63  ;;  %v1600_v63 = vld [vmem:[%s5280_s5 + $0xe8] sm:$0xff] }
0x1369   : > { %2064 = vperm.xlu1 %3862, %v3914_v51   ;;  %v3693_v31 = vpack.c.bf16 %v1600_v63, %v1599_v56 }
0x136b   : > { %3694 = vmatpush3.bf16.msra.mxu1 %v3693_v31 }
0x136c   : > { %3695 = vmatprep.subr.bf16.mxu1 %v4013_v3 }
0x136d   : > { %3863 = vset.pattern.permute.xlu1 %v4025_v2  ;;  %v5141_v2 = vld [vmem:[%s5281_s6 + $0x6] ss:$0 sm:$0xff] }
0x136e   : > { %2079 = vperm.xlu1 %3863, %v3914_v51  }
0x136f   : > { %3697 = vmatpush3.bf16.msra.mxu1 %v3696_v35 }
0x138d   : > { %v2524_v1 = vpop.f32.mrb[48].mxu0 }
0x138e   : > { %v3458_v60 = vpop.f32.mrb[49].mxu0  ;;  %v2525_v37 = vadd.f32 %v5141_v2, %v2524_v1 }
0x1390   : > { %v2541_v0 = vmul.f32 0.044715, %v2525_v37  ;;  %v2538_v16 = vmul.f32 0.5, %v2525_v37 }
0x1392   : > { %v2544_v15 = vmul.f32 %v2541_v0, %v2525_v37 }
0x1394   : > { %v2547_v58 = vmul.f32 %v2544_v15, %v2525_v37 }
0x1396   : > { %v2550_v17 = vadd.f32 %v2547_v58, %v2525_v37 }
0x1398   : > { %v2553_v8 = vmul.f32 0.7978846, %v2550_v17  ;;  %v2652_v17 = vld [vmem:[%s5280_s5 + $0x140] sm:$0xff] }
0x139a   : > { %3915 = vtanh.f32 %v2553_v8 }
0x13a4   : > { %v3916_v36 = vpop.eup %3915 }
0x13a5   : > { %v2559_v38 = vadd.f32 1.0, %v3916_v36 }
0x13a7   : > { %v2562_v24 = vmul.f32 %v2559_v38, %v2538_v16 }
0x13cf   : > { %v2046_v12 = vpop.permute.xlu1 %2045  ;;  %v2030_v54 = vpop.permute.xlu0 %2029 }
0x13d0   : > { %v2053_v45 = vmul.f32 %v5019_v46, %v2046_v12  ;;  %v2038_v5 = vmul.f32 %v5019_v46, %v2030_v54  ;;  %v2667_v54 = vlaneseq }
0x13d2   : > { %v2086_v18 = vsel %vm863_vm5, %v2038_v5, %v2053_v45  ;;  %v2649_v45 = vld [vmem:[%s5281_s6 + $0x8] sm:$0x1] }
0x13d4   : > { %v2061_v34 = vpop.permute.xlu1 %2060 }
0x13d5   : > { %v2068_v57 = vmul.f32 %v5019_v46, %v2061_v34  ;;  %v2668_v34 = vshrl.u32 %v2667_v54, 7 }
0x13d7   : > { %v2089_v9 = vsel %vm321_vm1, %v2086_v18, %v2068_v57  ;;  %v2669_v58 = vsub.s32 0, %v2668_v34  ;;  %v2650_v57 = vld [vmem:[%s5280_s5 + $0x130] sm:$0xff] }
0x13d9   : > { %v2076_v7 = vpop.permute.xlu1 %2075  ;;  %v2670_v5 = vrot.slane %v2649_v45, %v2669_v58 }
0x13da   : > { %v2083_v55 = vmul.f32 %v5019_v46, %v2076_v7  ;;  %v2651_v7 = vld [vmem:[%s5280_s5 + $0x138] sm:$0xff] }
0x13db   : > { %v3699_v18 = vpack.c.bf16 %v2651_v7, %v2650_v57 }
0x13dc   : > { %v2092_v47 = vsel %vm1014_vm9, %v2089_v9, %v2083_v55  ;;  %v2653_v55 = vld [vmem:[%s5280_s5 + $0x148] sm:$0xff] }
0x13dd   : > { %3443 = vmatmul.mubr.msk.f32.gmra.mrb[26].mxu1 %vm844_vm4, %v2092_v47  ;;  %3700 = vmatpush3.bf16.msra.mxu0 %v3699_v18  ;;  %v3702_v9 = vpack.c.bf16 %v2653_v55, %v2652_v17 }
0x13de   : > { %v2035_v10 = vpop.permute.xlu1 %2034  ;;  %3445 = vmatprep.mubr.msk.f32.mxu1 %vm4014_vm0, %v4015_v6  ;;  %3701 = vmatprep.subr.bf16.mxu0 %v4013_v3 }
0x13df   : > { %v2039_v46 = vmul.f32 %v5023_v40, %v2035_v10 }
0x13e1   : > { %3703 = vmatpush3.bf16.msra.mxu0 %v3702_v9 }
0x13e3   : > { %v2050_v22 = vpop.permute.xlu1 %2049 }
0x13e4   : > { %v2054_v33 = vmul.f32 %v5023_v40, %v2050_v22 }
0x13e6   : > { %v2087_v11 = vsel %vm863_vm5, %v2039_v46, %v2054_v33 }
0x13e8   : > { %v2065_v23 = vpop.permute.xlu1 %2064 }
0x13e9   : > { %v2069_v20 = vmul.f32 %v5023_v40, %v2065_v23 }
0x13eb   : > { %v2090_v50 = vsel %vm321_vm1, %v2087_v11, %v2069_v20 }
0x13ed   : > { %v2080_v32 = vpop.permute.xlu1 %2079 }
0x13ee   : > { %v2084_v49 = vmul.f32 %v5023_v40, %v2080_v32 }
0x13f0   : > { %v2093_v42 = vsel %vm1014_vm9, %v2090_v50, %v2084_v49 }
0x13f1   : > { %3446 = vmatmul.mubr.msk.f32.gmra.mrb[28].mxu1 %vm844_vm4, %v2093_v42 }
0x13f2   : > { %3497 = vmatprep.mubr.msk.f32.mxu1 %vm4014_vm0, %v4015_v6 }
0x13f5   : > { %3498 = vmatmul.mubr.f32.vlgmr.msra.gmra.mrb[30].mxu1 %v2562_v24 }
0x13f6   : > { %3500 = vmatprep.mubr.msk.f32.mxu1 %vm4014_vm0, %v4015_v6 }
0x14b0   : > { %v2375_v21 = vpop.f32.mrb[26].mxu1 }
0x14b1   : > { %v2385_v43 = vadd.f32 %v2375_v21, %v4770_v41  ;;  %v3444_v40 = vpop.f32.mrb[27].mxu1 }
0x14b3   : > { %v2392_v19 = vadd.f32 %v4997_v14, %v2385_v43 }
0x14b5   : > { %v2397_v13 = vsel %vm439_vm2, %v2392_v19, 0.0 }
0x14b6   : > { %2398 = vadd.xlane.f32.xlu1 %v2397_v13 }
0x14c4   : > { %v2380_v51 = vpop.f32.mrb[28].mxu1 }
0x14c5   : > { %v2386_v52 = vadd.f32 %v2380_v51, %v4775_v44  ;;  %v3447_v61 = vpop.f32.mrb[29].mxu1 }
0x14c7   : > { %v2393_v25 = vadd.f32 %v4997_v14, %v2386_v52 }
0x14c8   : > { %v2631_v27 = vpop.f32.mrb[30].mxu1 }
0x14c9   : > { %v2643_v53 = vadd.f32 %v2631_v27, %v5001_v48  ;;  %v3499_v41 = vpop.f32.mrb[31].mxu1  ;;  %v2400_v62 = vsel %vm439_vm2, %v2393_v25, 0.0 }
0x14ca   : > { %2401 = vadd.xlane.f32.xlu0 %v2400_v62 }
0x14cb   : > { %v2648_v26 = vadd.f32 %v2973_v39, %v2643_v53 }
0x14cd   : > { %v2654_v4 = vsel %vm439_vm2, %v2648_v26, 0.0 }
0x14ce   : > { %2655 = vadd.xlane.f32.xlu0 %v2654_v4 }
0x1543   : > { %v2399_v56 = vpop.xlane.xlu1 %2398 }
0x1544   : > { %v2404_v44 = vmul.f32 0.03125, %v2399_v56 }
0x1546   : > { %v2407_v63 = vsub.f32 %v2392_v19, %v2404_v44 }
0x1548   : > { %v2410_v31 = vmul.f32 %v2407_v63, %v2407_v63 }
0x154a   : > { %v2415_v14 = vsel %vm439_vm2, %v2410_v31, 0.0 }
0x154b   : > { %2416 = vadd.xlane.f32.xlu1 %v2415_v14 }
0x1557   : > { %v2402_v28 = vpop.xlane.xlu0 %2401 }
0x1558   : > { %v2405_v59 = vmul.f32 0.03125, %v2402_v28 }
0x155a   : > { %v2408_v35 = vsub.f32 %v2393_v25, %v2405_v59 }
0x155b   : > { %v2656_v1 = vpop.xlane.xlu0 %2655 }
0x155c   : > { %v2657_v48 = vmul.f32 0.03125, %v2656_v1  ;;  %v2411_v60 = vmul.f32 %v2408_v35, %v2408_v35 }
0x155e   : > { %v2658_v37 = vsub.f32 %v2648_v26, %v2657_v48  ;;  %v2418_v0 = vsel %vm439_vm2, %v2411_v60, 0.0 }
0x155f   : > { %2419 = vadd.xlane.f32.xlu0 %v2418_v0 }
0x1560   : > { %v2659_v12 = vmul.f32 %v2658_v37, %v2658_v37 }
0x1562   : > { %v2660_v15 = vsel %vm439_vm2, %v2659_v12, 0.0 }
0x1563   : > { %2661 = vadd.xlane.f32.xlu1 %v2660_v15 }
0x1574   : > { %2678 = vrot.lane.b32.xlu1 %v2649_v45, %s4018_s29  ;;  %v2769_v45 = vand.u32 127, %v2667_v54 }
0x1575   : > { %2673 = vrot.lane.b32.xlu0 %v2670_v5, %s4016_s22  ;;  %s283_s22 = sand.u32 1, %s4002_s11  }
0x1576   : > { %s5216_s29 = scalar_lea.vmem [#allocation4], %s283_s22  ;;  %s2797_s14 = scalar_lea.sflag [#allocation5], %s283_s22 }
0x1577   : > { %s2812_s24 = sshll.u32 %s5216_s29, 4  ;;  %s2813_s24 = int_to_ptr.vmem [resolvable:$true] %s2812_s24 }
0x1578   : > { %s3946_s16 = scalar_lea.vmem %s2813_s24, 16  ;;  %p3953_p5 = scmp.lt.s32.totalorder %s2813_s24, %s3951_s21 }
0x1579   : > { %p3947_p2 = scmp.ne.s32.totalorder %s2813_s24, %s3946_s16  ;;  %p3954_p6 = scmp.lt.s32.totalorder %s3952_s9, %s3946_s16 }
0x157b   : > { %p3948_p3 = pnand %p3947_p2, %p4113_p10  ;;  %p3955_p7 = por %p3954_p6, %p3953_p5 }
0x157d   : > { %p3949_p4 = pneg %p3948_p3 }
0x157f   : > { %p3956_p8 = pnand %p3955_p7, %p3949_p4 }
0x15d8   : > { %v2417_v47 = vpop.xlane.xlu1 %2416 }
0x15d9   : > { %v2422_v8 = vmul.f32 0.03125, %v2417_v47 }
0x15db   : > { %v2425_v10 = vadd.f32 1e-06, %v2422_v8 }
0x15dd   : > { %3917 = vrsqrt.f32 %v2425_v10 }
0x15e7   : > { %v3918_v22 = vpop.eup %3917 }
0x15e8   : > { %v2431_v23 = vmul.f32 %v3918_v22, %v2407_v63 }
0x15ea   : > { %v2437_v33 = vmul.f32 %v5055_v29, %v2431_v23 }
0x15ec   : > { %v2420_v20 = vpop.xlane.xlu0 %2419  ;;  %v2443_v36 = vadd.f32 %v5053_v30, %v2437_v33 }
0x15ed   : > { %v2423_v46 = vmul.f32 0.03125, %v2420_v20 }
0x15ee   : > { %3460 = vmatmul.mubr.msk.f32.gmra.mrb[50].mxu0 %vm439_vm2, %v2443_v36 }
0x15ef   : > { %v2426_v32 = vadd.f32 1e-06, %v2423_v46  ;;  %3462 = vmatprep.mubr.msk.f32.mxu0 %vm4014_vm0, %v4015_v6 }
0x15f0   : > { %v2662_v3 = vpop.xlane.xlu1 %2661  ;;  %v2674_v43 = vpop.permute.xlu0 %2673 }
0x15f1   : > { %3919 = vrsqrt.f32 %v2426_v32  ;;  %v2663_v11 = vmul.f32 0.03125, %v2662_v3 }
0x15f3   : > { %v2664_v49 = vadd.f32 1e-06, %v2663_v11 }
0x15f4   : > { %v2679_v62 = vpop.permute.xlu1 %2678 }
0x15f5   : > { %3921 = vrsqrt.f32 %v2664_v49 }
0x15fb   : > { %v3920_v50 = vpop.eup %3919 }
0x15fc   : > { %v2432_v38 = vmul.f32 %v3920_v50, %v2408_v35 }
0x15fe   : > { %v2438_v42 = vmul.f32 %v5055_v29, %v2432_v38 }
0x15ff   : > { %v3922_v16 = vpop.eup %3921 }
0x1600   : > { %v2444_v24 = vadd.f32 %v5053_v30, %v2438_v42  ;;  %v2666_v21 = vmul.f32 %v3922_v16, %v2658_v37 }
0x1602   : > { %3463 = vmatmul.mubr.msk.f32.gmra.mrb[52].mxu0 %vm439_vm2, %v2444_v24  ;;  %v2671_v40 = vmul.f32 %v2670_v5, %v2666_v21  ;;  %v2771_v5 = vstv %s2770_s25 }
0x1603   : > { %3514 = vmatprep.mubr.msk.f32.mxu0 %vm4014_vm0, %v4015_v6  ;;  %vm2772_vm11 = vcmp.eq.s32.totalorder %v2769_v45, %v2771_v5 }
0x1604   : > { %v2676_v19 = vadd.f32 %v2674_v43, %v2671_v40  ;;  %v2975_v57 = vsel %vm2772_vm11, 1.0, %v4015_v6 }
0x1606   : > { %3515 = vmatmul.mubr.msk.f32.vlgmr.msra.gmra.mrb[54].mxu0 %vm439_vm2, %v2676_v19 }
0x16c1   : > { %v2529_v13 = vpop.f32.mrb[50].mxu0 }
0x16c2   : > { %v2530_v51 = vadd.f32 %v5141_v2, %v2529_v13  ;;  %v3461_v52 = vpop.f32.mrb[51].mxu0 }
0x16c4   : > { %v2542_v29 = vmul.f32 0.044715, %v2530_v51  ;;  %v2539_v44 = vmul.f32 0.5, %v2530_v51 }
0x16c6   : > { %v2545_v61 = vmul.f32 %v2542_v29, %v2530_v51 }
0x16c8   : > { %v2548_v25 = vmul.f32 %v2545_v61, %v2530_v51 }
0x16ca   : > { %v2551_v30 = vadd.f32 %v2548_v25, %v2530_v51 }
0x16cc   : > { %v2554_v39 = vmul.f32 0.7978846, %v2551_v30 }
0x16ce   : > { %3923 = vtanh.f32 %v2554_v39 }
0x16d5   : > { %v2534_v27 = vpop.f32.mrb[52].mxu0 }
0x16d6   : > { %v2535_v53 = vadd.f32 %v5141_v2, %v2534_v27  ;;  %v3464_v41 = vpop.f32.mrb[53].mxu0 }
0x16d8   : > { %v3924_v26 = vpop.eup %3923  ;;  %v2543_v4 = vmul.f32 0.044715, %v2535_v53  ;;  %v2540_v37 = vmul.f32 0.5, %v2535_v53 }
0x16d9   : > { %v2750_v56 = vpop.f32.mrb[54].mxu0  ;;  %v2560_v63 = vadd.f32 1.0, %v3924_v26 }
0x16da   : > { %v2546_v31 = vmul.f32 %v2543_v4, %v2535_v53  ;;  %v2751_v14 = vadd.f32 %v2750_v56, %v2679_v62  ;;  %v3516_v28 = vpop.f32.mrb[55].mxu0 }
0x16db   : > { %v2563_v59 = vmul.f32 %v2560_v63, %v2539_v44 }
0x16dc   : > { %v2756_v35 = vsel %vm2754_vm10, %v2751_v14, -inf  ;;  %v2549_v1 = vmul.f32 %v2546_v31, %v2535_v53  ;;  %2755 = vst.msk [vmem:[%s5216_s29] sm:$0x1] %vm2754_vm10, %v2751_v14  ;;  %v2775_v18 = vmul.f32 %v2975_v57, %v2751_v14 }
0x16dd   : > { %3501 = vmatmul.mubr.f32.gmra.mrb[32].mxu1 %v2563_v59  ;;  %2757 = vmax.xlane.f32.xlu1 %v2756_v35 }
0x16de   : > { %3503 = vmatprep.mubr.msk.f32.mxu1 %vm4014_vm0, %v4015_v6  ;;  %v2552_v2 = vadd.f32 %v2549_v1, %v2535_v53  ;;  %v2776_v55 = vsel %vm2754_vm10, %v2775_v18, 0.0 }
0x16e0   : > { %v2555_v48 = vmul.f32 0.7978846, %v2552_v2 }
0x16e2   : > { %3925 = vtanh.f32 %v2555_v48 }
0x16ec   : > { %v3926_v60 = vpop.eup %3925 }
0x16ed   : > { %v2561_v0 = vadd.f32 1.0, %v3926_v60 }
0x16ef   : > { %v2564_v12 = vmul.f32 %v2561_v0, %v2540_v37 }
0x16f1   : > { %3504 = vmatmul.mubr.f32.gmra.mrb[34].mxu1 %v2564_v12 }
0x176a   : > { %v2758_v15 = vpop.xlane.xlu1 %2757 }
0x176b   : > { %v2759_v34 = vsub.f32 %v2751_v14, %v2758_v15 }
0x176d   : > { %v2760_v58 = vmul.f32 1.442695, %v2759_v34 }
0x176f   : > { %3927 = vpow2.f32 %v2760_v58 }
0x1779   : > { %v3928_v7 = vpop.eup %3927 }
0x177a   : > { %v2762_v17 = vsel %vm2754_vm10, %v3928_v7, 0.0 }
0x177b   : > { %2763 = vadd.xlane.f32.xlu0 %v2762_v17 }
0x177f   : > { %2777 = vadd.xlane.f32.xlu0 %v2776_v55 }
0x17b0   : > { %v2636_v9 = vpop.f32.mrb[32].mxu1 }
0x17b1   : > { %v3502_v47 = vpop.f32.mrb[33].mxu1 }
0x17c4   : > { %v2640_v8 = vpop.f32.mrb[34].mxu1 }
0x17c5   : > { %v3505_v10 = vpop.f32.mrb[35].mxu1 }
0x17c6   : > { %3959 = shalt.err (!%p3956_p8)
}
0x17c7   : > { %s3960_s27 = scalar_lea.hbm %s5232_s30, 16  ;;  %s3964_s25 = scalar_lea.hbm %s5283_s8, 32 }
0x17c8   : > { %p3961_p9 = scmp.ne.s32.totalorder %s5232_s30, %s3960_s27  ;;  %p3965_p0 = scmp.lt.u32.totalorder %s5232_s30, %s5283_s8 }
0x17c9   : > { %p3966_p1 = scmp.lt.u32.totalorder %s3964_s25, %s3960_s27  ;;  %p3968_p3 = scmp.lt.u32.totalorder %s3960_s27, %s5232_s30 }
0x17ca   : > { %p3962_p12 = pnand %p3961_p9, %p4113_p10 }
0x17cb   : > { %p3967_p2 = por %p3966_p1, %p3965_p0 }
0x17cc   : > { %p3963_p13 = pneg %p3962_p12 }
0x17cd   : > { %p3969_p4 = por %p3968_p3, %p3967_p2 }
0x17cf   : > { %p3970_p5 = pnand %p3969_p4, %p3963_p13 }
0x17d1   : > { %3973 = shalt.err (!%p3970_p5)
}
0x17d2   : > { %3708 = dma.vmem_to_hbm [thread:$0]  (%p4113_p10), %s2813_s24, 16, %s5232_s30, %s2797_s14   ;;  %vm2791_vm12 = vcmask 0  }
0x17d3   : > { %p291_p6 = scmp.lt.s32.totalorder %s4096_s13, 1 }
0x17d5   : > { %s5298_s13 = smov (!%p291_p6, %s4096_s13), 1 }
0x17d6   : > { %s293_s14 = scalar_lea.vmem %s5282_s7, %s5298_s13 }
0x1808   : > { %v2764_v6 = vpop.xlane.xlu0 %2763 }
0x1809   : > { %3929 = vlog2.f32 %v2764_v6 }
0x180c   : > { %v2778_v54 = vpop.xlane.xlu0 %2777 }
0x180d   : > { %v2779_v22 = vrot.slane %v2778_v54, 4 }
0x180f   : > { %v2780_v23 = vadd.f32 %v2779_v22, %v2778_v54 }
0x1811   : > { %v2781_v33 = vrot.slane %v2780_v23, 2 }
0x1813   : > { %v3930_v20 = vpop.eup %3929  ;;  %v2782_v36 = vadd.f32 %v2781_v33, %v2780_v23 }
0x1814   : > { %v2766_v46 = vmul.f32 0.6931472, %v3930_v20 }
0x1815   : > { %v2783_v32 = vrot.slane %v2782_v36, 1 }
0x1816   : > { %v2767_v3 = vadd.f32 %v2766_v46, %v2758_v15 }
0x1817   : > { %v2784_v11 = vadd.f32 %v2783_v32, %v2782_v36 }
0x1819   : > { %3704 = vpush %v2784_v11 }
0x181a   : > { %3706 = vpush %v2767_v3 }
0x184a   : > { %s3705_s19 = spop %3704 }
0x184b   : > { %s3707_s28 = spop %3706 }
0x184c   : > { %s2789_s16 = ssub.f32 %s3707_s28, %s3705_s19 }
0x184e   : > { %v2790_v49 = vstv %s2789_s16 }
0x184f   : > { %2792 = vst.msk [vmem:[%s293_s14] sm:$0x1] %vm2791_vm12, %v2790_v49 }
0x1850 PF: > { %p3714_p10 = scmp.ge.s32.totalorder %s4010_s12, 2  ;;  %s2830_s17 = sand.u32 1, %s3998_s10  }
0x1851   : > { %s2831_s21 = scalar_lea.sflag [#allocation5], %s2830_s17 }
0x1852   : > { %p3711_p7 = pnand %p3714_p10, %p4117_p11 }
0x1854   : > { %3993 = dma.done.wait (!%p3711_p7), %s2831_s21, 16  }
0x1855   : > { %3995 = vsyncadd (!%p3711_p7), %s2831_s21, 4294967280  ;;  %p25_p8 = scmp.ge.s32.totalorder %s4100_s15, 4   ;;  %s5291_s10 = smov %s4002_s11 }
0x1856   : > { %s5292_s11 = smov %s4006_s0  ;;  %s5293_s0 = smov %s4111_s18 }
0x1857   : > { %s5294_s12 = smov %s4100_s15  ;;  %27 = sbr.rel (!%p25_p8) target bundleno = 18 (0x12), region = 91 }
0x185e   :  { %2835 = vsyncpa [#allocation5], 1 }
0x185f   :  { %2837 = vsyncpa [#allocation5 + $0x1], 1 }

</bundles_post_ra>
